<compile_context>
chip_gen: v5e
topology: v5e:2x2
jax: 0.10.0
libtpu: 0.0.40
codegen_flags: <defaults>
</compile_context>

<pallas_src>
import functools

import jax
import jax.numpy as jnp
from jax.experimental import pallas as pl
from jax.experimental.pallas import tpu as pltpu

LN_EPS = 1e-5                 # PyTorch nn.LayerNorm default
ACT_DTYPE = jnp.bfloat16      # inter-kernel activation storage dtype
LANE = 128
# Explicit scoped-VMEM limit (review: required headroom for v7x at production dims;
# harmless at the toy sizes used here).
VMEM_LIMIT_BYTES = 64 * 1024 * 1024

_CPARAMS = pltpu.CompilerParams(dimension_semantics=("parallel",),
                                vmem_limit_bytes=VMEM_LIMIT_BYTES)


def _round_up(x, m):
    return (x + m - 1) // m * m


# ----------------------------------------------------------------------------
# Feature probes (run once at import): keep the main model compiling even on
# builds without Buffered(1) single-buffering or an erf lowering.
# ----------------------------------------------------------------------------

def _probe(fn):
    try:
        jax.block_until_ready(fn())
        return True
    except Exception:
        return False


def _probe_buffered():
    def k(w_ref, x_ref, o_ref):
        o_ref[...] = x_ref[...] + w_ref[...]
    x = jnp.ones((16, 128), jnp.float32)
    w = jnp.ones((8, 128), jnp.float32)
    return pl.pallas_call(
        k,
        out_shape=jax.ShapeDtypeStruct((16, 128), jnp.float32),
        grid=(2,),
        in_specs=[pl.BlockSpec((8, 128), lambda i: (0, 0), pipeline_mode=pl.Buffered(1)),
                  pl.BlockSpec((8, 128), lambda i: (i, 0))],
        out_specs=pl.BlockSpec((8, 128), lambda i: (i, 0)),
    )(w, x)


def _probe_exact_gelu():
    def k(x_ref, o_ref):
        o_ref[...] = jax.nn.gelu(x_ref[...], approximate=False)
    x = jnp.ones((8, 128), jnp.float32)
    return pl.pallas_call(
        k, out_shape=jax.ShapeDtypeStruct((8, 128), jnp.float32))(x)


_BUFFERED_OK = _probe(_probe_buffered)
_EXACT_GELU_OK = _probe(_probe_exact_gelu)


def _const_spec(shape):
    """BlockSpec for a grid-invariant operand (weights / biases / pos-embed).

    Single-buffered when supported so default double-buffering does not duplicate
    weight VMEM (matters for the fused-block kernel at production dims on v7x)."""
    idx = lambda i: (0,) * len(shape)
    if _BUFFERED_OK:
        return pl.BlockSpec(shape, idx, pipeline_mode=pl.Buffered(1))
    return pl.BlockSpec(shape, idx)


def _gelu(x):
    # PyTorch nn.GELU default is the exact erf form; fall back to the tanh
    # approximation only if this Mosaic build has no erf lowering.
    return jax.nn.gelu(x, approximate=not _EXACT_GELU_OK)


def _layernorm_f32(x, g, b):
    mu = jnp.mean(x, axis=-1, keepdims=True)
    var = jnp.mean(jnp.square(x - mu), axis=-1, keepdims=True)
    return (x - mu) * jax.lax.rsqrt(var + LN_EPS) * g + b


def _row_tiling(R, max_tile=256, min_steps=2):
    """Sublane-aligned row tile; aim for >= min_steps grid steps (pipelining /
    megacore) while capping the tile so it scales to production row counts."""
    tr = min(max_tile, max(8, _round_up(pl.cdiv(R, min_steps), 8)))
    tr = min(tr, R)
    return tr, (pl.cdiv(R, tr),)


# ----------------------------------------------------------------------------
# Pallas kernels (math in f32, storage bf16)
# ----------------------------------------------------------------------------

def _embed_pos_kernel(x_ref, w_ref, b_ref, pos_ref, o_ref):
    """o = x @ w + b + pos  (joint/temporal patch embedding, pos-embed folded in)."""
    y = jnp.dot(x_ref[0].astype(w_ref.dtype), w_ref[...],
                preferred_element_type=jnp.float32)
    y = y + b_ref[...].astype(jnp.float32) + pos_ref[...].astype(jnp.float32)
    o_ref[0] = y.astype(o_ref.dtype)


def _layernorm_kernel(x_ref, g_ref, b_ref, o_ref):
    x = x_ref[...].astype(jnp.float32)
    o_ref[...] = _layernorm_f32(x, g_ref[...].astype(jnp.float32),
                                b_ref[...].astype(jnp.float32)).astype(o_ref.dtype)


def _ln_linear_kernel(x_ref, g_ref, b_ref, w_ref, bias_ref, o_ref):
    """o = LN(x) @ w + bias  (fused final-norm + decoder head, lane-padded output)."""
    x = x_ref[...].astype(jnp.float32)
    xn = _layernorm_f32(x, g_ref[...].astype(jnp.float32), b_ref[...].astype(jnp.float32))
    y = jnp.dot(xn.astype(w_ref.dtype), w_ref[...], preferred_element_type=jnp.float32)
    o_ref[...] = (y + bias_ref[...].astype(jnp.float32)).astype(o_ref.dtype)


def _block_kernel(*refs, num_heads, scale, has_pos):
    """One full pre-norm transformer block for one sample:
       [x (+pos)] -> LN1 -> QKV -> per-head softmax(QK^T)V -> proj (+x)
                  -> LN2 -> fc1 -> GELU -> fc2 (+residual)."""
    if has_pos:
        (x_ref, pos_ref, ln1_g, ln1_b, qkv_w, qkv_b, proj_w, proj_b,
         ln2_g, ln2_b, fc1_w, fc1_b, fc2_w, fc2_b, o_ref) = refs
    else:
        pos_ref = None
        (x_ref, ln1_g, ln1_b, qkv_w, qkv_b, proj_w, proj_b,
         ln2_g, ln2_b, fc1_w, fc1_b, fc2_w, fc2_b, o_ref) = refs

    x = x_ref[0].astype(jnp.float32)                        # (L, D)
    if has_pos:
        x = x + pos_ref[...].astype(jnp.float32)            # pos-embed folded into block 0

    D = x.shape[-1]
    dh = D // num_heads

    # ---- attention path: fused LN1 + QKV + attention + proj + residual ----
    xn = _layernorm_f32(x, ln1_g[...].astype(jnp.float32), ln1_b[...].astype(jnp.float32))
    qkv = jnp.dot(xn.astype(qkv_w.dtype), qkv_w[...],
                  preferred_element_type=jnp.float32)
    qkv = qkv + qkv_b[...].astype(jnp.float32)               # (L, 3D): [q | k | v] lanes

    heads = []
    for h in range(num_heads):                               # static loop; q/k/v = lane slices
        q = qkv[:, h * dh:(h + 1) * dh]
        k = qkv[:, D + h * dh:D + (h + 1) * dh]
        v = qkv[:, 2 * D + h * dh:2 * D + (h + 1) * dh]
        # scores (L, L): contract last dims directly (no k.T materialisation)
        s = jax.lax.dot_general(q, k, (((1,), (1,)), ((), ())),
                                preferred_element_type=jnp.float32) * scale
        s = s - jnp.max(s, axis=-1, keepdims=True)
        p = jnp.exp(s)
        p = p * pl.reciprocal(jnp.sum(p, axis=-1, keepdims=True), approx=True)
        heads.append(jnp.dot(p, v, preferred_element_type=jnp.float32))
    a = jnp.concatenate(heads, axis=-1)                      # (L, D), lane-dense

    y = jnp.dot(a.astype(proj_w.dtype), proj_w[...],
                preferred_element_type=jnp.float32)
    y = y + proj_b[...].astype(jnp.float32) + x               # attention residual (f32)

    # ---- MLP path: fused LN2 + fc1 + GELU + fc2 + residual ----
    yn = _layernorm_f32(y, ln2_g[...].astype(jnp.float32), ln2_b[...].astype(jnp.float32))
    hid = jnp.dot(yn.astype(fc1_w.dtype), fc1_w[...],
                  preferred_element_type=jnp.float32)
    hid = _gelu(hid + fc1_b[...].astype(jnp.float32))
    out = jnp.dot(hid.astype(fc2_w.dtype), fc2_w[...],
                  preferred_element_type=jnp.float32)
    out = out + fc2_b[...].astype(jnp.float32) + y            # MLP residual (f32)

    o_ref[0] = out.astype(o_ref.dtype)


# ----------------------------------------------------------------------------
# Pallas wrappers
# ----------------------------------------------------------------------------

def embed_with_pos(patches, w, b, pos):
    """patches: (B, L, K) -> (B, L, D); pos (L, D) added in-kernel (one sample / step)."""
    B, L, K = patches.shape
    D = w.shape[-1]
    return pl.pallas_call(
        _embed_pos_kernel,
        out_shape=jax.ShapeDtypeStruct((B, L, D), ACT_DTYPE),
        grid=(B,),
        in_specs=[pl.BlockSpec((1, L, K), lambda i: (i, 0, 0)),
                  _const_spec((K, D)),
                  _const_spec((1, D)),
                  _const_spec((L, D))],
        out_specs=pl.BlockSpec((1, L, D), lambda i: (i, 0, 0)),
        compiler_params=_CPARAMS,
    )(patches, w, b.reshape(1, D), pos.astype(jnp.float32))


def transformer_block(x, p, num_heads, pos=None):
    """x: (B, L, D) bf16. One fused kernel per sample (grid over B)."""
    B, L, D = x.shape
    Hd = p["fc1_w"].shape[-1]
    scale = (D // num_heads) ** -0.5
    kern = functools.partial(_block_kernel, num_heads=num_heads, scale=scale,
                             has_pos=pos is not None)

    in_specs = [pl.BlockSpec((1, L, D), lambda b: (b, 0, 0))]
    args = [x]
    if pos is not None:
        in_specs.append(_const_spec((L, D)))
        args.append(pos.astype(jnp.float32))
    in_specs += [
        _const_spec((1, D)), _const_spec((1, D)),            # ln1 g, b
        _const_spec((D, 3 * D)), _const_spec((1, 3 * D)),    # qkv w, b
        _const_spec((D, D)), _const_spec((1, D)),            # proj w, b
        _const_spec((1, D)), _const_spec((1, D)),            # ln2 g, b
        _const_spec((D, Hd)), _const_spec((1, Hd)),          # fc1 w, b
        _const_spec((Hd, D)), _const_spec((1, D)),           # fc2 w, b
    ]
    args += [
        p["ln1_g"].reshape(1, D), p["ln1_b"].reshape(1, D),
        p["qkv_w"], p["qkv_b"].reshape(1, 3 * D),
        p["proj_w"], p["proj_b"].reshape(1, D),
        p["ln2_g"].reshape(1, D), p["ln2_b"].reshape(1, D),
        p["fc1_w"], p["fc1_b"].reshape(1, Hd),
        p["fc2_w"], p["fc2_b"].reshape(1, D),
    ]
    return pl.pallas_call(
        kern,
        out_shape=jax.ShapeDtypeStruct((B, L, D), ACT_DTYPE),
        grid=(B,),
        in_specs=in_specs,
        out_specs=pl.BlockSpec((1, L, D), lambda b: (b, 0, 0)),
        compiler_params=_CPARAMS,
    )(*args)


def layernorm(x2, g, b):
    R, D = x2.shape
    tr, grid = _row_tiling(R)
    return pl.pallas_call(
        _layernorm_kernel,
        out_shape=jax.ShapeDtypeStruct((R, D), ACT_DTYPE),
        grid=grid,
        in_specs=[pl.BlockSpec((tr, D), lambda i: (i, 0)),
                  _const_spec((1, D)), _const_spec((1, D))],
        out_specs=pl.BlockSpec((tr, D), lambda i: (i, 0)),
        compiler_params=_CPARAMS,
    )(x2, g.reshape(1, D), b.reshape(1, D))


def ln_head(x2, g, b, w, bias):
    """Fused final-norm + head projection.  The true head width (u*p*C) is lane-sparse,
    so the weight/output are padded to a multiple of 128 lanes (lane-dense stores) and
    the result is sliced back outside the kernel."""
    R, D = x2.shape
    n_true = w.shape[-1]
    n_pad = _round_up(n_true, LANE)
    if n_pad != n_true:
        w = jnp.pad(w, ((0, 0), (0, n_pad - n_true)))
        bias = jnp.pad(bias, ((0, n_pad - n_true),))
    tr, grid = _row_tiling(R)
    out = pl.pallas_call(
        _ln_linear_kernel,
        out_shape=jax.ShapeDtypeStruct((R, n_pad), ACT_DTYPE),
        grid=grid,
        in_specs=[pl.BlockSpec((tr, D), lambda i: (i, 0)),
                  _const_spec((1, D)), _const_spec((1, D)),
                  _const_spec((D, n_pad)), _const_spec((1, n_pad))],
        out_specs=pl.BlockSpec((tr, n_pad), lambda i: (i, 0)),
        compiler_params=_CPARAMS,
    )(x2, g.reshape(1, D), b.reshape(1, D), w, bias.reshape(1, n_pad))
    return out[:, :n_true]


# ----------------------------------------------------------------------------
# Model glue (compute in Pallas, gathers / masking in XLA)
# ----------------------------------------------------------------------------

def patchify(imgs, p, u):
    """imgs: (NM, T, V, C) -> (NM, (T//u)*(V//p), u*p*C) — matches the PyTorch einsum."""
    NM, T, V, C = imgs.shape
    TP, VP = T // u, V // p
    x = imgs.reshape(NM, TP, u, VP, p, C)
    x = jnp.einsum("ntuvpc->ntvupc", x)
    return x.reshape(NM, TP * VP, u * p * C)


def _pos_2d(params, Tp, Vp, D):
    # parameter-only op (tiny); combined temporal+spatial pos-embed, (Tp*Vp, D)
    return (params["temp_pos"][:Tp, None, :]
            + params["spat_pos"][None, :Vp, :]).reshape(Tp * Vp, D)


def former_forward(params, cfg, x_tvjc, mask_ratio, motion_stride,
                   motion_aware_tau, setting, mask_key):
    NM, T, V, C = x_tvjc.shape
    u, p = cfg["t_patch_size"], cfg["patch_size"]
    Tp, Vp = T // u, V // p
    D = cfg["dim_feat"]

    # motion signal (temporal difference, zero-padded at the end)
    x_motion = jnp.concatenate(
        [x_tvjc[:, motion_stride:] - x_tvjc[:, :-motion_stride],
         jnp.zeros((NM, motion_stride, V, C), x_tvjc.dtype)], axis=1)

    # patch embedding with the pos-embed add folded into the kernel
    patches = patchify(x_tvjc, p, u)                               # (NM, Tp*Vp, u*p*C)
    pos = _pos_2d(params, Tp, Vp, D)
    tokens = embed_with_pos(patches, params["embed_w"], params["embed_b"], pos)
    tokens = tokens.reshape(NM, Tp, Vp, D)

    if setting == "student" and mask_ratio > 0.0:
        len_keep = max(1, int(Tp * (1.0 - mask_ratio)))
        # motion-aware temporal masking score
        m_patch = jnp.abs(x_motion).reshape(NM, Tp, u, V, C).sum(axis=(2, 3, 4))
        m_patch = m_patch / (m_patch.sum(axis=1, keepdims=True) + 1e-6)
        noise = jax.random.uniform(mask_key, (NM, Tp))
        score = motion_aware_tau * m_patch + (1.0 - motion_aware_tau) * noise
        ids_shuffle = jnp.argsort(-score, axis=1)        # keep highest-motion patches
        ids_restore = jnp.argsort(ids_shuffle, axis=1)   # (NM, Tp)
        ids_keep = ids_shuffle[:, :len_keep]
        tokens = jnp.take_along_axis(tokens, ids_keep[:, :, None, None], axis=1)
        mask_t = jnp.concatenate(
            [jnp.zeros((NM, len_keep)), jnp.ones((NM, Tp - len_keep))], axis=1)
        mask_t = jnp.take_along_axis(mask_t, ids_restore, axis=1)      # 1 == masked
    else:
        ids_restore = jnp.broadcast_to(jnp.arange(Tp)[None, :], (NM, Tp))
        mask_t = jnp.zeros((NM, Tp))

    mask = jnp.broadcast_to(mask_t[:, :, None], (NM, Tp, Vp))
    ids_restore = jnp.broadcast_to(ids_restore[:, :, None], (NM, Tp, Vp))

    B, Tk = tokens.shape[0], tokens.shape[1]
    h = tokens.reshape(B, Tk * Vp, D)
    for blk in params["blocks"]:
        h = transformer_block(h, blk, cfg["num_heads"])
    h = layernorm(h.reshape(B * Tk * Vp, D), params["norm_g"], params["norm_b"])
    return h.reshape(B, Tk, Vp, D), mask, ids_restore, x_motion


def trunk_forward(params, cfg, tokens):
    """Predictor / Decoder trunk: blocks (pos-embed folded into block 0) + norm (+ head)."""
    B, Tp, Vp, D = tokens.shape
    L = Tp * Vp
    pos = _pos_2d(params, Tp, Vp, D)
    h = tokens.reshape(B, L, D)
    for li, blk in enumerate(params["blocks"]):
        h = transformer_block(h, blk, cfg["num_heads"], pos=pos if li == 0 else None)
    h2 = h.reshape(B * L, D)
    if "head_w" in params:
        out = ln_head(h2, params["norm_g"], params["norm_b"],
                      params["head_w"], params["head_b"])
        return out.reshape(B, L, -1)                      # (B, L, u*p*C)
    out = layernorm(h2, params["norm_g"], params["norm_b"])
    return out.reshape(B, Tp, Vp, D)


# ----------------------------------------------------------------------------
# TeacherStudentNetwork.forward
# ----------------------------------------------------------------------------

def teacher_student_forward(params, cfg, x, mask_ratio=0.9, motion_stride=1,
                            motion_aware_tau=0.8, mask_key=None):
    N, C, T, J, M = x.shape
    u, p, D = cfg["t_patch_size"], cfg["patch_size"], cfg["dim_feat"]
    Tp, Vp = T // u, J // p

    # (N, C, T, J, M) -> (N*M, T, J, C)
    x_tvjc = jnp.transpose(x, (0, 4, 2, 3, 1)).reshape(N * M, T, J, C)

    stu_enc, mask, ids_restore, x_motion = former_forward(
        params["student"], cfg, x_tvjc, mask_ratio, motion_stride,
        motion_aware_tau, "student", mask_key)
    T_s = stu_enc.shape[1]

    # teacher weights are a copy of the student (load_state_dict at init);
    # teacher runs full-sequence (mask_ratio=0), no gradient path.
    tea_enc, _, _, x_motion = former_forward(
        params["teacher"], cfg, x_tvjc, 0.0, motion_stride,
        motion_aware_tau, "teacher", mask_key)

    mask_tokens = jnp.broadcast_to(params["mask_token"].astype(stu_enc.dtype),
                                   (N * M, Tp - T_s, Vp, D))
    stu_full = jnp.concatenate([stu_enc, mask_tokens], axis=1)           # (NM,Tp,Vp,D)
    stu_full = jnp.take_along_axis(stu_full, ids_restore[..., None], axis=1)

    studentPredict = trunk_forward(params["predictor"], cfg, stu_full)   # (NM,Tp,Vp,D)
    studentProject = trunk_forward(params["decoder"], cfg, stu_full)     # (NM,Tp*Vp,u*p*C)

    # masked_fill((1 - mask).bool(), 0): zero where mask == 0 (keep masked positions)
    keep_masked = mask[..., None] > 0.5
    studentMotionPredict = jnp.where(keep_masked, studentPredict, 0.0)
    teacherMotionGT = jnp.where(keep_masked, tea_enc, 0.0)
    target = patchify(x_motion, p, u)                                    # (NM, Tp*Vp, u*p*C)
    return studentProject, target, studentMotionPredict, teacherMotionGT, mask


# ----------------------------------------------------------------------------
# Deterministic parameter init (matmul weights bf16, LN/bias/pos f32)
# ----------------------------------------------------------------------------

def _dense(key, fan_in, fan_out, dtype=jnp.float32):
    return (jax.random.normal(key, (fan_in, fan_out), jnp.float32) * 0.02).astype(dtype)


def init_block(key, D, mlp_ratio):
    ks = jax.random.split(key, 4)
    Hd = D * mlp_ratio
    w = jnp.bfloat16
    return dict(
        ln1_g=jnp.ones((D,), jnp.float32), ln1_b=jnp.zeros((D,), jnp.float32),
        qkv_w=_dense(ks[0], D, 3 * D, w), qkv_b=jnp.zeros((3 * D,), jnp.float32),
        proj_w=_dense(ks[1], D, D, w), proj_b=jnp.zeros((D,), jnp.float32),
        ln2_g=jnp.ones((D,), jnp.float32), ln2_b=jnp.zeros((D,), jnp.float32),
        fc1_w=_dense(ks[2], D, Hd, w), fc1_b=jnp.zeros((Hd,), jnp.float32),
        fc2_w=_dense(ks[3], Hd, D, w), fc2_b=jnp.zeros((D,), jnp.float32),
    )


def init_params(key, cfg):
    D = cfg["dim_feat"]
    Tp_max = cfg["num_frames"] // cfg["t_patch_size"]
    Vp_max = cfg["num_joints"] // cfg["patch_size"]
    in_dim = cfg["t_patch_size"] * cfg["patch_size"] * cfg["dim_in"]
    keys = iter(jax.random.split(key, 128))

    def trunk(depth, embed_in=None, head_out=None):
        d = dict(
            temp_pos=_dense(next(keys), Tp_max, D),
            spat_pos=_dense(next(keys), Vp_max, D),
            blocks=[init_block(next(keys), D, cfg["mlp_ratio"]) for _ in range(depth)],
            norm_g=jnp.ones((D,), jnp.float32),
            norm_b=jnp.zeros((D,), jnp.float32),
        )
        if embed_in is not None:
            d["embed_w"] = _dense(next(keys), embed_in, D, jnp.bfloat16)
            d["embed_b"] = jnp.zeros((D,), jnp.float32)
        if head_out is not None:
            d["head_w"] = _dense(next(keys), D, head_out, jnp.bfloat16)
            d["head_b"] = jnp.zeros((head_out,), jnp.float32)
        return d

    student = trunk(cfg["depth"], embed_in=in_dim)
    teacher = jax.tree_util.tree_map(lambda a: a, student)   # teacher = copy of student
    return dict(
        student=student,
        teacher=teacher,
        predictor=trunk(cfg["pred_depth"]),
        decoder=trunk(cfg["decoder_depth"], head_out=in_dim),
        # trunc_normal_(std=0.02) on the mask token
        mask_token=jnp.clip(jax.random.normal(next(keys), (D,)) * 0.02, -0.04, 0.04),
        adjust_para=jnp.array(1.0, jnp.float32),             # unused in forward
    )


# ----------------------------------------------------------------------------
# Main
# ----------------------------------------------------------------------------

if __name__ == "__main__":
    cfg = dict(
        dim_in=3, dim_feat=32, depth=2, pred_depth=1, decoder_depth=1,
        num_heads=4, mlp_ratio=4, num_frames=16, num_joints=6,
        patch_size=1, t_patch_size=4,
    )

    key = jax.random.PRNGKey(0)
    pkey, xkey, mkey = jax.random.split(key, 3)
    params = init_params(pkey, cfg)

    N, M = 2, 1
    x = jax.random.normal(
        xkey, (N, cfg["dim_in"], cfg["num_frames"], cfg["num_joints"], M),
        dtype=jnp.float32)

    @functools.partial(jax.jit,
                       static_argnames=("mask_ratio", "motion_stride", "motion_aware_tau"))
    def fwd(params, x, mask_key, mask_ratio, motion_stride, motion_aware_tau):
        return teacher_student_forward(params, cfg, x, mask_ratio, motion_stride,
                                       motion_aware_tau, mask_key)

    outs = fwd(params, x, mkey, mask_ratio=0.5, motion_stride=1, motion_aware_tau=0.8)
    outs = jax.block_until_ready(outs)

    studentProject, target, studentMotionPredict, teacherMotionGT, mask = outs
    NM = N * M
    Tp = cfg["num_frames"] // cfg["t_patch_size"]
    Vp = cfg["num_joints"] // cfg["patch_size"]
    upc = cfg["t_patch_size"] * cfg["patch_size"] * cfg["dim_in"]
    assert studentProject.shape == (NM, Tp * Vp, upc)
    assert target.shape == (NM, Tp * Vp, upc)
    assert studentMotionPredict.shape == (NM, Tp, Vp, cfg["dim_feat"])
    assert teacherMotionGT.shape == (NM, Tp, Vp, cfg["dim_feat"])
    assert mask.shape == (NM, Tp, Vp)
    assert all(bool(jnp.all(jnp.isfinite(o.astype(jnp.float32)))) for o in
               (studentProject, target, studentMotionPredict, teacherMotionGT, mask))

    print("KERNEL_OK")
</pallas_src>

<mosaic_0001>
module attributes {stable_mosaic.version = 11 : i64} {
  func.func @k(%arg0: i32, %arg1: memref<8x128xf32, #tpu.memory_space<vmem>>, %arg2: memref<8x128xf32, #tpu.memory_space<vmem>>, %arg3: memref<8x128xf32, #tpu.memory_space<vmem>>) attributes {dimension_semantics = [#tpu.dimension_semantics<arbitrary>], iteration_bounds = array<i64: 2>, scalar_prefetch = 0 : i64, scratch_operands = 0 : i64, tpu.core_type = #tpu.core_type<tc>, window_params = [{pipeline_mode = #tpu.pipeline_mode<synchronous>, transform_indices = @transform_0, window_bounds = array<i64: 8, 128>}, {transform_indices = @transform_1, window_bounds = array<i64: 8, 128>}, {transform_indices = @transform_2, window_bounds = array<i64: 8, 128>}]} {
    %c0 = arith.constant 0 : index
    %c0_0 = arith.constant 0 : index
    %0 = vector.load %arg2[%c0, %c0_0] : memref<8x128xf32, #tpu.memory_space<vmem>>, vector<8x128xf32>
    %c0_1 = arith.constant 0 : index
    %c0_2 = arith.constant 0 : index
    %1 = vector.load %arg1[%c0_1, %c0_2] : memref<8x128xf32, #tpu.memory_space<vmem>>, vector<8x128xf32>
    %2 = arith.addf %0, %1 : vector<8x128xf32>
    %c0_3 = arith.constant 0 : index
    %c0_4 = arith.constant 0 : index
    %3 = vector.load %arg3[%c0_3, %c0_4] : memref<8x128xf32, #tpu.memory_space<vmem>>, vector<8x128xf32>
    tpu.vector_store %arg3[%c0_3, %c0_4], %2 {strides = array<i32>} : memref<8x128xf32, #tpu.memory_space<vmem>>, vector<8x128xf32>,
    return
  }
  func.func @transform_0(%arg0: i32) -> (i32, i32) {
    %c0_i32 = arith.constant 0 : i32
    %c0_i32_0 = arith.constant 0 : i32
    %c0_i32_1 = arith.constant 0 : i32
    return %c0_i32, %c0_i32_0 : i32, i32
  }
  func.func @transform_1(%arg0: i32) -> (i32, i32) {
    %c0_i32 = arith.constant 0 : i32
    %c0_i32_0 = arith.constant 0 : i32
    return %arg0, %c0_i32 : i32, i32
  }
  func.func @transform_2(%arg0: i32) -> (i32, i32) {
    %c0_i32 = arith.constant 0 : i32
    %c0_i32_0 = arith.constant 0 : i32
    return %arg0, %c0_i32 : i32, i32
  }
}

module attributes {stable_mosaic.version = 11 : i64} {
  func.func @_embed_pos_kernel(%arg0: i32, %arg1: memref<1x24x12xf32, #tpu.memory_space<vmem>>, %arg2: memref<12x32xbf16, #tpu.memory_space<vmem>>, %arg3: memref<1x32xf32, #tpu.memory_space<vmem>>, %arg4: memref<24x32xf32, #tpu.memory_space<vmem>>, %arg5: memref<1x24x32xbf16, #tpu.memory_space<vmem>>) attributes {dimension_semantics = [#tpu.dimension_semantics<parallel>], iteration_bounds = array<i64: 2>, scalar_prefetch = 0 : i64, scratch_operands = 0 : i64, tpu.core_type = #tpu.core_type<tc>, window_params = [{transform_indices = @transform_0, window_bounds = array<i64: 1, 24, 12>}, {pipeline_mode = #tpu.pipeline_mode<synchronous>, transform_indices = @transform_1, window_bounds = array<i64: 12, 32>}, {pipeline_mode = #tpu.pipeline_mode<synchronous>, transform_indices = @transform_2, window_bounds = array<i64: 1, 32>}, {pipeline_mode = #tpu.pipeline_mode<synchronous>, transform_indices = @transform_3, window_bounds = array<i64: 24, 32>}, {transform_indices = @transform_4, window_bounds = array<i64: 1, 24, 32>}]} {
    %c0 = arith.constant 0 : index
    %c0_0 = arith.constant 0 : index
    %c0_1 = arith.constant 0 : index
    %0 = vector.load %arg1[%c0, %c0_0, %c0_1] : memref<1x24x12xf32, #tpu.memory_space<vmem>>, vector<1x24x12xf32>
    %1 = vector.shape_cast %0 : vector<1x24x12xf32> to vector<24x12xf32>
    %2 = arith.truncf %1 : vector<24x12xf32> to vector<24x12xbf16>
    %c0_2 = arith.constant 0 : index
    %c0_3 = arith.constant 0 : index
    %3 = vector.load %arg2[%c0_2, %c0_3] : memref<12x32xbf16, #tpu.memory_space<vmem>>, vector<12x32xbf16>
    %cst = arith.constant dense<0.000000e+00> : vector<24x32xf32>
    %4 = tpu.matmul %2, %3, %cst {dimension_numbers = #tpu.dot_dimension_numbers<[1], [0], [0], [1], [0, 0, 1, 1], [], []>} : vector<24x12xbf16>, vector<12x32xbf16>, vector<24x32xf32> -> vector<24x32xf32>
    %c0_4 = arith.constant 0 : index
    %c0_5 = arith.constant 0 : index
    %5 = vector.load %arg3[%c0_4, %c0_5] : memref<1x32xf32, #tpu.memory_space<vmem>>, vector<1x32xf32>
    %6 = vector.broadcast %5 : vector<1x32xf32> to vector<24x32xf32>
    %7 = arith.addf %4, %6 : vector<24x32xf32>
    %c0_6 = arith.constant 0 : index
    %c0_7 = arith.constant 0 : index
    %8 = vector.load %arg4[%c0_6, %c0_7] : memref<24x32xf32, #tpu.memory_space<vmem>>, vector<24x32xf32>
    %9 = arith.addf %7, %8 : vector<24x32xf32>
    %10 = arith.truncf %9 : vector<24x32xf32> to vector<24x32xbf16>
    %c0_8 = arith.constant 0 : index
    %c0_9 = arith.constant 0 : index
    %c0_10 = arith.constant 0 : index
    %11 = vector.load %arg5[%c0_8, %c0_9, %c0_10] : memref<1x24x32xbf16, #tpu.memory_space<vmem>>, vector<1x24x32xbf16>
    %12 = vector.shape_cast %11 : vector<1x24x32xbf16> to vector<24x32xbf16>
    %13 = vector.shape_cast %10 : vector<24x32xbf16> to vector<1x24x32xbf16>
    tpu.vector_store %arg5[%c0_8, %c0_9, %c0_10], %13 {strides = array<i32>} : memref<1x24x32xbf16, #tpu.memory_space<vmem>>, vector<1x24x32xbf16>,
    return
  }
  func.func @transform_0(%arg0: i32) -> (i32, i32, i32) {
    %c0_i32 = arith.constant 0 : i32
    %c0_i32_0 = arith.constant 0 : i32
    %c0_i32_1 = arith.constant 0 : i32
    return %arg0, %c0_i32, %c0_i32_0 : i32, i32, i32
  }
  func.func @transform_1(%arg0: i32) -> (i32, i32) {
    %c0_i32 = arith.constant 0 : i32
    %c0_i32_0 = arith.constant 0 : i32
    %c0_i32_1 = arith.constant 0 : i32
    return %c0_i32, %c0_i32_0 : i32, i32
  }
  func.func @transform_2(%arg0: i32) -> (i32, i32) {
    %c0_i32 = arith.constant 0 : i32
    %c0_i32_0 = arith.constant 0 : i32
    %c0_i32_1 = arith.constant 0 : i32
    return %c0_i32, %c0_i32_0 : i32, i32
  }
  func.func @transform_3(%arg0: i32) -> (i32, i32) {
    %c0_i32 = arith.constant 0 : i32
    %c0_i32_0 = arith.constant 0 : i32
    %c0_i32_1 = arith.constant 0 : i32
    return %c0_i32, %c0_i32_0 : i32, i32
  }
  func.func @transform_4(%arg0: i32) -> (i32, i32, i32) {
    %c0_i32 = arith.constant 0 : i32
    %c0_i32_0 = arith.constant 0 : i32
    %c0_i32_1 = arith.constant 0 : i32
    return %arg0, %c0_i32, %c0_i32_0 : i32, i32, i32
  }
}

module attributes {stable_mosaic.version = 11 : i64} {
  func.func @_block_kernel(%arg0: i32, %arg1: memref<1x12x32xbf16, #tpu.memory_space<vmem>>, %arg2: memref<1x32xf32, #tpu.memory_space<vmem>>, %arg3: memref<1x32xf32, #tpu.memory_space<vmem>>, %arg4: memref<32x96xbf16, #tpu.memory_space<vmem>>, %arg5: memref<1x96xf32, #tpu.memory_space<vmem>>, %arg6: memref<32x32xbf16, #tpu.memory_space<vmem>>, %arg7: memref<1x32xf32, #tpu.memory_space<vmem>>, %arg8: memref<1x32xf32, #tpu.memory_space<vmem>>, %arg9: memref<1x32xf32, #tpu.memory_space<vmem>>, %arg10: memref<32x128xbf16, #tpu.memory_space<vmem>>, %arg11: memref<1x128xf32, #tpu.memory_space<vmem>>, %arg12: memref<128x32xbf16, #tpu.memory_space<vmem>>, %arg13: memref<1x32xf32, #tpu.memory_space<vmem>>, %arg14: memref<1x12x32xbf16, #tpu.memory_space<vmem>>) attributes {dimension_semantics = [#tpu.dimension_semantics<parallel>], iteration_bounds = array<i64: 2>, scalar_prefetch = 0 : i64, scratch_operands = 0 : i64, tpu.core_type = #tpu.core_type<tc>, window_params = [{transform_indices = @transform_0, window_bounds = array<i64: 1, 12, 32>}, {pipeline_mode = #tpu.pipeline_mode<synchronous>, transform_indices = @transform_1, window_bounds = array<i64: 1, 32>}, {pipeline_mode = #tpu.pipeline_mode<synchronous>, transform_indices = @transform_2, window_bounds = array<i64: 1, 32>}, {pipeline_mode = #tpu.pipeline_mode<synchronous>, transform_indices = @transform_3, window_bounds = array<i64: 32, 96>}, {pipeline_mode = #tpu.pipeline_mode<synchronous>, transform_indices = @transform_4, window_bounds = array<i64: 1, 96>}, {pipeline_mode = #tpu.pipeline_mode<synchronous>, transform_indices = @transform_5, window_bounds = array<i64: 32, 32>}, {pipeline_mode = #tpu.pipeline_mode<synchronous>, transform_indices = @transform_6, window_bounds = array<i64: 1, 32>}, {pipeline_mode = #tpu.pipeline_mode<synchronous>, transform_indices = @transform_7, window_bounds = array<i64: 1, 32>}, {pipeline_mode = #tpu.pipeline_mode<synchronous>, transform_indices = @transform_8, window_bounds = array<i64: 1, 32>}, {pipeline_mode = #tpu.pipeline_mode<synchronous>, transform_indices = @transform_9, window_bounds = array<i64: 32, 128>}, {pipeline_mode = #tpu.pipeline_mode<synchronous>, transform_indices = @transform_10, window_bounds = array<i64: 1, 128>}, {pipeline_mode = #tpu.pipeline_mode<synchronous>, transform_indices = @transform_11, window_bounds = array<i64: 128, 32>}, {pipeline_mode = #tpu.pipeline_mode<synchronous>, transform_indices = @transform_12, window_bounds = array<i64: 1, 32>}, {transform_indices = @transform_13, window_bounds = array<i64: 1, 12, 32>}]} {
    %c0 = arith.constant 0 : index
    %c0_0 = arith.constant 0 : index
    %c0_1 = arith.constant 0 : index
    %0 = vector.load %arg1[%c0, %c0_0, %c0_1] : memref<1x12x32xbf16, #tpu.memory_space<vmem>>, vector<1x12x32xbf16>
    %1 = vector.shape_cast %0 : vector<1x12x32xbf16> to vector<12x32xbf16>
    %2 = arith.extf %1 : vector<12x32xbf16> to vector<12x32xf32>
    %c0_2 = arith.constant 0 : index
    %c0_3 = arith.constant 0 : index
    %3 = vector.load %arg2[%c0_2, %c0_3] : memref<1x32xf32, #tpu.memory_space<vmem>>, vector<1x32xf32>
    %c0_4 = arith.constant 0 : index
    %c0_5 = arith.constant 0 : index
    %4 = vector.load %arg3[%c0_4, %c0_5] : memref<1x32xf32, #tpu.memory_space<vmem>>, vector<1x32xf32>
    %cst = arith.constant dense<0.000000e+00> : vector<12xf32>
    %5 = vector.multi_reduction <add>, %2, %cst [1] : vector<12x32xf32> to vector<12xf32>
    %6 = vector.shape_cast %5 : vector<12xf32> to vector<12x1xf32>
    %cst_6 = arith.constant 3.200000e+01 : f32
    %7 = vector.broadcast %cst_6 : f32 to vector<12x1xf32>
    %8 = arith.divf %6, %7 : vector<12x1xf32>
    %9 = vector.broadcast %8 : vector<12x1xf32> to vector<12x32xf32>
    %10 = arith.subf %2, %9 : vector<12x32xf32>
    %11 = arith.mulf %10, %10 : vector<12x32xf32>
    %cst_7 = arith.constant dense<0.000000e+00> : vector<12xf32>
    %12 = vector.multi_reduction <add>, %11, %cst_7 [1] : vector<12x32xf32> to vector<12xf32>
    %13 = vector.shape_cast %12 : vector<12xf32> to vector<12x1xf32>
    %cst_8 = arith.constant 3.200000e+01 : f32
    %14 = vector.broadcast %cst_8 : f32 to vector<12x1xf32>
    %15 = arith.divf %13, %14 : vector<12x1xf32>
    %16 = vector.broadcast %8 : vector<12x1xf32> to vector<12x32xf32>
    %17 = arith.subf %2, %16 : vector<12x32xf32>
    %cst_9 = arith.constant 9.99999974E-6 : f32
    %18 = vector.broadcast %cst_9 : f32 to vector<12x1xf32>
    %19 = arith.addf %15, %18 : vector<12x1xf32>
    %20 = math.rsqrt %19 : vector<12x1xf32>
    %21 = vector.broadcast %20 : vector<12x1xf32> to vector<12x32xf32>
    %22 = arith.mulf %17, %21 : vector<12x32xf32>
    %23 = vector.broadcast %3 : vector<1x32xf32> to vector<12x32xf32>
    %24 = arith.mulf %22, %23 : vector<12x32xf32>
    %25 = vector.broadcast %4 : vector<1x32xf32> to vector<12x32xf32>
    %26 = arith.addf %24, %25 : vector<12x32xf32>
    %27 = arith.truncf %26 : vector<12x32xf32> to vector<12x32xbf16>
    %c0_10 = arith.constant 0 : index
    %c0_11 = arith.constant 0 : index
    %28 = vector.load %arg4[%c0_10, %c0_11] : memref<32x96xbf16, #tpu.memory_space<vmem>>, vector<32x96xbf16>
    %cst_12 = arith.constant dense<0.000000e+00> : vector<12x96xf32>
    %29 = tpu.matmul %27, %28, %cst_12 {dimension_numbers = #tpu.dot_dimension_numbers<[1], [0], [0], [1], [0, 0, 1, 1], [], []>} : vector<12x32xbf16>, vector<32x96xbf16>, vector<12x96xf32> -> vector<12x96xf32>
    %c0_13 = arith.constant 0 : index
    %c0_14 = arith.constant 0 : index
    %30 = vector.load %arg5[%c0_13, %c0_14] : memref<1x96xf32, #tpu.memory_space<vmem>>, vector<1x96xf32>
    %31 = vector.broadcast %30 : vector<1x96xf32> to vector<12x96xf32>
    %32 = arith.addf %29, %31 : vector<12x96xf32>
    %33 = vector.extract_strided_slice %32 {offsets = [0, 0], sizes = [12, 8], strides = [1, 1]} : vector<12x96xf32> to vector<12x8xf32>
    %34 = vector.extract_strided_slice %32 {offsets = [0, 32], sizes = [12, 8], strides = [1, 1]} : vector<12x96xf32> to vector<12x8xf32>
    %35 = vector.extract_strided_slice %32 {offsets = [0, 64], sizes = [12, 8], strides = [1, 1]} : vector<12x96xf32> to vector<12x8xf32>
    %cst_15 = arith.constant dense<0.000000e+00> : vector<12x12xf32>
    %36 = tpu.matmul %33, %34, %cst_15 {dimension_numbers = #tpu.dot_dimension_numbers<[1], [1], [0], [0], [0, 0, 1, 0], [], []>} : vector<12x8xf32>, vector<12x8xf32>, vector<12x12xf32> -> vector<12x12xf32>
    %cst_16 = arith.constant 0.353553385 : f32
    %37 = vector.broadcast %cst_16 : f32 to vector<12x12xf32>
    %38 = arith.mulf %36, %37 : vector<12x12xf32>
    %cst_17 = arith.constant dense<0xFF800000> : vector<12xf32>
    %39 = vector.multi_reduction <maximumf>, %38, %cst_17 [1] : vector<12x12xf32> to vector<12xf32>
    %40 = vector.shape_cast %39 : vector<12xf32> to vector<12x1xf32>
    %41 = vector.broadcast %40 : vector<12x1xf32> to vector<12x12xf32>
    %42 = arith.subf %38, %41 : vector<12x12xf32>
    %43 = math.exp %42 : vector<12x12xf32>
    %cst_18 = arith.constant dense<0.000000e+00> : vector<12xf32>
    %44 = vector.multi_reduction <add>, %43, %cst_18 [1] : vector<12x12xf32> to vector<12xf32>
    %45 = vector.shape_cast %44 : vector<12xf32> to vector<12x1xf32>
    %46 = tpu.reciprocal %45 {approx = true} : vector<12x1xf32> -> vector<12x1xf32>
    %47 = vector.broadcast %46 : vector<12x1xf32> to vector<12x12xf32>
    %48 = arith.mulf %43, %47 : vector<12x12xf32>
    %cst_19 = arith.constant dense<0.000000e+00> : vector<12x8xf32>
    %49 = tpu.matmul %48, %35, %cst_19 {dimension_numbers = #tpu.dot_dimension_numbers<[1], [0], [0], [1], [0, 0, 1, 1], [], []>} : vector<12x12xf32>, vector<12x8xf32>, vector<12x8xf32> -> vector<12x8xf32>
    %50 = vector.extract_strided_slice %32 {offsets = [0, 8], sizes = [12, 8], strides = [1, 1]} : vector<12x96xf32> to vector<12x8xf32>
    %51 = vector.extract_strided_slice %32 {offsets = [0, 40], sizes = [12, 8], strides = [1, 1]} : vector<12x96xf32> to vector<12x8xf32>
    %52 = vector.extract_strided_slice %32 {offsets = [0, 72], sizes = [12, 8], strides = [1, 1]} : vector<12x96xf32> to vector<12x8xf32>
    %cst_20 = arith.constant dense<0.000000e+00> : vector<12x12xf32>
    %53 = tpu.matmul %50, %51, %cst_20 {dimension_numbers = #tpu.dot_dimension_numbers<[1], [1], [0], [0], [0, 0, 1, 0], [], []>} : vector<12x8xf32>, vector<12x8xf32>, vector<12x12xf32> -> vector<12x12xf32>
    %cst_21 = arith.constant 0.353553385 : f32
    %54 = vector.broadcast %cst_21 : f32 to vector<12x12xf32>
    %55 = arith.mulf %53, %54 : vector<12x12xf32>
    %cst_22 = arith.constant dense<0xFF800000> : vector<12xf32>
    %56 = vector.multi_reduction <maximumf>, %55, %cst_22 [1] : vector<12x12xf32> to vector<12xf32>
    %57 = vector.shape_cast %56 : vector<12xf32> to vector<12x1xf32>
    %58 = vector.broadcast %57 : vector<12x1xf32> to vector<12x12xf32>
    %59 = arith.subf %55, %58 : vector<12x12xf32>
    %60 = math.exp %59 : vector<12x12xf32>
    %cst_23 = arith.constant dense<0.000000e+00> : vector<12xf32>
    %61 = vector.multi_reduction <add>, %60, %cst_23 [1] : vector<12x12xf32> to vector<12xf32>
    %62 = vector.shape_cast %61 : vector<12xf32> to vector<12x1xf32>
    %63 = tpu.reciprocal %62 {approx = true} : vector<12x1xf32> -> vector<12x1xf32>
    %64 = vector.broadcast %63 : vector<12x1xf32> to vector<12x12xf32>
    %65 = arith.mulf %60, %64 : vector<12x12xf32>
    %cst_24 = arith.constant dense<0.000000e+00> : vector<12x8xf32>
    %66 = tpu.matmul %65, %52, %cst_24 {dimension_numbers = #tpu.dot_dimension_numbers<[1], [0], [0], [1], [0, 0, 1, 1], [], []>} : vector<12x12xf32>, vector<12x8xf32>, vector<12x8xf32> -> vector<12x8xf32>
    %67 = vector.extract_strided_slice %32 {offsets = [0, 16], sizes = [12, 8], strides = [1, 1]} : vector<12x96xf32> to vector<12x8xf32>
    %68 = vector.extract_strided_slice %32 {offsets = [0, 48], sizes = [12, 8], strides = [1, 1]} : vector<12x96xf32> to vector<12x8xf32>
    %69 = vector.extract_strided_slice %32 {offsets = [0, 80], sizes = [12, 8], strides = [1, 1]} : vector<12x96xf32> to vector<12x8xf32>
    %cst_25 = arith.constant dense<0.000000e+00> : vector<12x12xf32>
    %70 = tpu.matmul %67, %68, %cst_25 {dimension_numbers = #tpu.dot_dimension_numbers<[1], [1], [0], [0], [0, 0, 1, 0], [], []>} : vector<12x8xf32>, vector<12x8xf32>, vector<12x12xf32> -> vector<12x12xf32>
    %cst_26 = arith.constant 0.353553385 : f32
    %71 = vector.broadcast %cst_26 : f32 to vector<12x12xf32>
    %72 = arith.mulf %70, %71 : vector<12x12xf32>
    %cst_27 = arith.constant dense<0xFF800000> : vector<12xf32>
    %73 = vector.multi_reduction <maximumf>, %72, %cst_27 [1] : vector<12x12xf32> to vector<12xf32>
    %74 = vector.shape_cast %73 : vector<12xf32> to vector<12x1xf32>
    %75 = vector.broadcast %74 : vector<12x1xf32> to vector<12x12xf32>
    %76 = arith.subf %72, %75 : vector<12x12xf32>
    %77 = math.exp %76 : vector<12x12xf32>
    %cst_28 = arith.constant dense<0.000000e+00> : vector<12xf32>
    %78 = vector.multi_reduction <add>, %77, %cst_28 [1] : vector<12x12xf32> to vector<12xf32>
    %79 = vector.shape_cast %78 : vector<12xf32> to vector<12x1xf32>
    %80 = tpu.reciprocal %79 {approx = true} : vector<12x1xf32> -> vector<12x1xf32>
    %81 = vector.broadcast %80 : vector<12x1xf32> to vector<12x12xf32>
    %82 = arith.mulf %77, %81 : vector<12x12xf32>
    %cst_29 = arith.constant dense<0.000000e+00> : vector<12x8xf32>
    %83 = tpu.matmul %82, %69, %cst_29 {dimension_numbers = #tpu.dot_dimension_numbers<[1], [0], [0], [1], [0, 0, 1, 1], [], []>} : vector<12x12xf32>, vector<12x8xf32>, vector<12x8xf32> -> vector<12x8xf32>
    %84 = vector.extract_strided_slice %32 {offsets = [0, 24], sizes = [12, 8], strides = [1, 1]} : vector<12x96xf32> to vector<12x8xf32>
    %85 = vector.extract_strided_slice %32 {offsets = [0, 56], sizes = [12, 8], strides = [1, 1]} : vector<12x96xf32> to vector<12x8xf32>
    %86 = vector.extract_strided_slice %32 {offsets = [0, 88], sizes = [12, 8], strides = [1, 1]} : vector<12x96xf32> to vector<12x8xf32>
    %cst_30 = arith.constant dense<0.000000e+00> : vector<12x12xf32>
    %87 = tpu.matmul %84, %85, %cst_30 {dimension_numbers = #tpu.dot_dimension_numbers<[1], [1], [0], [0], [0, 0, 1, 0], [], []>} : vector<12x8xf32>, vector<12x8xf32>, vector<12x12xf32> -> vector<12x12xf32>
    %cst_31 = arith.constant 0.353553385 : f32
    %88 = vector.broadcast %cst_31 : f32 to vector<12x12xf32>
    %89 = arith.mulf %87, %88 : vector<12x12xf32>
    %cst_32 = arith.constant dense<0xFF800000> : vector<12xf32>
    %90 = vector.multi_reduction <maximumf>, %89, %cst_32 [1] : vector<12x12xf32> to vector<12xf32>
    %91 = vector.shape_cast %90 : vector<12xf32> to vector<12x1xf32>
    %92 = vector.broadcast %91 : vector<12x1xf32> to vector<12x12xf32>
    %93 = arith.subf %89, %92 : vector<12x12xf32>
    %94 = math.exp %93 : vector<12x12xf32>
    %cst_33 = arith.constant dense<0.000000e+00> : vector<12xf32>
    %95 = vector.multi_reduction <add>, %94, %cst_33 [1] : vector<12x12xf32> to vector<12xf32>
    %96 = vector.shape_cast %95 : vector<12xf32> to vector<12x1xf32>
    %97 = tpu.reciprocal %96 {approx = true} : vector<12x1xf32> -> vector<12x1xf32>
    %98 = vector.broadcast %97 : vector<12x1xf32> to vector<12x12xf32>
    %99 = arith.mulf %94, %98 : vector<12x12xf32>
    %cst_34 = arith.constant dense<0.000000e+00> : vector<12x8xf32>
    %100 = tpu.matmul %99, %86, %cst_34 {dimension_numbers = #tpu.dot_dimension_numbers<[1], [0], [0], [1], [0, 0, 1, 1], [], []>} : vector<12x12xf32>, vector<12x8xf32>, vector<12x8xf32> -> vector<12x8xf32>
    %101 = tpu.concatenate %49, %66, %83, %100 in 1 : vector<12x8xf32>, vector<12x8xf32>, vector<12x8xf32>, vector<12x8xf32> -> vector<12x32xf32>
    %102 = arith.truncf %101 : vector<12x32xf32> to vector<12x32xbf16>
    %c0_35 = arith.constant 0 : index
    %c0_36 = arith.constant 0 : index
    %103 = vector.load %arg6[%c0_35, %c0_36] : memref<32x32xbf16, #tpu.memory_space<vmem>>, vector<32x32xbf16>
    %cst_37 = arith.constant dense<0.000000e+00> : vector<12x32xf32>
    %104 = tpu.matmul %102, %103, %cst_37 {dimension_numbers = #tpu.dot_dimension_numbers<[1], [0], [0], [1], [0, 0, 1, 1], [], []>} : vector<12x32xbf16>, vector<32x32xbf16>, vector<12x32xf32> -> vector<12x32xf32>
    %c0_38 = arith.constant 0 : index
    %c0_39 = arith.constant 0 : index
    %105 = vector.load %arg7[%c0_38, %c0_39] : memref<1x32xf32, #tpu.memory_space<vmem>>, vector<1x32xf32>
    %106 = vector.broadcast %105 : vector<1x32xf32> to vector<12x32xf32>
    %107 = arith.addf %104, %106 : vector<12x32xf32>
    %108 = arith.addf %107, %2 : vector<12x32xf32>
    %c0_40 = arith.constant 0 : index
    %c0_41 = arith.constant 0 : index
    %109 = vector.load %arg8[%c0_40, %c0_41] : memref<1x32xf32, #tpu.memory_space<vmem>>, vector<1x32xf32>
    %c0_42 = arith.constant 0 : index
    %c0_43 = arith.constant 0 : index
    %110 = vector.load %arg9[%c0_42, %c0_43] : memref<1x32xf32, #tpu.memory_space<vmem>>, vector<1x32xf32>
    %cst_44 = arith.constant dense<0.000000e+00> : vector<12xf32>
    %111 = vector.multi_reduction <add>, %108, %cst_44 [1] : vector<12x32xf32> to vector<12xf32>
    %112 = vector.shape_cast %111 : vector<12xf32> to vector<12x1xf32>
    %cst_45 = arith.constant 3.200000e+01 : f32
    %113 = vector.broadcast %cst_45 : f32 to vector<12x1xf32>
    %114 = arith.divf %112, %113 : vector<12x1xf32>
    %115 = vector.broadcast %114 : vector<12x1xf32> to vector<12x32xf32>
    %116 = arith.subf %108, %115 : vector<12x32xf32>
    %117 = arith.mulf %116, %116 : vector<12x32xf32>
    %cst_46 = arith.constant dense<0.000000e+00> : vector<12xf32>
    %118 = vector.multi_reduction <add>, %117, %cst_46 [1] : vector<12x32xf32> to vector<12xf32>
    %119 = vector.shape_cast %118 : vector<12xf32> to vector<12x1xf32>
    %cst_47 = arith.constant 3.200000e+01 : f32
    %120 = vector.broadcast %cst_47 : f32 to vector<12x1xf32>
    %121 = arith.divf %119, %120 : vector<12x1xf32>
    %122 = vector.broadcast %114 : vector<12x1xf32> to vector<12x32xf32>
    %123 = arith.subf %108, %122 : vector<12x32xf32>
    %cst_48 = arith.constant 9.99999974E-6 : f32
    %124 = vector.broadcast %cst_48 : f32 to vector<12x1xf32>
    %125 = arith.addf %121, %124 : vector<12x1xf32>
    %126 = math.rsqrt %125 : vector<12x1xf32>
    %127 = vector.broadcast %126 : vector<12x1xf32> to vector<12x32xf32>
    %128 = arith.mulf %123, %127 : vector<12x32xf32>
    %129 = vector.broadcast %109 : vector<1x32xf32> to vector<12x32xf32>
    %130 = arith.mulf %128, %129 : vector<12x32xf32>
    %131 = vector.broadcast %110 : vector<1x32xf32> to vector<12x32xf32>
    %132 = arith.addf %130, %131 : vector<12x32xf32>
    %133 = arith.truncf %132 : vector<12x32xf32> to vector<12x32xbf16>
    %c0_49 = arith.constant 0 : index
    %c0_50 = arith.constant 0 : index
    %134 = vector.load %arg10[%c0_49, %c0_50] : memref<32x128xbf16, #tpu.memory_space<vmem>>, vector<32x128xbf16>
    %cst_51 = arith.constant dense<0.000000e+00> : vector<12x128xf32>
    %135 = tpu.matmul %133, %134, %cst_51 {dimension_numbers = #tpu.dot_dimension_numbers<[1], [0], [0], [1], [0, 0, 1, 1], [], []>} : vector<12x32xbf16>, vector<32x128xbf16>, vector<12x128xf32> -> vector<12x128xf32>
    %c0_52 = arith.constant 0 : index
    %c0_53 = arith.constant 0 : index
    %136 = vector.load %arg11[%c0_52, %c0_53] : memref<1x128xf32, #tpu.memory_space<vmem>>, vector<1x128xf32>
    %137 = vector.broadcast %136 : vector<1x128xf32> to vector<12x128xf32>
    %138 = arith.addf %135, %137 : vector<12x128xf32>
    %139 = arith.mulf %138, %138 : vector<12x128xf32>
    %140 = arith.mulf %138, %139 : vector<12x128xf32>
    %cst_54 = arith.constant 4.471500e-02 : f32
    %141 = vector.broadcast %cst_54 : f32 to vector<12x128xf32>
    %142 = arith.mulf %141, %140 : vector<12x128xf32>
    %143 = arith.addf %138, %142 : vector<12x128xf32>
    %cst_55 = arith.constant 0.797884583 : f32
    %144 = vector.broadcast %cst_55 : f32 to vector<12x128xf32>
    %145 = arith.mulf %144, %143 : vector<12x128xf32>
    %146 = math.tanh %145 : vector<12x128xf32>
    %cst_56 = arith.constant 1.000000e+00 : f32
    %147 = vector.broadcast %cst_56 : f32 to vector<12x128xf32>
    %148 = arith.addf %147, %146 : vector<12x128xf32>
    %cst_57 = arith.constant 5.000000e-01 : f32
    %149 = vector.broadcast %cst_57 : f32 to vector<12x128xf32>
    %150 = arith.mulf %149, %148 : vector<12x128xf32>
    %151 = arith.mulf %138, %150 : vector<12x128xf32>
    %152 = arith.truncf %151 : vector<12x128xf32> to vector<12x128xbf16>
    %c0_58 = arith.constant 0 : index
    %c0_59 = arith.constant 0 : index
    %153 = vector.load %arg12[%c0_58, %c0_59] : memref<128x32xbf16, #tpu.memory_space<vmem>>, vector<128x32xbf16>
    %cst_60 = arith.constant dense<0.000000e+00> : vector<12x32xf32>
    %154 = tpu.matmul %152, %153, %cst_60 {dimension_numbers = #tpu.dot_dimension_numbers<[1], [0], [0], [1], [0, 0, 1, 1], [], []>} : vector<12x128xbf16>, vector<128x32xbf16>, vector<12x32xf32> -> vector<12x32xf32>
    %c0_61 = arith.constant 0 : index
    %c0_62 = arith.constant 0 : index
    %155 = vector.load %arg13[%c0_61, %c0_62] : memref<1x32xf32, #tpu.memory_space<vmem>>, vector<1x32xf32>
    %156 = vector.broadcast %155 : vector<1x32xf32> to vector<12x32xf32>
    %157 = arith.addf %154, %156 : vector<12x32xf32>
    %158 = arith.addf %157, %108 : vector<12x32xf32>
    %159 = arith.truncf %158 : vector<12x32xf32> to vector<12x32xbf16>
    %c0_63 = arith.constant 0 : index
    %c0_64 = arith.constant 0 : index
    %c0_65 = arith.constant 0 : index
    %160 = vector.load %arg14[%c0_63, %c0_64, %c0_65] : memref<1x12x32xbf16, #tpu.memory_space<vmem>>, vector<1x12x32xbf16>
    %161 = vector.shape_cast %160 : vector<1x12x32xbf16> to vector<12x32xbf16>
    %162 = vector.shape_cast %159 : vector<12x32xbf16> to vector<1x12x32xbf16>
    tpu.vector_store %arg14[%c0_63, %c0_64, %c0_65], %162 {strides = array<i32>} : memref<1x12x32xbf16, #tpu.memory_space<vmem>>, vector<1x12x32xbf16>,
    return
  }
  func.func @transform_0(%arg0: i32) -> (i32, i32, i32) {
    %c0_i32 = arith.constant 0 : i32
    %c0_i32_0 = arith.constant 0 : i32
    %c0_i32_1 = arith.constant 0 : i32
    return %arg0, %c0_i32, %c0_i32_0 : i32, i32, i32
  }
  func.func @transform_1(%arg0: i32) -> (i32, i32) {
    %c0_i32 = arith.constant 0 : i32
    %c0_i32_0 = arith.constant 0 : i32
    %c0_i32_1 = arith.constant 0 : i32
    return %c0_i32, %c0_i32_0 : i32, i32
  }
  func.func @transform_2(%arg0: i32) -> (i32, i32) {
    %c0_i32 = arith.constant 0 : i32
    %c0_i32_0 = arith.constant 0 : i32
    %c0_i32_1 = arith.constant 0 : i32
    return %c0_i32, %c0_i32_0 : i32, i32
  }
  func.func @transform_3(%arg0: i32) -> (i32, i32) {
    %c0_i32 = arith.constant 0 : i32
    %c0_i32_0 = arith.constant 0 : i32
    %c0_i32_1 = arith.constant 0 : i32
    return %c0_i32, %c0_i32_0 : i32, i32
  }
  func.func @transform_4(%arg0: i32) -> (i32, i32) {
    %c0_i32 = arith.constant 0 : i32
    %c0_i32_0 = arith.constant 0 : i32
    %c0_i32_1 = arith.constant 0 : i32
    return %c0_i32, %c0_i32_0 : i32, i32
  }
  func.func @transform_5(%arg0: i32) -> (i32, i32) {
    %c0_i32 = arith.constant 0 : i32
    %c0_i32_0 = arith.constant 0 : i32
    %c0_i32_1 = arith.constant 0 : i32
    return %c0_i32, %c0_i32_0 : i32, i32
  }
  func.func @transform_6(%arg0: i32) -> (i32, i32) {
    %c0_i32 = arith.constant 0 : i32
    %c0_i32_0 = arith.constant 0 : i32
    %c0_i32_1 = arith.constant 0 : i32
    return %c0_i32, %c0_i32_0 : i32, i32
  }
  func.func @transform_7(%arg0: i32) -> (i32, i32) {
    %c0_i32 = arith.constant 0 : i32
    %c0_i32_0 = arith.constant 0 : i32
    %c0_i32_1 = arith.constant 0 : i32
    return %c0_i32, %c0_i32_0 : i32, i32
  }
  func.func @transform_8(%arg0: i32) -> (i32, i32) {
    %c0_i32 = arith.constant 0 : i32
    %c0_i32_0 = arith.constant 0 : i32
    %c0_i32_1 = arith.constant 0 : i32
    return %c0_i32, %c0_i32_0 : i32, i32
  }
  func.func @transform_9(%arg0: i32) -> (i32, i32) {
    %c0_i32 = arith.constant 0 : i32
    %c0_i32_0 = arith.constant 0 : i32
    %c0_i32_1 = arith.constant 0 : i32
    return %c0_i32, %c0_i32_0 : i32, i32
  }
  func.func @transform_10(%arg0: i32) -> (i32, i32) {
    %c0_i32 = arith.constant 0 : i32
    %c0_i32_0 = arith.constant 0 : i32
    %c0_i32_1 = arith.constant 0 : i32
    return %c0_i32, %c0_i32_0 : i32, i32
  }
  func.func @transform_11(%arg0: i32) -> (i32, i32) {
    %c0_i32 = arith.constant 0 : i32
    %c0_i32_0 = arith.constant 0 : i32
    %c0_i32_1 = arith.constant 0 : i32
    return %c0_i32, %c0_i32_0 : i32, i32
  }
  func.func @transform_12(%arg0: i32) -> (i32, i32) {
    %c0_i32 = arith.constant 0 : i32
    %c0_i32_0 = arith.constant 0 : i32
    %c0_i32_1 = arith.constant 0 : i32
    return %c0_i32, %c0_i32_0 : i32, i32
  }
  func.func @transform_13(%arg0: i32) -> (i32, i32, i32) {
    %c0_i32 = arith.constant 0 : i32
    %c0_i32_0 = arith.constant 0 : i32
    %c0_i32_1 = arith.constant 0 : i32
    return %arg0, %c0_i32, %c0_i32_0 : i32, i32, i32
  }
}

module attributes {stable_mosaic.version = 11 : i64} {
  func.func @_layernorm_kernel(%arg0: i32, %arg1: memref<16x32xbf16, #tpu.memory_space<vmem>>, %arg2: memref<1x32xf32, #tpu.memory_space<vmem>>, %arg3: memref<1x32xf32, #tpu.memory_space<vmem>>, %arg4: memref<16x32xbf16, #tpu.memory_space<vmem>>) attributes {dimension_semantics = [#tpu.dimension_semantics<parallel>], iteration_bounds = array<i64: 2>, scalar_prefetch = 0 : i64, scratch_operands = 0 : i64, tpu.core_type = #tpu.core_type<tc>, window_params = [{transform_indices = @transform_0, window_bounds = array<i64: 16, 32>}, {pipeline_mode = #tpu.pipeline_mode<synchronous>, transform_indices = @transform_1, window_bounds = array<i64: 1, 32>}, {pipeline_mode = #tpu.pipeline_mode<synchronous>, transform_indices = @transform_2, window_bounds = array<i64: 1, 32>}, {transform_indices = @transform_3, window_bounds = array<i64: 16, 32>}]} {
    %c0 = arith.constant 0 : index
    %c0_0 = arith.constant 0 : index
    %0 = vector.load %arg1[%c0, %c0_0] : memref<16x32xbf16, #tpu.memory_space<vmem>>, vector<16x32xbf16>
    %1 = arith.extf %0 : vector<16x32xbf16> to vector<16x32xf32>
    %c0_1 = arith.constant 0 : index
    %c0_2 = arith.constant 0 : index
    %2 = vector.load %arg2[%c0_1, %c0_2] : memref<1x32xf32, #tpu.memory_space<vmem>>, vector<1x32xf32>
    %c0_3 = arith.constant 0 : index
    %c0_4 = arith.constant 0 : index
    %3 = vector.load %arg3[%c0_3, %c0_4] : memref<1x32xf32, #tpu.memory_space<vmem>>, vector<1x32xf32>
    %cst = arith.constant dense<0.000000e+00> : vector<16xf32>
    %4 = vector.multi_reduction <add>, %1, %cst [1] : vector<16x32xf32> to vector<16xf32>
    %5 = vector.shape_cast %4 : vector<16xf32> to vector<16x1xf32>
    %cst_5 = arith.constant 3.200000e+01 : f32
    %6 = vector.broadcast %cst_5 : f32 to vector<16x1xf32>
    %7 = arith.divf %5, %6 : vector<16x1xf32>
    %8 = vector.broadcast %7 : vector<16x1xf32> to vector<16x32xf32>
    %9 = arith.subf %1, %8 : vector<16x32xf32>
    %10 = arith.mulf %9, %9 : vector<16x32xf32>
    %cst_6 = arith.constant dense<0.000000e+00> : vector<16xf32>
    %11 = vector.multi_reduction <add>, %10, %cst_6 [1] : vector<16x32xf32> to vector<16xf32>
    %12 = vector.shape_cast %11 : vector<16xf32> to vector<16x1xf32>
    %cst_7 = arith.constant 3.200000e+01 : f32
    %13 = vector.broadcast %cst_7 : f32 to vector<16x1xf32>
    %14 = arith.divf %12, %13 : vector<16x1xf32>
    %15 = vector.broadcast %7 : vector<16x1xf32> to vector<16x32xf32>
    %16 = arith.subf %1, %15 : vector<16x32xf32>
    %cst_8 = arith.constant 9.99999974E-6 : f32
    %17 = vector.broadcast %cst_8 : f32 to vector<16x1xf32>
    %18 = arith.addf %14, %17 : vector<16x1xf32>
    %19 = math.rsqrt %18 : vector<16x1xf32>
    %20 = vector.broadcast %19 : vector<16x1xf32> to vector<16x32xf32>
    %21 = arith.mulf %16, %20 : vector<16x32xf32>
    %22 = vector.broadcast %2 : vector<1x32xf32> to vector<16x32xf32>
    %23 = arith.mulf %21, %22 : vector<16x32xf32>
    %24 = vector.broadcast %3 : vector<1x32xf32> to vector<16x32xf32>
    %25 = arith.addf %23, %24 : vector<16x32xf32>
    %26 = arith.truncf %25 : vector<16x32xf32> to vector<16x32xbf16>
    %c0_9 = arith.constant 0 : index
    %c0_10 = arith.constant 0 : index
    %27 = vector.load %arg4[%c0_9, %c0_10] : memref<16x32xbf16, #tpu.memory_space<vmem>>, vector<16x32xbf16>
    tpu.vector_store %arg4[%c0_9, %c0_10], %26 {strides = array<i32>} : memref<16x32xbf16, #tpu.memory_space<vmem>>, vector<16x32xbf16>,
    return
  }
  func.func @transform_0(%arg0: i32) -> (i32, i32) {
    %c0_i32 = arith.constant 0 : i32
    %c0_i32_0 = arith.constant 0 : i32
    return %arg0, %c0_i32 : i32, i32
  }
  func.func @transform_1(%arg0: i32) -> (i32, i32) {
    %c0_i32 = arith.constant 0 : i32
    %c0_i32_0 = arith.constant 0 : i32
    %c0_i32_1 = arith.constant 0 : i32
    return %c0_i32, %c0_i32_0 : i32, i32
  }
  func.func @transform_2(%arg0: i32) -> (i32, i32) {
    %c0_i32 = arith.constant 0 : i32
    %c0_i32_0 = arith.constant 0 : i32
    %c0_i32_1 = arith.constant 0 : i32
    return %c0_i32, %c0_i32_0 : i32, i32
  }
  func.func @transform_3(%arg0: i32) -> (i32, i32) {
    %c0_i32 = arith.constant 0 : i32
    %c0_i32_0 = arith.constant 0 : i32
    return %arg0, %c0_i32 : i32, i32
  }
}

module attributes {stable_mosaic.version = 11 : i64} {
  func.func @_block_kernel(%arg0: i32, %arg1: memref<1x24x32xbf16, #tpu.memory_space<vmem>>, %arg2: memref<24x32xf32, #tpu.memory_space<vmem>>, %arg3: memref<1x32xf32, #tpu.memory_space<vmem>>, %arg4: memref<1x32xf32, #tpu.memory_space<vmem>>, %arg5: memref<32x96xbf16, #tpu.memory_space<vmem>>, %arg6: memref<1x96xf32, #tpu.memory_space<vmem>>, %arg7: memref<32x32xbf16, #tpu.memory_space<vmem>>, %arg8: memref<1x32xf32, #tpu.memory_space<vmem>>, %arg9: memref<1x32xf32, #tpu.memory_space<vmem>>, %arg10: memref<1x32xf32, #tpu.memory_space<vmem>>, %arg11: memref<32x128xbf16, #tpu.memory_space<vmem>>, %arg12: memref<1x128xf32, #tpu.memory_space<vmem>>, %arg13: memref<128x32xbf16, #tpu.memory_space<vmem>>, %arg14: memref<1x32xf32, #tpu.memory_space<vmem>>, %arg15: memref<1x24x32xbf16, #tpu.memory_space<vmem>>) attributes {dimension_semantics = [#tpu.dimension_semantics<parallel>], iteration_bounds = array<i64: 2>, scalar_prefetch = 0 : i64, scratch_operands = 0 : i64, tpu.core_type = #tpu.core_type<tc>, window_params = [{transform_indices = @transform_0, window_bounds = array<i64: 1, 24, 32>}, {pipeline_mode = #tpu.pipeline_mode<synchronous>, transform_indices = @transform_1, window_bounds = array<i64: 24, 32>}, {pipeline_mode = #tpu.pipeline_mode<synchronous>, transform_indices = @transform_2, window_bounds = array<i64: 1, 32>}, {pipeline_mode = #tpu.pipeline_mode<synchronous>, transform_indices = @transform_3, window_bounds = array<i64: 1, 32>}, {pipeline_mode = #tpu.pipeline_mode<synchronous>, transform_indices = @transform_4, window_bounds = array<i64: 32, 96>}, {pipeline_mode = #tpu.pipeline_mode<synchronous>, transform_indices = @transform_5, window_bounds = array<i64: 1, 96>}, {pipeline_mode = #tpu.pipeline_mode<synchronous>, transform_indices = @transform_6, window_bounds = array<i64: 32, 32>}, {pipeline_mode = #tpu.pipeline_mode<synchronous>, transform_indices = @transform_7, window_bounds = array<i64: 1, 32>}, {pipeline_mode = #tpu.pipeline_mode<synchronous>, transform_indices = @transform_8, window_bounds = array<i64: 1, 32>}, {pipeline_mode = #tpu.pipeline_mode<synchronous>, transform_indices = @transform_9, window_bounds = array<i64: 1, 32>}, {pipeline_mode = #tpu.pipeline_mode<synchronous>, transform_indices = @transform_10, window_bounds = array<i64: 32, 128>}, {pipeline_mode = #tpu.pipeline_mode<synchronous>, transform_indices = @transform_11, window_bounds = array<i64: 1, 128>}, {pipeline_mode = #tpu.pipeline_mode<synchronous>, transform_indices = @transform_12, window_bounds = array<i64: 128, 32>}, {pipeline_mode = #tpu.pipeline_mode<synchronous>, transform_indices = @transform_13, window_bounds = array<i64: 1, 32>}, {transform_indices = @transform_14, window_bounds = array<i64: 1, 24, 32>}]} {
    %c0 = arith.constant 0 : index
    %c0_0 = arith.constant 0 : index
    %c0_1 = arith.constant 0 : index
    %0 = vector.load %arg1[%c0, %c0_0, %c0_1] : memref<1x24x32xbf16, #tpu.memory_space<vmem>>, vector<1x24x32xbf16>
    %1 = vector.shape_cast %0 : vector<1x24x32xbf16> to vector<24x32xbf16>
    %2 = arith.extf %1 : vector<24x32xbf16> to vector<24x32xf32>
    %c0_2 = arith.constant 0 : index
    %c0_3 = arith.constant 0 : index
    %3 = vector.load %arg2[%c0_2, %c0_3] : memref<24x32xf32, #tpu.memory_space<vmem>>, vector<24x32xf32>
    %4 = arith.addf %2, %3 : vector<24x32xf32>
    %c0_4 = arith.constant 0 : index
    %c0_5 = arith.constant 0 : index
    %5 = vector.load %arg3[%c0_4, %c0_5] : memref<1x32xf32, #tpu.memory_space<vmem>>, vector<1x32xf32>
    %c0_6 = arith.constant 0 : index
    %c0_7 = arith.constant 0 : index
    %6 = vector.load %arg4[%c0_6, %c0_7] : memref<1x32xf32, #tpu.memory_space<vmem>>, vector<1x32xf32>
    %cst = arith.constant dense<0.000000e+00> : vector<24xf32>
    %7 = vector.multi_reduction <add>, %4, %cst [1] : vector<24x32xf32> to vector<24xf32>
    %8 = vector.shape_cast %7 : vector<24xf32> to vector<24x1xf32>
    %cst_8 = arith.constant 3.200000e+01 : f32
    %9 = vector.broadcast %cst_8 : f32 to vector<24x1xf32>
    %10 = arith.divf %8, %9 : vector<24x1xf32>
    %11 = vector.broadcast %10 : vector<24x1xf32> to vector<24x32xf32>
    %12 = arith.subf %4, %11 : vector<24x32xf32>
    %13 = arith.mulf %12, %12 : vector<24x32xf32>
    %cst_9 = arith.constant dense<0.000000e+00> : vector<24xf32>
    %14 = vector.multi_reduction <add>, %13, %cst_9 [1] : vector<24x32xf32> to vector<24xf32>
    %15 = vector.shape_cast %14 : vector<24xf32> to vector<24x1xf32>
    %cst_10 = arith.constant 3.200000e+01 : f32
    %16 = vector.broadcast %cst_10 : f32 to vector<24x1xf32>
    %17 = arith.divf %15, %16 : vector<24x1xf32>
    %18 = vector.broadcast %10 : vector<24x1xf32> to vector<24x32xf32>
    %19 = arith.subf %4, %18 : vector<24x32xf32>
    %cst_11 = arith.constant 9.99999974E-6 : f32
    %20 = vector.broadcast %cst_11 : f32 to vector<24x1xf32>
    %21 = arith.addf %17, %20 : vector<24x1xf32>
    %22 = math.rsqrt %21 : vector<24x1xf32>
    %23 = vector.broadcast %22 : vector<24x1xf32> to vector<24x32xf32>
    %24 = arith.mulf %19, %23 : vector<24x32xf32>
    %25 = vector.broadcast %5 : vector<1x32xf32> to vector<24x32xf32>
    %26 = arith.mulf %24, %25 : vector<24x32xf32>
    %27 = vector.broadcast %6 : vector<1x32xf32> to vector<24x32xf32>
    %28 = arith.addf %26, %27 : vector<24x32xf32>
    %29 = arith.truncf %28 : vector<24x32xf32> to vector<24x32xbf16>
    %c0_12 = arith.constant 0 : index
    %c0_13 = arith.constant 0 : index
    %30 = vector.load %arg5[%c0_12, %c0_13] : memref<32x96xbf16, #tpu.memory_space<vmem>>, vector<32x96xbf16>
    %cst_14 = arith.constant dense<0.000000e+00> : vector<24x96xf32>
    %31 = tpu.matmul %29, %30, %cst_14 {dimension_numbers = #tpu.dot_dimension_numbers<[1], [0], [0], [1], [0, 0, 1, 1], [], []>} : vector<24x32xbf16>, vector<32x96xbf16>, vector<24x96xf32> -> vector<24x96xf32>
    %c0_15 = arith.constant 0 : index
    %c0_16 = arith.constant 0 : index
    %32 = vector.load %arg6[%c0_15, %c0_16] : memref<1x96xf32, #tpu.memory_space<vmem>>, vector<1x96xf32>
    %33 = vector.broadcast %32 : vector<1x96xf32> to vector<24x96xf32>
    %34 = arith.addf %31, %33 : vector<24x96xf32>
    %35 = vector.extract_strided_slice %34 {offsets = [0, 0], sizes = [24, 8], strides = [1, 1]} : vector<24x96xf32> to vector<24x8xf32>
    %36 = vector.extract_strided_slice %34 {offsets = [0, 32], sizes = [24, 8], strides = [1, 1]} : vector<24x96xf32> to vector<24x8xf32>
    %37 = vector.extract_strided_slice %34 {offsets = [0, 64], sizes = [24, 8], strides = [1, 1]} : vector<24x96xf32> to vector<24x8xf32>
    %cst_17 = arith.constant dense<0.000000e+00> : vector<24x24xf32>
    %38 = tpu.matmul %35, %36, %cst_17 {dimension_numbers = #tpu.dot_dimension_numbers<[1], [1], [0], [0], [0, 0, 1, 0], [], []>} : vector<24x8xf32>, vector<24x8xf32>, vector<24x24xf32> -> vector<24x24xf32>
    %cst_18 = arith.constant 0.353553385 : f32
    %39 = vector.broadcast %cst_18 : f32 to vector<24x24xf32>
    %40 = arith.mulf %38, %39 : vector<24x24xf32>
    %cst_19 = arith.constant dense<0xFF800000> : vector<24xf32>
    %41 = vector.multi_reduction <maximumf>, %40, %cst_19 [1] : vector<24x24xf32> to vector<24xf32>
    %42 = vector.shape_cast %41 : vector<24xf32> to vector<24x1xf32>
    %43 = vector.broadcast %42 : vector<24x1xf32> to vector<24x24xf32>
    %44 = arith.subf %40, %43 : vector<24x24xf32>
    %45 = math.exp %44 : vector<24x24xf32>
    %cst_20 = arith.constant dense<0.000000e+00> : vector<24xf32>
    %46 = vector.multi_reduction <add>, %45, %cst_20 [1] : vector<24x24xf32> to vector<24xf32>
    %47 = vector.shape_cast %46 : vector<24xf32> to vector<24x1xf32>
    %48 = tpu.reciprocal %47 {approx = true} : vector<24x1xf32> -> vector<24x1xf32>
    %49 = vector.broadcast %48 : vector<24x1xf32> to vector<24x24xf32>
    %50 = arith.mulf %45, %49 : vector<24x24xf32>
    %cst_21 = arith.constant dense<0.000000e+00> : vector<24x8xf32>
    %51 = tpu.matmul %50, %37, %cst_21 {dimension_numbers = #tpu.dot_dimension_numbers<[1], [0], [0], [1], [0, 0, 1, 1], [], []>} : vector<24x24xf32>, vector<24x8xf32>, vector<24x8xf32> -> vector<24x8xf32>
    %52 = vector.extract_strided_slice %34 {offsets = [0, 8], sizes = [24, 8], strides = [1, 1]} : vector<24x96xf32> to vector<24x8xf32>
    %53 = vector.extract_strided_slice %34 {offsets = [0, 40], sizes = [24, 8], strides = [1, 1]} : vector<24x96xf32> to vector<24x8xf32>
    %54 = vector.extract_strided_slice %34 {offsets = [0, 72], sizes = [24, 8], strides = [1, 1]} : vector<24x96xf32> to vector<24x8xf32>
    %cst_22 = arith.constant dense<0.000000e+00> : vector<24x24xf32>
    %55 = tpu.matmul %52, %53, %cst_22 {dimension_numbers = #tpu.dot_dimension_numbers<[1], [1], [0], [0], [0, 0, 1, 0], [], []>} : vector<24x8xf32>, vector<24x8xf32>, vector<24x24xf32> -> vector<24x24xf32>
    %cst_23 = arith.constant 0.353553385 : f32
    %56 = vector.broadcast %cst_23 : f32 to vector<24x24xf32>
    %57 = arith.mulf %55, %56 : vector<24x24xf32>
    %cst_24 = arith.constant dense<0xFF800000> : vector<24xf32>
    %58 = vector.multi_reduction <maximumf>, %57, %cst_24 [1] : vector<24x24xf32> to vector<24xf32>
    %59 = vector.shape_cast %58 : vector<24xf32> to vector<24x1xf32>
    %60 = vector.broadcast %59 : vector<24x1xf32> to vector<24x24xf32>
    %61 = arith.subf %57, %60 : vector<24x24xf32>
    %62 = math.exp %61 : vector<24x24xf32>
    %cst_25 = arith.constant dense<0.000000e+00> : vector<24xf32>
    %63 = vector.multi_reduction <add>, %62, %cst_25 [1] : vector<24x24xf32> to vector<24xf32>
    %64 = vector.shape_cast %63 : vector<24xf32> to vector<24x1xf32>
    %65 = tpu.reciprocal %64 {approx = true} : vector<24x1xf32> -> vector<24x1xf32>
    %66 = vector.broadcast %65 : vector<24x1xf32> to vector<24x24xf32>
    %67 = arith.mulf %62, %66 : vector<24x24xf32>
    %cst_26 = arith.constant dense<0.000000e+00> : vector<24x8xf32>
    %68 = tpu.matmul %67, %54, %cst_26 {dimension_numbers = #tpu.dot_dimension_numbers<[1], [0], [0], [1], [0, 0, 1, 1], [], []>} : vector<24x24xf32>, vector<24x8xf32>, vector<24x8xf32> -> vector<24x8xf32>
    %69 = vector.extract_strided_slice %34 {offsets = [0, 16], sizes = [24, 8], strides = [1, 1]} : vector<24x96xf32> to vector<24x8xf32>
    %70 = vector.extract_strided_slice %34 {offsets = [0, 48], sizes = [24, 8], strides = [1, 1]} : vector<24x96xf32> to vector<24x8xf32>
    %71 = vector.extract_strided_slice %34 {offsets = [0, 80], sizes = [24, 8], strides = [1, 1]} : vector<24x96xf32> to vector<24x8xf32>
    %cst_27 = arith.constant dense<0.000000e+00> : vector<24x24xf32>
    %72 = tpu.matmul %69, %70, %cst_27 {dimension_numbers = #tpu.dot_dimension_numbers<[1], [1], [0], [0], [0, 0, 1, 0], [], []>} : vector<24x8xf32>, vector<24x8xf32>, vector<24x24xf32> -> vector<24x24xf32>
    %cst_28 = arith.constant 0.353553385 : f32
    %73 = vector.broadcast %cst_28 : f32 to vector<24x24xf32>
    %74 = arith.mulf %72, %73 : vector<24x24xf32>
    %cst_29 = arith.constant dense<0xFF800000> : vector<24xf32>
    %75 = vector.multi_reduction <maximumf>, %74, %cst_29 [1] : vector<24x24xf32> to vector<24xf32>
    %76 = vector.shape_cast %75 : vector<24xf32> to vector<24x1xf32>
    %77 = vector.broadcast %76 : vector<24x1xf32> to vector<24x24xf32>
    %78 = arith.subf %74, %77 : vector<24x24xf32>
    %79 = math.exp %78 : vector<24x24xf32>
    %cst_30 = arith.constant dense<0.000000e+00> : vector<24xf32>
    %80 = vector.multi_reduction <add>, %79, %cst_30 [1] : vector<24x24xf32> to vector<24xf32>
    %81 = vector.shape_cast %80 : vector<24xf32> to vector<24x1xf32>
    %82 = tpu.reciprocal %81 {approx = true} : vector<24x1xf32> -> vector<24x1xf32>
    %83 = vector.broadcast %82 : vector<24x1xf32> to vector<24x24xf32>
    %84 = arith.mulf %79, %83 : vector<24x24xf32>
    %cst_31 = arith.constant dense<0.000000e+00> : vector<24x8xf32>
    %85 = tpu.matmul %84, %71, %cst_31 {dimension_numbers = #tpu.dot_dimension_numbers<[1], [0], [0], [1], [0, 0, 1, 1], [], []>} : vector<24x24xf32>, vector<24x8xf32>, vector<24x8xf32> -> vector<24x8xf32>
    %86 = vector.extract_strided_slice %34 {offsets = [0, 24], sizes = [24, 8], strides = [1, 1]} : vector<24x96xf32> to vector<24x8xf32>
    %87 = vector.extract_strided_slice %34 {offsets = [0, 56], sizes = [24, 8], strides = [1, 1]} : vector<24x96xf32> to vector<24x8xf32>
    %88 = vector.extract_strided_slice %34 {offsets = [0, 88], sizes = [24, 8], strides = [1, 1]} : vector<24x96xf32> to vector<24x8xf32>
    %cst_32 = arith.constant dense<0.000000e+00> : vector<24x24xf32>
    %89 = tpu.matmul %86, %87, %cst_32 {dimension_numbers = #tpu.dot_dimension_numbers<[1], [1], [0], [0], [0, 0, 1, 0], [], []>} : vector<24x8xf32>, vector<24x8xf32>, vector<24x24xf32> -> vector<24x24xf32>
    %cst_33 = arith.constant 0.353553385 : f32
    %90 = vector.broadcast %cst_33 : f32 to vector<24x24xf32>
    %91 = arith.mulf %89, %90 : vector<24x24xf32>
    %cst_34 = arith.constant dense<0xFF800000> : vector<24xf32>
    %92 = vector.multi_reduction <maximumf>, %91, %cst_34 [1] : vector<24x24xf32> to vector<24xf32>
    %93 = vector.shape_cast %92 : vector<24xf32> to vector<24x1xf32>
    %94 = vector.broadcast %93 : vector<24x1xf32> to vector<24x24xf32>
    %95 = arith.subf %91, %94 : vector<24x24xf32>
    %96 = math.exp %95 : vector<24x24xf32>
    %cst_35 = arith.constant dense<0.000000e+00> : vector<24xf32>
    %97 = vector.multi_reduction <add>, %96, %cst_35 [1] : vector<24x24xf32> to vector<24xf32>
    %98 = vector.shape_cast %97 : vector<24xf32> to vector<24x1xf32>
    %99 = tpu.reciprocal %98 {approx = true} : vector<24x1xf32> -> vector<24x1xf32>
    %100 = vector.broadcast %99 : vector<24x1xf32> to vector<24x24xf32>
    %101 = arith.mulf %96, %100 : vector<24x24xf32>
    %cst_36 = arith.constant dense<0.000000e+00> : vector<24x8xf32>
    %102 = tpu.matmul %101, %88, %cst_36 {dimension_numbers = #tpu.dot_dimension_numbers<[1], [0], [0], [1], [0, 0, 1, 1], [], []>} : vector<24x24xf32>, vector<24x8xf32>, vector<24x8xf32> -> vector<24x8xf32>
    %103 = tpu.concatenate %51, %68, %85, %102 in 1 : vector<24x8xf32>, vector<24x8xf32>, vector<24x8xf32>, vector<24x8xf32> -> vector<24x32xf32>
    %104 = arith.truncf %103 : vector<24x32xf32> to vector<24x32xbf16>
    %c0_37 = arith.constant 0 : index
    %c0_38 = arith.constant 0 : index
    %105 = vector.load %arg7[%c0_37, %c0_38] : memref<32x32xbf16, #tpu.memory_space<vmem>>, vector<32x32xbf16>
    %cst_39 = arith.constant dense<0.000000e+00> : vector<24x32xf32>
    %106 = tpu.matmul %104, %105, %cst_39 {dimension_numbers = #tpu.dot_dimension_numbers<[1], [0], [0], [1], [0, 0, 1, 1], [], []>} : vector<24x32xbf16>, vector<32x32xbf16>, vector<24x32xf32> -> vector<24x32xf32>
    %c0_40 = arith.constant 0 : index
    %c0_41 = arith.constant 0 : index
    %107 = vector.load %arg8[%c0_40, %c0_41] : memref<1x32xf32, #tpu.memory_space<vmem>>, vector<1x32xf32>
    %108 = vector.broadcast %107 : vector<1x32xf32> to vector<24x32xf32>
    %109 = arith.addf %106, %108 : vector<24x32xf32>
    %110 = arith.addf %109, %4 : vector<24x32xf32>
    %c0_42 = arith.constant 0 : index
    %c0_43 = arith.constant 0 : index
    %111 = vector.load %arg9[%c0_42, %c0_43] : memref<1x32xf32, #tpu.memory_space<vmem>>, vector<1x32xf32>
    %c0_44 = arith.constant 0 : index
    %c0_45 = arith.constant 0 : index
    %112 = vector.load %arg10[%c0_44, %c0_45] : memref<1x32xf32, #tpu.memory_space<vmem>>, vector<1x32xf32>
    %cst_46 = arith.constant dense<0.000000e+00> : vector<24xf32>
    %113 = vector.multi_reduction <add>, %110, %cst_46 [1] : vector<24x32xf32> to vector<24xf32>
    %114 = vector.shape_cast %113 : vector<24xf32> to vector<24x1xf32>
    %cst_47 = arith.constant 3.200000e+01 : f32
    %115 = vector.broadcast %cst_47 : f32 to vector<24x1xf32>
    %116 = arith.divf %114, %115 : vector<24x1xf32>
    %117 = vector.broadcast %116 : vector<24x1xf32> to vector<24x32xf32>
    %118 = arith.subf %110, %117 : vector<24x32xf32>
    %119 = arith.mulf %118, %118 : vector<24x32xf32>
    %cst_48 = arith.constant dense<0.000000e+00> : vector<24xf32>
    %120 = vector.multi_reduction <add>, %119, %cst_48 [1] : vector<24x32xf32> to vector<24xf32>
    %121 = vector.shape_cast %120 : vector<24xf32> to vector<24x1xf32>
    %cst_49 = arith.constant 3.200000e+01 : f32
    %122 = vector.broadcast %cst_49 : f32 to vector<24x1xf32>
    %123 = arith.divf %121, %122 : vector<24x1xf32>
    %124 = vector.broadcast %116 : vector<24x1xf32> to vector<24x32xf32>
    %125 = arith.subf %110, %124 : vector<24x32xf32>
    %cst_50 = arith.constant 9.99999974E-6 : f32
    %126 = vector.broadcast %cst_50 : f32 to vector<24x1xf32>
    %127 = arith.addf %123, %126 : vector<24x1xf32>
    %128 = math.rsqrt %127 : vector<24x1xf32>
    %129 = vector.broadcast %128 : vector<24x1xf32> to vector<24x32xf32>
    %130 = arith.mulf %125, %129 : vector<24x32xf32>
    %131 = vector.broadcast %111 : vector<1x32xf32> to vector<24x32xf32>
    %132 = arith.mulf %130, %131 : vector<24x32xf32>
    %133 = vector.broadcast %112 : vector<1x32xf32> to vector<24x32xf32>
    %134 = arith.addf %132, %133 : vector<24x32xf32>
    %135 = arith.truncf %134 : vector<24x32xf32> to vector<24x32xbf16>
    %c0_51 = arith.constant 0 : index
    %c0_52 = arith.constant 0 : index
    %136 = vector.load %arg11[%c0_51, %c0_52] : memref<32x128xbf16, #tpu.memory_space<vmem>>, vector<32x128xbf16>
    %cst_53 = arith.constant dense<0.000000e+00> : vector<24x128xf32>
    %137 = tpu.matmul %135, %136, %cst_53 {dimension_numbers = #tpu.dot_dimension_numbers<[1], [0], [0], [1], [0, 0, 1, 1], [], []>} : vector<24x32xbf16>, vector<32x128xbf16>, vector<24x128xf32> -> vector<24x128xf32>
    %c0_54 = arith.constant 0 : index
    %c0_55 = arith.constant 0 : index
    %138 = vector.load %arg12[%c0_54, %c0_55] : memref<1x128xf32, #tpu.memory_space<vmem>>, vector<1x128xf32>
    %139 = vector.broadcast %138 : vector<1x128xf32> to vector<24x128xf32>
    %140 = arith.addf %137, %139 : vector<24x128xf32>
    %141 = arith.mulf %140, %140 : vector<24x128xf32>
    %142 = arith.mulf %140, %141 : vector<24x128xf32>
    %cst_56 = arith.constant 4.471500e-02 : f32
    %143 = vector.broadcast %cst_56 : f32 to vector<24x128xf32>
    %144 = arith.mulf %143, %142 : vector<24x128xf32>
    %145 = arith.addf %140, %144 : vector<24x128xf32>
    %cst_57 = arith.constant 0.797884583 : f32
    %146 = vector.broadcast %cst_57 : f32 to vector<24x128xf32>
    %147 = arith.mulf %146, %145 : vector<24x128xf32>
    %148 = math.tanh %147 : vector<24x128xf32>
    %cst_58 = arith.constant 1.000000e+00 : f32
    %149 = vector.broadcast %cst_58 : f32 to vector<24x128xf32>
    %150 = arith.addf %149, %148 : vector<24x128xf32>
    %cst_59 = arith.constant 5.000000e-01 : f32
    %151 = vector.broadcast %cst_59 : f32 to vector<24x128xf32>
    %152 = arith.mulf %151, %150 : vector<24x128xf32>
    %153 = arith.mulf %140, %152 : vector<24x128xf32>
    %154 = arith.truncf %153 : vector<24x128xf32> to vector<24x128xbf16>
    %c0_60 = arith.constant 0 : index
    %c0_61 = arith.constant 0 : index
    %155 = vector.load %arg13[%c0_60, %c0_61] : memref<128x32xbf16, #tpu.memory_space<vmem>>, vector<128x32xbf16>
    %cst_62 = arith.constant dense<0.000000e+00> : vector<24x32xf32>
    %156 = tpu.matmul %154, %155, %cst_62 {dimension_numbers = #tpu.dot_dimension_numbers<[1], [0], [0], [1], [0, 0, 1, 1], [], []>} : vector<24x128xbf16>, vector<128x32xbf16>, vector<24x32xf32> -> vector<24x32xf32>
    %c0_63 = arith.constant 0 : index
    %c0_64 = arith.constant 0 : index
    %157 = vector.load %arg14[%c0_63, %c0_64] : memref<1x32xf32, #tpu.memory_space<vmem>>, vector<1x32xf32>
    %158 = vector.broadcast %157 : vector<1x32xf32> to vector<24x32xf32>
    %159 = arith.addf %156, %158 : vector<24x32xf32>
    %160 = arith.addf %159, %110 : vector<24x32xf32>
    %161 = arith.truncf %160 : vector<24x32xf32> to vector<24x32xbf16>
    %c0_65 = arith.constant 0 : index
    %c0_66 = arith.constant 0 : index
    %c0_67 = arith.constant 0 : index
    %162 = vector.load %arg15[%c0_65, %c0_66, %c0_67] : memref<1x24x32xbf16, #tpu.memory_space<vmem>>, vector<1x24x32xbf16>
    %163 = vector.shape_cast %162 : vector<1x24x32xbf16> to vector<24x32xbf16>
    %164 = vector.shape_cast %161 : vector<24x32xbf16> to vector<1x24x32xbf16>
    tpu.vector_store %arg15[%c0_65, %c0_66, %c0_67], %164 {strides = array<i32>} : memref<1x24x32xbf16, #tpu.memory_space<vmem>>, vector<1x24x32xbf16>,
    return
  }
  func.func @transform_0(%arg0: i32) -> (i32, i32, i32) {
    %c0_i32 = arith.constant 0 : i32
    %c0_i32_0 = arith.constant 0 : i32
    %c0_i32_1 = arith.constant 0 : i32
    return %arg0, %c0_i32, %c0_i32_0 : i32, i32, i32
  }
  func.func @transform_1(%arg0: i32) -> (i32, i32) {
    %c0_i32 = arith.constant 0 : i32
    %c0_i32_0 = arith.constant 0 : i32
    %c0_i32_1 = arith.constant 0 : i32
    return %c0_i32, %c0_i32_0 : i32, i32
  }
  func.func @transform_2(%arg0: i32) -> (i32, i32) {
    %c0_i32 = arith.constant 0 : i32
    %c0_i32_0 = arith.constant 0 : i32
    %c0_i32_1 = arith.constant 0 : i32
    return %c0_i32, %c0_i32_0 : i32, i32
  }
  func.func @transform_3(%arg0: i32) -> (i32, i32) {
    %c0_i32 = arith.constant 0 : i32
    %c0_i32_0 = arith.constant 0 : i32
    %c0_i32_1 = arith.constant 0 : i32
    return %c0_i32, %c0_i32_0 : i32, i32
  }
  func.func @transform_4(%arg0: i32) -> (i32, i32) {
    %c0_i32 = arith.constant 0 : i32
    %c0_i32_0 = arith.constant 0 : i32
    %c0_i32_1 = arith.constant 0 : i32
    return %c0_i32, %c0_i32_0 : i32, i32
  }
  func.func @transform_5(%arg0: i32) -> (i32, i32) {
    %c0_i32 = arith.constant 0 : i32
    %c0_i32_0 = arith.constant 0 : i32
    %c0_i32_1 = arith.constant 0 : i32
    return %c0_i32, %c0_i32_0 : i32, i32
  }
  func.func @transform_6(%arg0: i32) -> (i32, i32) {
    %c0_i32 = arith.constant 0 : i32
    %c0_i32_0 = arith.constant 0 : i32
    %c0_i32_1 = arith.constant 0 : i32
    return %c0_i32, %c0_i32_0 : i32, i32
  }
  func.func @transform_7(%arg0: i32) -> (i32, i32) {
    %c0_i32 = arith.constant 0 : i32
    %c0_i32_0 = arith.constant 0 : i32
    %c0_i32_1 = arith.constant 0 : i32
    return %c0_i32, %c0_i32_0 : i32, i32
  }
  func.func @transform_8(%arg0: i32) -> (i32, i32) {
    %c0_i32 = arith.constant 0 : i32
    %c0_i32_0 = arith.constant 0 : i32
    %c0_i32_1 = arith.constant 0 : i32
    return %c0_i32, %c0_i32_0 : i32, i32
  }
  func.func @transform_9(%arg0: i32) -> (i32, i32) {
    %c0_i32 = arith.constant 0 : i32
    %c0_i32_0 = arith.constant 0 : i32
    %c0_i32_1 = arith.constant 0 : i32
    return %c0_i32, %c0_i32_0 : i32, i32
  }
  func.func @transform_10(%arg0: i32) -> (i32, i32) {
    %c0_i32 = arith.constant 0 : i32
    %c0_i32_0 = arith.constant 0 : i32
    %c0_i32_1 = arith.constant 0 : i32
    return %c0_i32, %c0_i32_0 : i32, i32
  }
  func.func @transform_11(%arg0: i32) -> (i32, i32) {
    %c0_i32 = arith.constant 0 : i32
    %c0_i32_0 = arith.constant 0 : i32
    %c0_i32_1 = arith.constant 0 : i32
    return %c0_i32, %c0_i32_0 : i32, i32
  }
  func.func @transform_12(%arg0: i32) -> (i32, i32) {
    %c0_i32 = arith.constant 0 : i32
    %c0_i32_0 = arith.constant 0 : i32
    %c0_i32_1 = arith.constant 0 : i32
    return %c0_i32, %c0_i32_0 : i32, i32
  }
  func.func @transform_13(%arg0: i32) -> (i32, i32) {
    %c0_i32 = arith.constant 0 : i32
    %c0_i32_0 = arith.constant 0 : i32
    %c0_i32_1 = arith.constant 0 : i32
    return %c0_i32, %c0_i32_0 : i32, i32
  }
  func.func @transform_14(%arg0: i32) -> (i32, i32, i32) {
    %c0_i32 = arith.constant 0 : i32
    %c0_i32_0 = arith.constant 0 : i32
    %c0_i32_1 = arith.constant 0 : i32
    return %arg0, %c0_i32, %c0_i32_0 : i32, i32, i32
  }
}

module attributes {stable_mosaic.version = 11 : i64} {
  func.func @_layernorm_kernel(%arg0: i32, %arg1: memref<24x32xbf16, #tpu.memory_space<vmem>>, %arg2: memref<1x32xf32, #tpu.memory_space<vmem>>, %arg3: memref<1x32xf32, #tpu.memory_space<vmem>>, %arg4: memref<24x32xbf16, #tpu.memory_space<vmem>>) attributes {dimension_semantics = [#tpu.dimension_semantics<parallel>], iteration_bounds = array<i64: 2>, scalar_prefetch = 0 : i64, scratch_operands = 0 : i64, tpu.core_type = #tpu.core_type<tc>, window_params = [{transform_indices = @transform_0, window_bounds = array<i64: 24, 32>}, {pipeline_mode = #tpu.pipeline_mode<synchronous>, transform_indices = @transform_1, window_bounds = array<i64: 1, 32>}, {pipeline_mode = #tpu.pipeline_mode<synchronous>, transform_indices = @transform_2, window_bounds = array<i64: 1, 32>}, {transform_indices = @transform_3, window_bounds = array<i64: 24, 32>}]} {
    %c0 = arith.constant 0 : index
    %c0_0 = arith.constant 0 : index
    %0 = vector.load %arg1[%c0, %c0_0] : memref<24x32xbf16, #tpu.memory_space<vmem>>, vector<24x32xbf16>
    %1 = arith.extf %0 : vector<24x32xbf16> to vector<24x32xf32>
    %c0_1 = arith.constant 0 : index
    %c0_2 = arith.constant 0 : index
    %2 = vector.load %arg2[%c0_1, %c0_2] : memref<1x32xf32, #tpu.memory_space<vmem>>, vector<1x32xf32>
    %c0_3 = arith.constant 0 : index
    %c0_4 = arith.constant 0 : index
    %3 = vector.load %arg3[%c0_3, %c0_4] : memref<1x32xf32, #tpu.memory_space<vmem>>, vector<1x32xf32>
    %cst = arith.constant dense<0.000000e+00> : vector<24xf32>
    %4 = vector.multi_reduction <add>, %1, %cst [1] : vector<24x32xf32> to vector<24xf32>
    %5 = vector.shape_cast %4 : vector<24xf32> to vector<24x1xf32>
    %cst_5 = arith.constant 3.200000e+01 : f32
    %6 = vector.broadcast %cst_5 : f32 to vector<24x1xf32>
    %7 = arith.divf %5, %6 : vector<24x1xf32>
    %8 = vector.broadcast %7 : vector<24x1xf32> to vector<24x32xf32>
    %9 = arith.subf %1, %8 : vector<24x32xf32>
    %10 = arith.mulf %9, %9 : vector<24x32xf32>
    %cst_6 = arith.constant dense<0.000000e+00> : vector<24xf32>
    %11 = vector.multi_reduction <add>, %10, %cst_6 [1] : vector<24x32xf32> to vector<24xf32>
    %12 = vector.shape_cast %11 : vector<24xf32> to vector<24x1xf32>
    %cst_7 = arith.constant 3.200000e+01 : f32
    %13 = vector.broadcast %cst_7 : f32 to vector<24x1xf32>
    %14 = arith.divf %12, %13 : vector<24x1xf32>
    %15 = vector.broadcast %7 : vector<24x1xf32> to vector<24x32xf32>
    %16 = arith.subf %1, %15 : vector<24x32xf32>
    %cst_8 = arith.constant 9.99999974E-6 : f32
    %17 = vector.broadcast %cst_8 : f32 to vector<24x1xf32>
    %18 = arith.addf %14, %17 : vector<24x1xf32>
    %19 = math.rsqrt %18 : vector<24x1xf32>
    %20 = vector.broadcast %19 : vector<24x1xf32> to vector<24x32xf32>
    %21 = arith.mulf %16, %20 : vector<24x32xf32>
    %22 = vector.broadcast %2 : vector<1x32xf32> to vector<24x32xf32>
    %23 = arith.mulf %21, %22 : vector<24x32xf32>
    %24 = vector.broadcast %3 : vector<1x32xf32> to vector<24x32xf32>
    %25 = arith.addf %23, %24 : vector<24x32xf32>
    %26 = arith.truncf %25 : vector<24x32xf32> to vector<24x32xbf16>
    %c0_9 = arith.constant 0 : index
    %c0_10 = arith.constant 0 : index
    %27 = vector.load %arg4[%c0_9, %c0_10] : memref<24x32xbf16, #tpu.memory_space<vmem>>, vector<24x32xbf16>
    tpu.vector_store %arg4[%c0_9, %c0_10], %26 {strides = array<i32>} : memref<24x32xbf16, #tpu.memory_space<vmem>>, vector<24x32xbf16>,
    return
  }
  func.func @transform_0(%arg0: i32) -> (i32, i32) {
    %c0_i32 = arith.constant 0 : i32
    %c0_i32_0 = arith.constant 0 : i32
    return %arg0, %c0_i32 : i32, i32
  }
  func.func @transform_1(%arg0: i32) -> (i32, i32) {
    %c0_i32 = arith.constant 0 : i32
    %c0_i32_0 = arith.constant 0 : i32
    %c0_i32_1 = arith.constant 0 : i32
    return %c0_i32, %c0_i32_0 : i32, i32
  }
  func.func @transform_2(%arg0: i32) -> (i32, i32) {
    %c0_i32 = arith.constant 0 : i32
    %c0_i32_0 = arith.constant 0 : i32
    %c0_i32_1 = arith.constant 0 : i32
    return %c0_i32, %c0_i32_0 : i32, i32
  }
  func.func @transform_3(%arg0: i32) -> (i32, i32) {
    %c0_i32 = arith.constant 0 : i32
    %c0_i32_0 = arith.constant 0 : i32
    return %arg0, %c0_i32 : i32, i32
  }
}

module attributes {stable_mosaic.version = 11 : i64} {
  func.func @_block_kernel(%arg0: i32, %arg1: memref<1x24x32xbf16, #tpu.memory_space<vmem>>, %arg2: memref<1x32xf32, #tpu.memory_space<vmem>>, %arg3: memref<1x32xf32, #tpu.memory_space<vmem>>, %arg4: memref<32x96xbf16, #tpu.memory_space<vmem>>, %arg5: memref<1x96xf32, #tpu.memory_space<vmem>>, %arg6: memref<32x32xbf16, #tpu.memory_space<vmem>>, %arg7: memref<1x32xf32, #tpu.memory_space<vmem>>, %arg8: memref<1x32xf32, #tpu.memory_space<vmem>>, %arg9: memref<1x32xf32, #tpu.memory_space<vmem>>, %arg10: memref<32x128xbf16, #tpu.memory_space<vmem>>, %arg11: memref<1x128xf32, #tpu.memory_space<vmem>>, %arg12: memref<128x32xbf16, #tpu.memory_space<vmem>>, %arg13: memref<1x32xf32, #tpu.memory_space<vmem>>, %arg14: memref<1x24x32xbf16, #tpu.memory_space<vmem>>) attributes {dimension_semantics = [#tpu.dimension_semantics<parallel>], iteration_bounds = array<i64: 2>, scalar_prefetch = 0 : i64, scratch_operands = 0 : i64, tpu.core_type = #tpu.core_type<tc>, window_params = [{transform_indices = @transform_0, window_bounds = array<i64: 1, 24, 32>}, {pipeline_mode = #tpu.pipeline_mode<synchronous>, transform_indices = @transform_1, window_bounds = array<i64: 1, 32>}, {pipeline_mode = #tpu.pipeline_mode<synchronous>, transform_indices = @transform_2, window_bounds = array<i64: 1, 32>}, {pipeline_mode = #tpu.pipeline_mode<synchronous>, transform_indices = @transform_3, window_bounds = array<i64: 32, 96>}, {pipeline_mode = #tpu.pipeline_mode<synchronous>, transform_indices = @transform_4, window_bounds = array<i64: 1, 96>}, {pipeline_mode = #tpu.pipeline_mode<synchronous>, transform_indices = @transform_5, window_bounds = array<i64: 32, 32>}, {pipeline_mode = #tpu.pipeline_mode<synchronous>, transform_indices = @transform_6, window_bounds = array<i64: 1, 32>}, {pipeline_mode = #tpu.pipeline_mode<synchronous>, transform_indices = @transform_7, window_bounds = array<i64: 1, 32>}, {pipeline_mode = #tpu.pipeline_mode<synchronous>, transform_indices = @transform_8, window_bounds = array<i64: 1, 32>}, {pipeline_mode = #tpu.pipeline_mode<synchronous>, transform_indices = @transform_9, window_bounds = array<i64: 32, 128>}, {pipeline_mode = #tpu.pipeline_mode<synchronous>, transform_indices = @transform_10, window_bounds = array<i64: 1, 128>}, {pipeline_mode = #tpu.pipeline_mode<synchronous>, transform_indices = @transform_11, window_bounds = array<i64: 128, 32>}, {pipeline_mode = #tpu.pipeline_mode<synchronous>, transform_indices = @transform_12, window_bounds = array<i64: 1, 32>}, {transform_indices = @transform_13, window_bounds = array<i64: 1, 24, 32>}]} {
    %c0 = arith.constant 0 : index
    %c0_0 = arith.constant 0 : index
    %c0_1 = arith.constant 0 : index
    %0 = vector.load %arg1[%c0, %c0_0, %c0_1] : memref<1x24x32xbf16, #tpu.memory_space<vmem>>, vector<1x24x32xbf16>
    %1 = vector.shape_cast %0 : vector<1x24x32xbf16> to vector<24x32xbf16>
    %2 = arith.extf %1 : vector<24x32xbf16> to vector<24x32xf32>
    %c0_2 = arith.constant 0 : index
    %c0_3 = arith.constant 0 : index
    %3 = vector.load %arg2[%c0_2, %c0_3] : memref<1x32xf32, #tpu.memory_space<vmem>>, vector<1x32xf32>
    %c0_4 = arith.constant 0 : index
    %c0_5 = arith.constant 0 : index
    %4 = vector.load %arg3[%c0_4, %c0_5] : memref<1x32xf32, #tpu.memory_space<vmem>>, vector<1x32xf32>
    %cst = arith.constant dense<0.000000e+00> : vector<24xf32>
    %5 = vector.multi_reduction <add>, %2, %cst [1] : vector<24x32xf32> to vector<24xf32>
    %6 = vector.shape_cast %5 : vector<24xf32> to vector<24x1xf32>
    %cst_6 = arith.constant 3.200000e+01 : f32
    %7 = vector.broadcast %cst_6 : f32 to vector<24x1xf32>
    %8 = arith.divf %6, %7 : vector<24x1xf32>
    %9 = vector.broadcast %8 : vector<24x1xf32> to vector<24x32xf32>
    %10 = arith.subf %2, %9 : vector<24x32xf32>
    %11 = arith.mulf %10, %10 : vector<24x32xf32>
    %cst_7 = arith.constant dense<0.000000e+00> : vector<24xf32>
    %12 = vector.multi_reduction <add>, %11, %cst_7 [1] : vector<24x32xf32> to vector<24xf32>
    %13 = vector.shape_cast %12 : vector<24xf32> to vector<24x1xf32>
    %cst_8 = arith.constant 3.200000e+01 : f32
    %14 = vector.broadcast %cst_8 : f32 to vector<24x1xf32>
    %15 = arith.divf %13, %14 : vector<24x1xf32>
    %16 = vector.broadcast %8 : vector<24x1xf32> to vector<24x32xf32>
    %17 = arith.subf %2, %16 : vector<24x32xf32>
    %cst_9 = arith.constant 9.99999974E-6 : f32
    %18 = vector.broadcast %cst_9 : f32 to vector<24x1xf32>
    %19 = arith.addf %15, %18 : vector<24x1xf32>
    %20 = math.rsqrt %19 : vector<24x1xf32>
    %21 = vector.broadcast %20 : vector<24x1xf32> to vector<24x32xf32>
    %22 = arith.mulf %17, %21 : vector<24x32xf32>
    %23 = vector.broadcast %3 : vector<1x32xf32> to vector<24x32xf32>
    %24 = arith.mulf %22, %23 : vector<24x32xf32>
    %25 = vector.broadcast %4 : vector<1x32xf32> to vector<24x32xf32>
    %26 = arith.addf %24, %25 : vector<24x32xf32>
    %27 = arith.truncf %26 : vector<24x32xf32> to vector<24x32xbf16>
    %c0_10 = arith.constant 0 : index
    %c0_11 = arith.constant 0 : index
    %28 = vector.load %arg4[%c0_10, %c0_11] : memref<32x96xbf16, #tpu.memory_space<vmem>>, vector<32x96xbf16>
    %cst_12 = arith.constant dense<0.000000e+00> : vector<24x96xf32>
    %29 = tpu.matmul %27, %28, %cst_12 {dimension_numbers = #tpu.dot_dimension_numbers<[1], [0], [0], [1], [0, 0, 1, 1], [], []>} : vector<24x32xbf16>, vector<32x96xbf16>, vector<24x96xf32> -> vector<24x96xf32>
    %c0_13 = arith.constant 0 : index
    %c0_14 = arith.constant 0 : index
    %30 = vector.load %arg5[%c0_13, %c0_14] : memref<1x96xf32, #tpu.memory_space<vmem>>, vector<1x96xf32>
    %31 = vector.broadcast %30 : vector<1x96xf32> to vector<24x96xf32>
    %32 = arith.addf %29, %31 : vector<24x96xf32>
    %33 = vector.extract_strided_slice %32 {offsets = [0, 0], sizes = [24, 8], strides = [1, 1]} : vector<24x96xf32> to vector<24x8xf32>
    %34 = vector.extract_strided_slice %32 {offsets = [0, 32], sizes = [24, 8], strides = [1, 1]} : vector<24x96xf32> to vector<24x8xf32>
    %35 = vector.extract_strided_slice %32 {offsets = [0, 64], sizes = [24, 8], strides = [1, 1]} : vector<24x96xf32> to vector<24x8xf32>
    %cst_15 = arith.constant dense<0.000000e+00> : vector<24x24xf32>
    %36 = tpu.matmul %33, %34, %cst_15 {dimension_numbers = #tpu.dot_dimension_numbers<[1], [1], [0], [0], [0, 0, 1, 0], [], []>} : vector<24x8xf32>, vector<24x8xf32>, vector<24x24xf32> -> vector<24x24xf32>
    %cst_16 = arith.constant 0.353553385 : f32
    %37 = vector.broadcast %cst_16 : f32 to vector<24x24xf32>
    %38 = arith.mulf %36, %37 : vector<24x24xf32>
    %cst_17 = arith.constant dense<0xFF800000> : vector<24xf32>
    %39 = vector.multi_reduction <maximumf>, %38, %cst_17 [1] : vector<24x24xf32> to vector<24xf32>
    %40 = vector.shape_cast %39 : vector<24xf32> to vector<24x1xf32>
    %41 = vector.broadcast %40 : vector<24x1xf32> to vector<24x24xf32>
    %42 = arith.subf %38, %41 : vector<24x24xf32>
    %43 = math.exp %42 : vector<24x24xf32>
    %cst_18 = arith.constant dense<0.000000e+00> : vector<24xf32>
    %44 = vector.multi_reduction <add>, %43, %cst_18 [1] : vector<24x24xf32> to vector<24xf32>
    %45 = vector.shape_cast %44 : vector<24xf32> to vector<24x1xf32>
    %46 = tpu.reciprocal %45 {approx = true} : vector<24x1xf32> -> vector<24x1xf32>
    %47 = vector.broadcast %46 : vector<24x1xf32> to vector<24x24xf32>
    %48 = arith.mulf %43, %47 : vector<24x24xf32>
    %cst_19 = arith.constant dense<0.000000e+00> : vector<24x8xf32>
    %49 = tpu.matmul %48, %35, %cst_19 {dimension_numbers = #tpu.dot_dimension_numbers<[1], [0], [0], [1], [0, 0, 1, 1], [], []>} : vector<24x24xf32>, vector<24x8xf32>, vector<24x8xf32> -> vector<24x8xf32>
    %50 = vector.extract_strided_slice %32 {offsets = [0, 8], sizes = [24, 8], strides = [1, 1]} : vector<24x96xf32> to vector<24x8xf32>
    %51 = vector.extract_strided_slice %32 {offsets = [0, 40], sizes = [24, 8], strides = [1, 1]} : vector<24x96xf32> to vector<24x8xf32>
    %52 = vector.extract_strided_slice %32 {offsets = [0, 72], sizes = [24, 8], strides = [1, 1]} : vector<24x96xf32> to vector<24x8xf32>
    %cst_20 = arith.constant dense<0.000000e+00> : vector<24x24xf32>
    %53 = tpu.matmul %50, %51, %cst_20 {dimension_numbers = #tpu.dot_dimension_numbers<[1], [1], [0], [0], [0, 0, 1, 0], [], []>} : vector<24x8xf32>, vector<24x8xf32>, vector<24x24xf32> -> vector<24x24xf32>
    %cst_21 = arith.constant 0.353553385 : f32
    %54 = vector.broadcast %cst_21 : f32 to vector<24x24xf32>
    %55 = arith.mulf %53, %54 : vector<24x24xf32>
    %cst_22 = arith.constant dense<0xFF800000> : vector<24xf32>
    %56 = vector.multi_reduction <maximumf>, %55, %cst_22 [1] : vector<24x24xf32> to vector<24xf32>
    %57 = vector.shape_cast %56 : vector<24xf32> to vector<24x1xf32>
    %58 = vector.broadcast %57 : vector<24x1xf32> to vector<24x24xf32>
    %59 = arith.subf %55, %58 : vector<24x24xf32>
    %60 = math.exp %59 : vector<24x24xf32>
    %cst_23 = arith.constant dense<0.000000e+00> : vector<24xf32>
    %61 = vector.multi_reduction <add>, %60, %cst_23 [1] : vector<24x24xf32> to vector<24xf32>
    %62 = vector.shape_cast %61 : vector<24xf32> to vector<24x1xf32>
    %63 = tpu.reciprocal %62 {approx = true} : vector<24x1xf32> -> vector<24x1xf32>
    %64 = vector.broadcast %63 : vector<24x1xf32> to vector<24x24xf32>
    %65 = arith.mulf %60, %64 : vector<24x24xf32>
    %cst_24 = arith.constant dense<0.000000e+00> : vector<24x8xf32>
    %66 = tpu.matmul %65, %52, %cst_24 {dimension_numbers = #tpu.dot_dimension_numbers<[1], [0], [0], [1], [0, 0, 1, 1], [], []>} : vector<24x24xf32>, vector<24x8xf32>, vector<24x8xf32> -> vector<24x8xf32>
    %67 = vector.extract_strided_slice %32 {offsets = [0, 16], sizes = [24, 8], strides = [1, 1]} : vector<24x96xf32> to vector<24x8xf32>
    %68 = vector.extract_strided_slice %32 {offsets = [0, 48], sizes = [24, 8], strides = [1, 1]} : vector<24x96xf32> to vector<24x8xf32>
    %69 = vector.extract_strided_slice %32 {offsets = [0, 80], sizes = [24, 8], strides = [1, 1]} : vector<24x96xf32> to vector<24x8xf32>
    %cst_25 = arith.constant dense<0.000000e+00> : vector<24x24xf32>
    %70 = tpu.matmul %67, %68, %cst_25 {dimension_numbers = #tpu.dot_dimension_numbers<[1], [1], [0], [0], [0, 0, 1, 0], [], []>} : vector<24x8xf32>, vector<24x8xf32>, vector<24x24xf32> -> vector<24x24xf32>
    %cst_26 = arith.constant 0.353553385 : f32
    %71 = vector.broadcast %cst_26 : f32 to vector<24x24xf32>
    %72 = arith.mulf %70, %71 : vector<24x24xf32>
    %cst_27 = arith.constant dense<0xFF800000> : vector<24xf32>
    %73 = vector.multi_reduction <maximumf>, %72, %cst_27 [1] : vector<24x24xf32> to vector<24xf32>
    %74 = vector.shape_cast %73 : vector<24xf32> to vector<24x1xf32>
    %75 = vector.broadcast %74 : vector<24x1xf32> to vector<24x24xf32>
    %76 = arith.subf %72, %75 : vector<24x24xf32>
    %77 = math.exp %76 : vector<24x24xf32>
    %cst_28 = arith.constant dense<0.000000e+00> : vector<24xf32>
    %78 = vector.multi_reduction <add>, %77, %cst_28 [1] : vector<24x24xf32> to vector<24xf32>
    %79 = vector.shape_cast %78 : vector<24xf32> to vector<24x1xf32>
    %80 = tpu.reciprocal %79 {approx = true} : vector<24x1xf32> -> vector<24x1xf32>
    %81 = vector.broadcast %80 : vector<24x1xf32> to vector<24x24xf32>
    %82 = arith.mulf %77, %81 : vector<24x24xf32>
    %cst_29 = arith.constant dense<0.000000e+00> : vector<24x8xf32>
    %83 = tpu.matmul %82, %69, %cst_29 {dimension_numbers = #tpu.dot_dimension_numbers<[1], [0], [0], [1], [0, 0, 1, 1], [], []>} : vector<24x24xf32>, vector<24x8xf32>, vector<24x8xf32> -> vector<24x8xf32>
    %84 = vector.extract_strided_slice %32 {offsets = [0, 24], sizes = [24, 8], strides = [1, 1]} : vector<24x96xf32> to vector<24x8xf32>
    %85 = vector.extract_strided_slice %32 {offsets = [0, 56], sizes = [24, 8], strides = [1, 1]} : vector<24x96xf32> to vector<24x8xf32>
    %86 = vector.extract_strided_slice %32 {offsets = [0, 88], sizes = [24, 8], strides = [1, 1]} : vector<24x96xf32> to vector<24x8xf32>
    %cst_30 = arith.constant dense<0.000000e+00> : vector<24x24xf32>
    %87 = tpu.matmul %84, %85, %cst_30 {dimension_numbers = #tpu.dot_dimension_numbers<[1], [1], [0], [0], [0, 0, 1, 0], [], []>} : vector<24x8xf32>, vector<24x8xf32>, vector<24x24xf32> -> vector<24x24xf32>
    %cst_31 = arith.constant 0.353553385 : f32
    %88 = vector.broadcast %cst_31 : f32 to vector<24x24xf32>
    %89 = arith.mulf %87, %88 : vector<24x24xf32>
    %cst_32 = arith.constant dense<0xFF800000> : vector<24xf32>
    %90 = vector.multi_reduction <maximumf>, %89, %cst_32 [1] : vector<24x24xf32> to vector<24xf32>
    %91 = vector.shape_cast %90 : vector<24xf32> to vector<24x1xf32>
    %92 = vector.broadcast %91 : vector<24x1xf32> to vector<24x24xf32>
    %93 = arith.subf %89, %92 : vector<24x24xf32>
    %94 = math.exp %93 : vector<24x24xf32>
    %cst_33 = arith.constant dense<0.000000e+00> : vector<24xf32>
    %95 = vector.multi_reduction <add>, %94, %cst_33 [1] : vector<24x24xf32> to vector<24xf32>
    %96 = vector.shape_cast %95 : vector<24xf32> to vector<24x1xf32>
    %97 = tpu.reciprocal %96 {approx = true} : vector<24x1xf32> -> vector<24x1xf32>
    %98 = vector.broadcast %97 : vector<24x1xf32> to vector<24x24xf32>
    %99 = arith.mulf %94, %98 : vector<24x24xf32>
    %cst_34 = arith.constant dense<0.000000e+00> : vector<24x8xf32>
    %100 = tpu.matmul %99, %86, %cst_34 {dimension_numbers = #tpu.dot_dimension_numbers<[1], [0], [0], [1], [0, 0, 1, 1], [], []>} : vector<24x24xf32>, vector<24x8xf32>, vector<24x8xf32> -> vector<24x8xf32>
    %101 = tpu.concatenate %49, %66, %83, %100 in 1 : vector<24x8xf32>, vector<24x8xf32>, vector<24x8xf32>, vector<24x8xf32> -> vector<24x32xf32>
    %102 = arith.truncf %101 : vector<24x32xf32> to vector<24x32xbf16>
    %c0_35 = arith.constant 0 : index
    %c0_36 = arith.constant 0 : index
    %103 = vector.load %arg6[%c0_35, %c0_36] : memref<32x32xbf16, #tpu.memory_space<vmem>>, vector<32x32xbf16>
    %cst_37 = arith.constant dense<0.000000e+00> : vector<24x32xf32>
    %104 = tpu.matmul %102, %103, %cst_37 {dimension_numbers = #tpu.dot_dimension_numbers<[1], [0], [0], [1], [0, 0, 1, 1], [], []>} : vector<24x32xbf16>, vector<32x32xbf16>, vector<24x32xf32> -> vector<24x32xf32>
    %c0_38 = arith.constant 0 : index
    %c0_39 = arith.constant 0 : index
    %105 = vector.load %arg7[%c0_38, %c0_39] : memref<1x32xf32, #tpu.memory_space<vmem>>, vector<1x32xf32>
    %106 = vector.broadcast %105 : vector<1x32xf32> to vector<24x32xf32>
    %107 = arith.addf %104, %106 : vector<24x32xf32>
    %108 = arith.addf %107, %2 : vector<24x32xf32>
    %c0_40 = arith.constant 0 : index
    %c0_41 = arith.constant 0 : index
    %109 = vector.load %arg8[%c0_40, %c0_41] : memref<1x32xf32, #tpu.memory_space<vmem>>, vector<1x32xf32>
    %c0_42 = arith.constant 0 : index
    %c0_43 = arith.constant 0 : index
    %110 = vector.load %arg9[%c0_42, %c0_43] : memref<1x32xf32, #tpu.memory_space<vmem>>, vector<1x32xf32>
    %cst_44 = arith.constant dense<0.000000e+00> : vector<24xf32>
    %111 = vector.multi_reduction <add>, %108, %cst_44 [1] : vector<24x32xf32> to vector<24xf32>
    %112 = vector.shape_cast %111 : vector<24xf32> to vector<24x1xf32>
    %cst_45 = arith.constant 3.200000e+01 : f32
    %113 = vector.broadcast %cst_45 : f32 to vector<24x1xf32>
    %114 = arith.divf %112, %113 : vector<24x1xf32>
    %115 = vector.broadcast %114 : vector<24x1xf32> to vector<24x32xf32>
    %116 = arith.subf %108, %115 : vector<24x32xf32>
    %117 = arith.mulf %116, %116 : vector<24x32xf32>
    %cst_46 = arith.constant dense<0.000000e+00> : vector<24xf32>
    %118 = vector.multi_reduction <add>, %117, %cst_46 [1] : vector<24x32xf32> to vector<24xf32>
    %119 = vector.shape_cast %118 : vector<24xf32> to vector<24x1xf32>
    %cst_47 = arith.constant 3.200000e+01 : f32
    %120 = vector.broadcast %cst_47 : f32 to vector<24x1xf32>
    %121 = arith.divf %119, %120 : vector<24x1xf32>
    %122 = vector.broadcast %114 : vector<24x1xf32> to vector<24x32xf32>
    %123 = arith.subf %108, %122 : vector<24x32xf32>
    %cst_48 = arith.constant 9.99999974E-6 : f32
    %124 = vector.broadcast %cst_48 : f32 to vector<24x1xf32>
    %125 = arith.addf %121, %124 : vector<24x1xf32>
    %126 = math.rsqrt %125 : vector<24x1xf32>
    %127 = vector.broadcast %126 : vector<24x1xf32> to vector<24x32xf32>
    %128 = arith.mulf %123, %127 : vector<24x32xf32>
    %129 = vector.broadcast %109 : vector<1x32xf32> to vector<24x32xf32>
    %130 = arith.mulf %128, %129 : vector<24x32xf32>
    %131 = vector.broadcast %110 : vector<1x32xf32> to vector<24x32xf32>
    %132 = arith.addf %130, %131 : vector<24x32xf32>
    %133 = arith.truncf %132 : vector<24x32xf32> to vector<24x32xbf16>
    %c0_49 = arith.constant 0 : index
    %c0_50 = arith.constant 0 : index
    %134 = vector.load %arg10[%c0_49, %c0_50] : memref<32x128xbf16, #tpu.memory_space<vmem>>, vector<32x128xbf16>
    %cst_51 = arith.constant dense<0.000000e+00> : vector<24x128xf32>
    %135 = tpu.matmul %133, %134, %cst_51 {dimension_numbers = #tpu.dot_dimension_numbers<[1], [0], [0], [1], [0, 0, 1, 1], [], []>} : vector<24x32xbf16>, vector<32x128xbf16>, vector<24x128xf32> -> vector<24x128xf32>
    %c0_52 = arith.constant 0 : index
    %c0_53 = arith.constant 0 : index
    %136 = vector.load %arg11[%c0_52, %c0_53] : memref<1x128xf32, #tpu.memory_space<vmem>>, vector<1x128xf32>
    %137 = vector.broadcast %136 : vector<1x128xf32> to vector<24x128xf32>
    %138 = arith.addf %135, %137 : vector<24x128xf32>
    %139 = arith.mulf %138, %138 : vector<24x128xf32>
    %140 = arith.mulf %138, %139 : vector<24x128xf32>
    %cst_54 = arith.constant 4.471500e-02 : f32
    %141 = vector.broadcast %cst_54 : f32 to vector<24x128xf32>
    %142 = arith.mulf %141, %140 : vector<24x128xf32>
    %143 = arith.addf %138, %142 : vector<24x128xf32>
    %cst_55 = arith.constant 0.797884583 : f32
    %144 = vector.broadcast %cst_55 : f32 to vector<24x128xf32>
    %145 = arith.mulf %144, %143 : vector<24x128xf32>
    %146 = math.tanh %145 : vector<24x128xf32>
    %cst_56 = arith.constant 1.000000e+00 : f32
    %147 = vector.broadcast %cst_56 : f32 to vector<24x128xf32>
    %148 = arith.addf %147, %146 : vector<24x128xf32>
    %cst_57 = arith.constant 5.000000e-01 : f32
    %149 = vector.broadcast %cst_57 : f32 to vector<24x128xf32>
    %150 = arith.mulf %149, %148 : vector<24x128xf32>
    %151 = arith.mulf %138, %150 : vector<24x128xf32>
    %152 = arith.truncf %151 : vector<24x128xf32> to vector<24x128xbf16>
    %c0_58 = arith.constant 0 : index
    %c0_59 = arith.constant 0 : index
    %153 = vector.load %arg12[%c0_58, %c0_59] : memref<128x32xbf16, #tpu.memory_space<vmem>>, vector<128x32xbf16>
    %cst_60 = arith.constant dense<0.000000e+00> : vector<24x32xf32>
    %154 = tpu.matmul %152, %153, %cst_60 {dimension_numbers = #tpu.dot_dimension_numbers<[1], [0], [0], [1], [0, 0, 1, 1], [], []>} : vector<24x128xbf16>, vector<128x32xbf16>, vector<24x32xf32> -> vector<24x32xf32>
    %c0_61 = arith.constant 0 : index
    %c0_62 = arith.constant 0 : index
    %155 = vector.load %arg13[%c0_61, %c0_62] : memref<1x32xf32, #tpu.memory_space<vmem>>, vector<1x32xf32>
    %156 = vector.broadcast %155 : vector<1x32xf32> to vector<24x32xf32>
    %157 = arith.addf %154, %156 : vector<24x32xf32>
    %158 = arith.addf %157, %108 : vector<24x32xf32>
    %159 = arith.truncf %158 : vector<24x32xf32> to vector<24x32xbf16>
    %c0_63 = arith.constant 0 : index
    %c0_64 = arith.constant 0 : index
    %c0_65 = arith.constant 0 : index
    %160 = vector.load %arg14[%c0_63, %c0_64, %c0_65] : memref<1x24x32xbf16, #tpu.memory_space<vmem>>, vector<1x24x32xbf16>
    %161 = vector.shape_cast %160 : vector<1x24x32xbf16> to vector<24x32xbf16>
    %162 = vector.shape_cast %159 : vector<24x32xbf16> to vector<1x24x32xbf16>
    tpu.vector_store %arg14[%c0_63, %c0_64, %c0_65], %162 {strides = array<i32>} : memref<1x24x32xbf16, #tpu.memory_space<vmem>>, vector<1x24x32xbf16>,
    return
  }
  func.func @transform_0(%arg0: i32) -> (i32, i32, i32) {
    %c0_i32 = arith.constant 0 : i32
    %c0_i32_0 = arith.constant 0 : i32
    %c0_i32_1 = arith.constant 0 : i32
    return %arg0, %c0_i32, %c0_i32_0 : i32, i32, i32
  }
  func.func @transform_1(%arg0: i32) -> (i32, i32) {
    %c0_i32 = arith.constant 0 : i32
    %c0_i32_0 = arith.constant 0 : i32
    %c0_i32_1 = arith.constant 0 : i32
    return %c0_i32, %c0_i32_0 : i32, i32
  }
  func.func @transform_2(%arg0: i32) -> (i32, i32) {
    %c0_i32 = arith.constant 0 : i32
    %c0_i32_0 = arith.constant 0 : i32
    %c0_i32_1 = arith.constant 0 : i32
    return %c0_i32, %c0_i32_0 : i32, i32
  }
  func.func @transform_3(%arg0: i32) -> (i32, i32) {
    %c0_i32 = arith.constant 0 : i32
    %c0_i32_0 = arith.constant 0 : i32
    %c0_i32_1 = arith.constant 0 : i32
    return %c0_i32, %c0_i32_0 : i32, i32
  }
  func.func @transform_4(%arg0: i32) -> (i32, i32) {
    %c0_i32 = arith.constant 0 : i32
    %c0_i32_0 = arith.constant 0 : i32
    %c0_i32_1 = arith.constant 0 : i32
    return %c0_i32, %c0_i32_0 : i32, i32
  }
  func.func @transform_5(%arg0: i32) -> (i32, i32) {
    %c0_i32 = arith.constant 0 : i32
    %c0_i32_0 = arith.constant 0 : i32
    %c0_i32_1 = arith.constant 0 : i32
    return %c0_i32, %c0_i32_0 : i32, i32
  }
  func.func @transform_6(%arg0: i32) -> (i32, i32) {
    %c0_i32 = arith.constant 0 : i32
    %c0_i32_0 = arith.constant 0 : i32
    %c0_i32_1 = arith.constant 0 : i32
    return %c0_i32, %c0_i32_0 : i32, i32
  }
  func.func @transform_7(%arg0: i32) -> (i32, i32) {
    %c0_i32 = arith.constant 0 : i32
    %c0_i32_0 = arith.constant 0 : i32
    %c0_i32_1 = arith.constant 0 : i32
    return %c0_i32, %c0_i32_0 : i32, i32
  }
  func.func @transform_8(%arg0: i32) -> (i32, i32) {
    %c0_i32 = arith.constant 0 : i32
    %c0_i32_0 = arith.constant 0 : i32
    %c0_i32_1 = arith.constant 0 : i32
    return %c0_i32, %c0_i32_0 : i32, i32
  }
  func.func @transform_9(%arg0: i32) -> (i32, i32) {
    %c0_i32 = arith.constant 0 : i32
    %c0_i32_0 = arith.constant 0 : i32
    %c0_i32_1 = arith.constant 0 : i32
    return %c0_i32, %c0_i32_0 : i32, i32
  }
  func.func @transform_10(%arg0: i32) -> (i32, i32) {
    %c0_i32 = arith.constant 0 : i32
    %c0_i32_0 = arith.constant 0 : i32
    %c0_i32_1 = arith.constant 0 : i32
    return %c0_i32, %c0_i32_0 : i32, i32
  }
  func.func @transform_11(%arg0: i32) -> (i32, i32) {
    %c0_i32 = arith.constant 0 : i32
    %c0_i32_0 = arith.constant 0 : i32
    %c0_i32_1 = arith.constant 0 : i32
    return %c0_i32, %c0_i32_0 : i32, i32
  }
  func.func @transform_12(%arg0: i32) -> (i32, i32) {
    %c0_i32 = arith.constant 0 : i32
    %c0_i32_0 = arith.constant 0 : i32
    %c0_i32_1 = arith.constant 0 : i32
    return %c0_i32, %c0_i32_0 : i32, i32
  }
  func.func @transform_13(%arg0: i32) -> (i32, i32, i32) {
    %c0_i32 = arith.constant 0 : i32
    %c0_i32_0 = arith.constant 0 : i32
    %c0_i32_1 = arith.constant 0 : i32
    return %arg0, %c0_i32, %c0_i32_0 : i32, i32, i32
  }
}

module attributes {stable_mosaic.version = 11 : i64} {
  func.func @_ln_linear_kernel(%arg0: i32, %arg1: memref<24x32xbf16, #tpu.memory_space<vmem>>, %arg2: memref<1x32xf32, #tpu.memory_space<vmem>>, %arg3: memref<1x32xf32, #tpu.memory_space<vmem>>, %arg4: memref<32x128xbf16, #tpu.memory_space<vmem>>, %arg5: memref<1x128xf32, #tpu.memory_space<vmem>>, %arg6: memref<24x128xbf16, #tpu.memory_space<vmem>>) attributes {dimension_semantics = [#tpu.dimension_semantics<parallel>], iteration_bounds = array<i64: 2>, scalar_prefetch = 0 : i64, scratch_operands = 0 : i64, tpu.core_type = #tpu.core_type<tc>, window_params = [{transform_indices = @transform_0, window_bounds = array<i64: 24, 32>}, {pipeline_mode = #tpu.pipeline_mode<synchronous>, transform_indices = @transform_1, window_bounds = array<i64: 1, 32>}, {pipeline_mode = #tpu.pipeline_mode<synchronous>, transform_indices = @transform_2, window_bounds = array<i64: 1, 32>}, {pipeline_mode = #tpu.pipeline_mode<synchronous>, transform_indices = @transform_3, window_bounds = array<i64: 32, 128>}, {pipeline_mode = #tpu.pipeline_mode<synchronous>, transform_indices = @transform_4, window_bounds = array<i64: 1, 128>}, {transform_indices = @transform_5, window_bounds = array<i64: 24, 128>}]} {
    %c0 = arith.constant 0 : index
    %c0_0 = arith.constant 0 : index
    %0 = vector.load %arg1[%c0, %c0_0] : memref<24x32xbf16, #tpu.memory_space<vmem>>, vector<24x32xbf16>
    %1 = arith.extf %0 : vector<24x32xbf16> to vector<24x32xf32>
    %c0_1 = arith.constant 0 : index
    %c0_2 = arith.constant 0 : index
    %2 = vector.load %arg2[%c0_1, %c0_2] : memref<1x32xf32, #tpu.memory_space<vmem>>, vector<1x32xf32>
    %c0_3 = arith.constant 0 : index
    %c0_4 = arith.constant 0 : index
    %3 = vector.load %arg3[%c0_3, %c0_4] : memref<1x32xf32, #tpu.memory_space<vmem>>, vector<1x32xf32>
    %cst = arith.constant dense<0.000000e+00> : vector<24xf32>
    %4 = vector.multi_reduction <add>, %1, %cst [1] : vector<24x32xf32> to vector<24xf32>
    %5 = vector.shape_cast %4 : vector<24xf32> to vector<24x1xf32>
    %cst_5 = arith.constant 3.200000e+01 : f32
    %6 = vector.broadcast %cst_5 : f32 to vector<24x1xf32>
    %7 = arith.divf %5, %6 : vector<24x1xf32>
    %8 = vector.broadcast %7 : vector<24x1xf32> to vector<24x32xf32>
    %9 = arith.subf %1, %8 : vector<24x32xf32>
    %10 = arith.mulf %9, %9 : vector<24x32xf32>
    %cst_6 = arith.constant dense<0.000000e+00> : vector<24xf32>
    %11 = vector.multi_reduction <add>, %10, %cst_6 [1] : vector<24x32xf32> to vector<24xf32>
    %12 = vector.shape_cast %11 : vector<24xf32> to vector<24x1xf32>
    %cst_7 = arith.constant 3.200000e+01 : f32
    %13 = vector.broadcast %cst_7 : f32 to vector<24x1xf32>
    %14 = arith.divf %12, %13 : vector<24x1xf32>
    %15 = vector.broadcast %7 : vector<24x1xf32> to vector<24x32xf32>
    %16 = arith.subf %1, %15 : vector<24x32xf32>
    %cst_8 = arith.constant 9.99999974E-6 : f32
    %17 = vector.broadcast %cst_8 : f32 to vector<24x1xf32>
    %18 = arith.addf %14, %17 : vector<24x1xf32>
    %19 = math.rsqrt %18 : vector<24x1xf32>
    %20 = vector.broadcast %19 : vector<24x1xf32> to vector<24x32xf32>
    %21 = arith.mulf %16, %20 : vector<24x32xf32>
    %22 = vector.broadcast %2 : vector<1x32xf32> to vector<24x32xf32>
    %23 = arith.mulf %21, %22 : vector<24x32xf32>
    %24 = vector.broadcast %3 : vector<1x32xf32> to vector<24x32xf32>
    %25 = arith.addf %23, %24 : vector<24x32xf32>
    %26 = arith.truncf %25 : vector<24x32xf32> to vector<24x32xbf16>
    %c0_9 = arith.constant 0 : index
    %c0_10 = arith.constant 0 : index
    %27 = vector.load %arg4[%c0_9, %c0_10] : memref<32x128xbf16, #tpu.memory_space<vmem>>, vector<32x128xbf16>
    %cst_11 = arith.constant dense<0.000000e+00> : vector<24x128xf32>
    %28 = tpu.matmul %26, %27, %cst_11 {dimension_numbers = #tpu.dot_dimension_numbers<[1], [0], [0], [1], [0, 0, 1, 1], [], []>} : vector<24x32xbf16>, vector<32x128xbf16>, vector<24x128xf32> -> vector<24x128xf32>
    %c0_12 = arith.constant 0 : index
    %c0_13 = arith.constant 0 : index
    %29 = vector.load %arg5[%c0_12, %c0_13] : memref<1x128xf32, #tpu.memory_space<vmem>>, vector<1x128xf32>
    %30 = vector.broadcast %29 : vector<1x128xf32> to vector<24x128xf32>
    %31 = arith.addf %28, %30 : vector<24x128xf32>
    %32 = arith.truncf %31 : vector<24x128xf32> to vector<24x128xbf16>
    %c0_14 = arith.constant 0 : index
    %c0_15 = arith.constant 0 : index
    %33 = vector.load %arg6[%c0_14, %c0_15] : memref<24x128xbf16, #tpu.memory_space<vmem>>, vector<24x128xbf16>
    tpu.vector_store %arg6[%c0_14, %c0_15], %32 {strides = array<i32>} : memref<24x128xbf16, #tpu.memory_space<vmem>>, vector<24x128xbf16>,
    return
  }
  func.func @transform_0(%arg0: i32) -> (i32, i32) {
    %c0_i32 = arith.constant 0 : i32
    %c0_i32_0 = arith.constant 0 : i32
    return %arg0, %c0_i32 : i32, i32
  }
  func.func @transform_1(%arg0: i32) -> (i32, i32) {
    %c0_i32 = arith.constant 0 : i32
    %c0_i32_0 = arith.constant 0 : i32
    %c0_i32_1 = arith.constant 0 : i32
    return %c0_i32, %c0_i32_0 : i32, i32
  }
  func.func @transform_2(%arg0: i32) -> (i32, i32) {
    %c0_i32 = arith.constant 0 : i32
    %c0_i32_0 = arith.constant 0 : i32
    %c0_i32_1 = arith.constant 0 : i32
    return %c0_i32, %c0_i32_0 : i32, i32
  }
  func.func @transform_3(%arg0: i32) -> (i32, i32) {
    %c0_i32 = arith.constant 0 : i32
    %c0_i32_0 = arith.constant 0 : i32
    %c0_i32_1 = arith.constant 0 : i32
    return %c0_i32, %c0_i32_0 : i32, i32
  }
  func.func @transform_4(%arg0: i32) -> (i32, i32) {
    %c0_i32 = arith.constant 0 : i32
    %c0_i32_0 = arith.constant 0 : i32
    %c0_i32_1 = arith.constant 0 : i32
    return %c0_i32, %c0_i32_0 : i32, i32
  }
  func.func @transform_5(%arg0: i32) -> (i32, i32) {
    %c0_i32 = arith.constant 0 : i32
    %c0_i32_0 = arith.constant 0 : i32
    return %arg0, %c0_i32 : i32, i32
  }
}

</mosaic_0001>

<bundles_post_ra>
// kernel: tpu_custom_call.1
= control target key start
LH: loop header
LB: loop body
LE: loop exit
PB: predicated region body
PF: predicated region fallthrough
CT: control target
= control target key end

     0   :  { %7 = vsyncpa [#allocation3], 0  ;;  %s635_s0 = inlined_call_operand.hbm [shape: f32[8,128], index: 0, kind: input, shape index: {}]   ;;  %s636_s1 = inlined_call_operand.hbm [shape: f32[16,128], index: 1, kind: input, shape index: {}]   ;;  %s637_s2 = inlined_call_operand.hbm [shape: f32[16,128], index: 2, kind: output, shape index: {}]  }
   0x1   :  { %8 = vsyncpa [#allocation6], 0 }
   0x2   :  { %10 = vsyncpa [#allocation6 + $0x1], 0 }
   0x3   :  { %11 = vsyncpa [#allocation4], 0 }
   0x4   :  { %13 = vsyncpa [#allocation4 + $0x1], 0  ;;  %s497_s9 = smov 0   ;;  %s499_s10 = smov 0  }
   0x5   :  { %s501_s11 = smov 0   ;;  %s503_s12 = smov 0  }
   0x6 LB: > { %s518_s13 = sadd.s32 4294967295, %s479_s12   ;;  %s278_s14 = sadd.s32 4294967294, %s479_s12   ;;  %s479_s12 = sphi %s503_s12, %s647_s12   ;;  %s475_s11 = sphi %s501_s11, %s646_s11   ;;  %s471_s10 = sphi %s499_s10, %s645_s10   ;;  %s467_s9 = sphi %s497_s9, %s644_s9  }
   0x7   : > { %p60_p0 = scmp.ne.s32.totalorder %s471_s10, %s467_s9  ;;  %p61_p1 = scmp.eq.s32.totalorder %s518_s13, 0 }
   0x8   : > { %p84_p2 = scmp.eq.s32.totalorder %s518_s13, 1  ;;  %p90_p3 = scmp.eq.s32.totalorder %s278_s14, 1 }
   0x9   : > { %p527_p4 = por %p61_p1, %p60_p0  ;;  %p279_p5 = scmp.ge.s32.totalorder %s479_s12, 1 }
   0xa   : > { %p532_p6 = por %p90_p3, %p60_p0  ;;  %p97_p7 = scmp.lt.s32.totalorder %s479_s12, 3 }
   0xb   : > { %s109_s19 = sshll.u32 %s635_s0, 4  ;;  %s481_s21 = smov [#allocation2]   ;;  %s110_s19 = int_to_ptr.hbm [resolvable:$true] %s109_s19 }
   0xc   : > { %p540_p8 = pnand %p279_p5, %p97_p7  ;;  %s111_s22 = sshll.u32 %s481_s21, 4  ;;  %s112_s22 = int_to_ptr.vmem [resolvable:$true] %s111_s22 }
   0xd   : > { %s550_s23 = sadd.s32 1, %s479_s12   ;;  %s47_s24 = sadd.s32 1, %s475_s11 }
   0xe   : > { %p300_p10 = pneg %p540_p8  ;;  %s44_s25 = ssub.s32 %s479_s12, %s550_s23 }
   0xf   : > { %p45_p12 = scmp.eq.s32.totalorder %s44_s25, 0  ;;  %p54_p13 = scmp.ne.s32.totalorder %s475_s11, %s471_s10 }
  0x10   : > { %p301_p11 = pnand %p300_p10, %p61_p1  ;;  %p55_p0 = scmp.eq.s32.totalorder %s479_s12, 0 }
  0x11   : > { %s559_s26 = scalar_select %p45_p12, %s475_s11, %s47_s24  }
  0x12   : > { %303 = dma.hbm_to_vmem [thread:$0]  (!%p301_p11), %s110_s19, 128, %s112_s22, [#allocation3]  }
  0x13   : > { %p563_p3 = por %p84_p2, %p54_p13  ;;  %p313_p5 = scmp.lt.s32.totalorder %s479_s12, 2 }
  0x14   : > { %s122_s28 = sand.u32 1, %s475_s11   ;;  %s283_s29 = sshll.u32 %s479_s12, 3 }
  0x15   : > { %p56_p7 = por %p55_p0, %p54_p13  ;;  %s282_s30 = sshll.u32 %s122_s28, 3 }
  0x16   : > { %s130_s5 = scalar_lea.hbm %s636_s1, %s283_s29  ;;  %s126_s7 = scalar_lea.vmem [#allocation5], %s282_s30 }
  0x17   : > { %s132_s6 = sshll.u32 %s130_s5, 4  ;;  %s134_s8 = sshll.u32 %s126_s7, 4  ;;  %s133_s6 = int_to_ptr.hbm [resolvable:$true] %s132_s6  ;;  %s135_s8 = int_to_ptr.vmem [resolvable:$true] %s134_s8 }
  0x18   : > { %p573_p10 = pnand %p313_p5, %p56_p7  ;;  %s123_s17 = scalar_lea.sflag [#allocation6], %s122_s28 }
  0x19   : > { %s379_s18 = sshra.s32 %s133_s6, 4  ;;  %s386_s24 = scalar_lea.hbm %s636_s1, 16  ;;  %s380_s18 = int_to_ptr.hbm [resolvable:$true] %s379_s18 }
  0x1a   : > { %s381_s19 = scalar_lea.hbm %s380_s18, 8  ;;  %p383_p11 = pneg %p573_p10 }
  0x1b   : > { %p382_p2 = scmp.ne.s32.totalorder %s380_s18, %s381_s19  ;;  %p387_p0 = scmp.lt.s32.totalorder %s380_s18, %s636_s1 }
  0x1c   : > { %p388_p5 = scmp.lt.s32.totalorder %s386_s24, %s381_s19 }
  0x1d   : > { %p384_p12 = pnand %p383_p11, %p382_p2 }
  0x1e   : > { %p389_p7 = por %p388_p5, %p387_p0 }
  0x1f   : > { %p385_p13 = pneg %p384_p12 }
  0x21   : > { %p390_p9 = pnand %p389_p7, %p385_p13 }
  0x23   : > { %393 = shalt.err (!%p390_p9)
}
  0x24   : > { %307 = dma.hbm_to_vmem [thread:$0]  (!%p573_p10), %s133_s6, 128, %s135_s8, %s123_s17  }
  0x25   : > { %143 = sbr.rel (%p540_p8) target bundleno = 62 (0x3e), region = 28 }
  0x2a   : > { %454 = dma.done.wait (%p61_p1), [#allocation3], 128  }
  0x2b   : > { %456 = vsyncadd (%p61_p1), [#allocation3], 4294967168  ;;  %s594_s28 = sand.u32 1, %s471_s10  }
  0x2c   : > { %s286_s30 = sshll.u32 %s594_s28, 3  ;;  %s151_s3 = scalar_lea.sflag [#allocation6], %s594_s28 }
  0x2d   : > { %s154_s4 = scalar_lea.vmem [#allocation5], %s286_s30 }
  0x2e   : > { %458 = dma.done.wait (%p527_p4), %s151_s3, 128  }
  0x2f   : > { %460 = vsyncadd (%p527_p4), %s151_s3, 4294967168  ;;  %s289_s20 = sshll.u32 %s518_s13, 3  ;;  %s175_s8 = scalar_lea.vmem [#allocation7], %s286_s30  ;;  %v176_v0 = vld [vmem:[%s154_s4] sm:$0xff]  ;;  %v177_v1 = vld [vmem:[#allocation2] sm:$0xff] }
  0x30   : > { %s191_s7 = scalar_lea.hbm %s637_s2, %s289_s20  ;;  %s193_s14 = sshll.u32 %s175_s8, 4  ;;  %v178_v2 = vadd.f32 %v177_v1, %v176_v0  ;;  %s194_s14 = int_to_ptr.vmem [resolvable:$true] %s193_s14 }
  0x31   : > { %s195_s17 = sshll.u32 %s191_s7, 4  ;;  %s181_s18 = scalar_lea.sflag [#allocation4], %s594_s28  ;;  %s196_s17 = int_to_ptr.hbm [resolvable:$true] %s195_s17 }
  0x32   : > { %179 = vst [vmem:[%s175_s8] sm:$0xff] %v178_v2  ;;  %s423_s15 = sshra.s32 %s196_s17, 4  ;;  %s429_s22 = scalar_lea.hbm %s637_s2, 16  ;;  %s424_s15 = int_to_ptr.hbm [resolvable:$true] %s423_s15 }
  0x33   : > { %s425_s19 = scalar_lea.hbm %s424_s15, 8  ;;  %p430_p9 = scmp.lt.s32.totalorder %s424_s15, %s637_s2 }
  0x34   : > { %p426_p1 = scmp.ne.s32.totalorder %s424_s15, %s425_s19  ;;  %p431_p10 = scmp.lt.s32.totalorder %s429_s22, %s425_s19 }
  0x36   : > { %p427_p4 = pnand %p426_p1, %p563_p3  ;;  %p432_p2 = por %p431_p10, %p430_p9 }
  0x38   : > { %p428_p8 = pneg %p427_p4 }
  0x3a   : > { %p433_p11 = pnand %p432_p2, %p428_p8 }
  0x3c   : > { %436 = shalt.err (!%p433_p11)
}
  0x3d   : > { %298 = dma.vmem_to_hbm [thread:$0]  (%p563_p3), %s194_s14, 128, %s196_s17, %s181_s18  }
  0x3e PF: > { %s207_s29 = sand.u32 1, %s467_s9   ;;  %p643_p12 = scmp.ge.s32.totalorder %s479_s12, 2 }
  0x3f   : > { %s208_s28 = scalar_lea.sflag [#allocation4], %s207_s29 }
  0x40   : > { %p309_p13 = pnand %p643_p12, %p532_p6 }
  0x42   : > { %p310_p0 = pneg %p309_p13 }
  0x44   : > { %462 = dma.done.wait (%p310_p0), %s208_s28, 128  }
  0x45   : > { %464 = vsyncadd (%p310_p0), %s208_s28, 4294967168  ;;  %p16_p5 = scmp.ge.s32.totalorder %s550_s23, 4   ;;  %s644_s9 = smov %s471_s10 }
  0x46   : > { %s645_s10 = smov %s475_s11  ;;  %s646_s11 = smov %s559_s26 }
  0x47   : > { %s647_s12 = smov %s550_s23  ;;  %18 = sbr.rel (!%p16_p5) target bundleno = 6 (0x6), region = 78 }
  0x4c   :  { %214 = vsyncpa [#allocation3], 1 }
  0x4d   :  { %216 = vsyncpa [#allocation3 + $0x1], 1 }
  0x4e   :  { %217 = vsyncpa [#allocation6], 1 }
  0x4f   :  { %219 = vsyncpa [#allocation6 + $0x1], 1 }
  0x50   :  { %220 = vsyncpa [#allocation4], 1 }
  0x51   :  { %222 = vsyncpa [#allocation4 + $0x1], 1 }

// kernel: fwd.12
= control target key start
LH: loop header
LB: loop body
LE: loop exit
PB: predicated region body
PF: predicated region fallthrough
CT: control target
= control target key end

     0   :  { %s373_s15 = smov 0   ;;  %s408_s0 = inlined_call_operand.vmem [shape: f32[2,24,12], index: 0, kind: input, shape index: {}]   ;;  %s409_s1 = inlined_call_operand.vmem [shape: bf16[12,32], index: 1, kind: input, shape index: {}]   ;;  %s410_s2 = inlined_call_operand.vmem [shape: f32[1,32], index: 2, kind: input, shape index: {}]   ;;  %s411_s3 = inlined_call_operand.vmem [shape: f32[24,32], index: 3, kind: input, shape index: {}]   ;;  %s412_s4 = inlined_call_operand.vmem [shape: bf16[2,24,32], index: 4, kind: output, shape index: {}]  }
   0x1 LB: > { %s312_s16 = sadd.s32 4294967295, %s346_s15   ;;  %p316_p0 = scmp.ge.s32.totalorder %s346_s15, 1  ;;  %s346_s15 = sphi %s373_s15, %s14_s15  }
   0x2   : > { %p162_p1 = scmp.lt.s32.totalorder %s346_s15, 3 }
   0x4   : > { %p163_p2 = pnand %p316_p0, %p162_p1 }
   0x5   : > { %p188_p3 = scmp.lt.s32.totalorder (!%p163_p2), %s312_s16, 1 }
   0x6   : > { %166 = sbr.rel (%p163_p2) target bundleno = 159 (0x9f), region = 36 }
   0xb   : > { %v321_v0 = vld [vmem:[%s409_s1] sm:$0xf]  ;;  %v327_v1 = vld [vmem:[%s409_s1] sm:$0x30]  ;;  %vm222_vm0 = vcmask 1045504   ;;  %s414_s16 = smov (!%p188_p3, %s312_s16), 1 }
   0xc   : > { %v322_v2 = vor.u32 %v327_v1, %v321_v0  ;;  %s329_s21 = smul.u32 24, %s414_s16  ;;  %vm215_vm1 = vcmask 97280   ;;  %v339_v9 = vld [vmem:[%s410_s2] ss:$0 sm:$0xff]  ;;  %v246_v13 = vld [vmem:[%s411_s3 + $0x10] sm:$0xff]  ;;  %vm253_vm2 = vcmask 257024  }
   0xd   : > { %s330_s27 = smul.u32 12, %s414_s16  ;;  %v244_v11 = vld [vmem:[%s411_s3] sm:$0xff]  ;;  %v245_v21 = vld [vmem:[%s411_s3 + $0x8] sm:$0xff] }
   0xe   : > { %v224_v3 = vsel %vm222_vm0, %v322_v2, 0  ;;  %s192_s24 = scalar_lea.vmem %s408_s0, %s329_s21 }
   0xf   : > { %233 = vmatpush.bf16.msra.mxu0 %v224_v3  ;;  %328 = vmatpush.bf16.msra.mxu1 %v224_v3  ;;  %v199_v4 = vld [vmem:[%s192_s24] sm:$0xff]  ;;  %v200_v5 = vld [vmem:[%s192_s24 + $0x8] sm:$0xff]  ;;  %v201_v6 = vld [vmem:[%s192_s24 + $0x10] sm:$0xff]  ;;  %s197_s8 = scalar_lea.vmem %s412_s4, %s330_s27 }
  0x10   : > { %v202_v7 = vpack.c.bf16 %v200_v5, %v199_v4  ;;  %v203_v8 = vpack.c.bf16 %v201_v6, %v201_v6 }
  0x12   : > { %323 = vmatmul.msk.bf16.vlgmr.msra.gmra.mxu0 %vm215_vm1, %v202_v7  ;;  %324 = vmatmul.msk.bf16.vlgmr.msra.gmra.mxu1 %vm215_vm1, %v203_v8 }
  0x8f   : > { %v235_v10 = vpop.f32.mrf.mxu0  ;;  %v240_v12 = vpop.f32.mrf.mxu1 }
  0x90   : > { %v236_v14 = vadd.f32 %v339_v9, %v235_v10  ;;  %v241_v15 = vadd.f32 %v339_v9, %v240_v12 }
  0x92   : > { %v247_v16 = vadd.f32 %v244_v11, %v236_v14  ;;  %v249_v17 = vadd.f32 %v246_v13, %v241_v15 }
  0x94   : > { %v250_v18 = vpack.c.bf16 %v247_v16, %v247_v16  ;;  %v252_v19 = vpack.c.bf16 %v249_v17, %v249_v17 }
  0x96   : > { %254 = vst.msk [vmem:[%s197_s8] sm:$0xf] %vm253_vm2, %v250_v18 }
  0x97   : > { %256 = vst.msk [vmem:[%s197_s8 + $0x8] sm:$0xf] %vm253_vm2, %v252_v19  ;;  %v237_v20 = vpop.f32.mrf.mxu0  ;;  %v242_v22 = vpop.f32.mrf.mxu1 }
  0x98   : > { %v238_v23 = vadd.f32 %v339_v9, %v237_v20 }
  0x9a   : > { %v248_v24 = vadd.f32 %v245_v21, %v238_v23 }
  0x9c   : > { %v251_v25 = vpack.c.bf16 %v248_v24, %v248_v24 }
  0x9e   : > { %255 = vst.msk [vmem:[%s197_s8 + $0x4] sm:$0xf] %vm253_vm2, %v251_v25 }
  0x9f PF: > { %s14_s15 = sadd.s32 1, %s346_s15  }
  0xa0   : > { %p11_p4 = scmp.ge.s32.totalorder %s14_s15, 4  }
  0xa2   :  { %13 = sbr.rel (!%p11_p4) target bundleno = 1 (0x1), region = 66 }

// kernel: fwd.15
= control target key start
LH: loop header
LB: loop body
LE: loop exit
PB: predicated region body
PF: predicated region fallthrough
CT: control target
= control target key end

     0   :  { %s722_s12 = smov 0   ;;  %s724_s13 = smov 0   ;;  %s815_s0 = inlined_call_operand.vmem [shape: bf16[24,32], index: 0, kind: input, shape index: {}]   ;;  %s816_s1 = inlined_call_operand.vmem [shape: f32[1,32], index: 1, kind: input, shape index: {}]   ;;  %s817_s2 = inlined_call_operand.vmem [shape: f32[1,32], index: 2, kind: input, shape index: {}]   ;;  %s818_s3 = inlined_call_operand.vmem [shape: bf16[24,32], index: 3, kind: output, shape index: {}]  }
   0x1   :  { %s726_s14 = smov 0  }
   0x2 LB: > { %s735_s15 = sadd.s32 4294967295, %s667_s14   ;;  %s737_s16 = sadd.s32 1, %s667_s14   ;;  %s667_s14 = sphi %s726_s14, %s822_s14   ;;  %s663_s13 = sphi %s724_s13, %s821_s13   ;;  %s659_s12 = sphi %s722_s12, %s820_s12  }
   0x3   : > { %s85_s17 = ssub.s32 %s667_s14, %s737_s16  ;;  %s88_s18 = sadd.s32 1, %s663_s13 }
   0x4   : > { %p86_p0 = scmp.eq.s32.totalorder %s85_s17, 0  ;;  %p98_p1 = scmp.ne.s32.totalorder %s663_s13, %s659_s12 }
   0x5   : > { %p99_p2 = scmp.eq.s32.totalorder %s735_s15, 1  ;;  %p488_p3 = scmp.ge.s32.totalorder %s667_s14, 1 }
   0x6   : > { %s745_s19 = scalar_select %p86_p0, %s663_s13, %s88_s18  }
   0x7   : > { %p747_p4 = por %p99_p2, %p98_p1  ;;  %p146_p5 = scmp.lt.s32.totalorder %s667_s14, 3 }
   0x9   : > { %p147_p6 = pnand %p488_p3, %p146_p5 }
   0xa   : > { %s752_s21 = sshll.u32 (!%p147_p6), %s735_s15, 1  ;;  %s170_s29 = sand.u32 (!%p147_p6), 1, %s659_s12  }
   0xb   : > { %150 = sbr.rel (%p147_p6) target bundleno = 341 (0x155), region = 32  ;;  %p178_p7 = scmp.lt.s32.totalorder (!%p147_p6), %s752_s21, 2 }
   0xc   : > { %s489_s5 = sshll.u32 (!%p147_p6), %s170_s29, 3 }
   0xd   : > { %s770_s6 = scalar_lea.vmem (!%p147_p6), [#allocation2], %s489_s5  }
  0x10   : > { %s179_s22 = scalar_select %p178_p7, %s752_s21, 2  ;;  %vm198_vm0 = vcmask 261120   ;;  %v701_v5 = vmov 32.0   ;;  %v605_v36 = vld [vmem:[%s816_s1] ss:$0 sm:$0xff]  ;;  %vm262_vm6 = vcmask 257024  }
  0x11   : > { %607 = vrcp.f32 %v701_v5  ;;  %v606_v39 = vld [vmem:[%s817_s2] ss:$0 sm:$0xff]  ;;  %s273_s7 = ssub.s32 (%p747_p4), 3, %s752_s21  ;;  %s509_s8 = sshll.u32 (%p747_p4), %s735_s15, 3 }
  0x12   : > { %s491_s23 = sshll.u32 %s179_s22, 2  ;;  %p274_p8 = scmp.lt.s32.totalorder (%p747_p4), %s273_s7, 2 }
  0x13   : > { %s181_s26 = scalar_lea.vmem %s815_s0, %s491_s23  ;;  %s781_s11 = scalar_lea.vmem (%p747_p4), %s818_s3, %s509_s8  }
  0x14   : > { %v513_v0 = vld [vmem:[%s181_s26] sm:$0xff]  }
  0x15   : > { %v514_v1 = vunpack.c.l.bf16 %v513_v0  ;;  %v515_v3 = vunpack.c.h.bf16 %v513_v0 }
  0x17   : > { %v199_v2 = vsel %vm198_vm0, %v514_v1, 0.0  ;;  %v202_v4 = vsel %vm198_vm0, %v515_v3, 0.0  ;;  %v608_v6 = vpop.eup %607 }
  0x18   : > { %200 = vadd.xlane.f32.xlu0 %v199_v2  ;;  %v206_v7 = vmul.f32 32.0, %v608_v6  ;;  %vm210_vm1 = vweird.f32 %v608_v6 }
  0x1a   : > { %v207_v8 = vsub.f32 1.0, %v206_v7 }
  0x1c   : > { %v208_v9 = vmul.f32 %v608_v6, %v207_v8 }
  0x1e   : > { %v209_v10 = vadd.f32 %v608_v6, %v208_v9 }
  0x20   : > { %203 = vadd.xlane.f32.xlu0 %v202_v4  ;;  %v211_v11 = vsel %vm210_vm1, %v608_v6, %v209_v10 }
  0x8b   : > { %v201_v12 = vpop.xlane.xlu0 %200 }
  0x8c   : > { %v212_v13 = vmul.f32 %v211_v11, %v201_v12 }
  0x8e   : > { %v214_v14 = vsub.f32 %v514_v1, %v212_v13 }
  0x90   : > { %v216_v15 = vmul.f32 %v214_v14, %v214_v14 }
  0x92   : > { %v218_v16 = vsel %vm198_vm0, %v216_v15, 0.0 }
  0x93   : > { %219 = vadd.xlane.f32.xlu1 %v218_v16  ;;  %v204_v17 = vpop.xlane.xlu0 %203 }
  0x94   : > { %v213_v18 = vmul.f32 %v211_v11, %v204_v17 }
  0x96   : > { %v215_v19 = vsub.f32 %v515_v3, %v213_v18 }
  0x98   : > { %v217_v20 = vmul.f32 %v215_v19, %v215_v19 }
  0x9a   : > { %v221_v21 = vsel %vm198_vm0, %v217_v20, 0.0 }
  0x9b   : > { %222 = vadd.xlane.f32.xlu1 %v221_v21 }
 0x106   : > { %v220_v22 = vpop.xlane.xlu1 %219 }
 0x107   : > { %v224_v23 = vmul.f32 %v220_v22, %v211_v11 }
 0x109   : > { %v226_v24 = vadd.f32 1e-05, %v224_v23 }
 0x10b   : > { %609 = vrsqrt.f32 %v226_v24  ;;  %vm234_vm3 = vweird.f32 %v226_v24 }
 0x10e   : > { %v223_v25 = vpop.xlane.xlu1 %222 }
 0x10f   : > { %v225_v26 = vmul.f32 %v223_v25, %v211_v11 }
 0x111   : > { %v610_v27 = vpop.eup %609  ;;  %v227_v28 = vadd.f32 1e-05, %v225_v26 }
 0x112   : > { %v229_v29 = vmul.f32 %v610_v27, %v226_v24  ;;  %vm235_vm2 = vweird.f32 %v610_v27 }
 0x113   : > { %611 = vrsqrt.f32 %v227_v28  ;;  %vm236_vm4 = vmor %vm234_vm3, %vm235_vm2  ;;  %vm244_vm7 = vweird.f32 %v227_v28 }
 0x114   : > { %v230_v30 = vmul.f32 %v610_v27, %v229_v29 }
 0x116   : > { %v231_v31 = vmul.f32 0.5, %v230_v30 }
 0x118   : > { %v232_v32 = vsub.f32 1.5, %v231_v31 }
 0x119   : > { %v612_v33 = vpop.eup %611 }
 0x11a   : > { %v233_v34 = vmul.f32 %v610_v27, %v232_v32  ;;  %v239_v35 = vmul.f32 %v612_v33, %v227_v28  ;;  %vm245_vm5 = vweird.f32 %v612_v33 }
 0x11b   : > { %vm246_vm8 = vmor %vm244_vm7, %vm245_vm5 }
 0x11c   : > { %v237_v37 = vsel %vm236_vm4, %v610_v27, %v233_v34  ;;  %v240_v38 = vmul.f32 %v612_v33, %v239_v35 }
 0x11d   : > { %v248_v40 = vmul.f32 %v237_v37, %v214_v14 }
 0x11e   : > { %v241_v41 = vmul.f32 0.5, %v240_v38 }
 0x11f   : > { %v253_v42 = vmul.f32 %v605_v36, %v248_v40 }
 0x120   : > { %v242_v43 = vsub.f32 1.5, %v241_v41 }
 0x121   : > { %v258_v44 = vadd.f32 %v606_v39, %v253_v42 }
 0x122   : > { %v243_v45 = vmul.f32 %v612_v33, %v242_v43 }
 0x123   : > { %v260_v46 = vpack.c.bf16 %v258_v44, %v258_v44 }
 0x124   : > { %v247_v47 = vsel %vm246_vm8, %v612_v33, %v243_v45 }
 0x125   : > { %263 = vst.msk [vmem:[%s770_s6] sm:$0xf] %vm262_vm6, %v260_v46  ;;  %v249_v48 = vmul.f32 %v247_v47, %v215_v19 }
 0x127   : > { %v254_v49 = vmul.f32 %v605_v36, %v249_v48 }
 0x129   : > { %v259_v50 = vadd.f32 %v606_v39, %v254_v49  ;;  %271 = sbr.rel (!%p747_p4) target bundleno = 341 (0x155), region = 36 }
 0x12b   : > { %v261_v51 = vpack.c.bf16 %v259_v50, %v259_v50 }
 0x12d   : > { %264 = vst.msk [vmem:[%s770_s6 + $0x4] sm:$0xf] %vm262_vm6, %v261_v51 }
 0x12e   : > { %s824_s7 = smov (!%p274_p8, %s273_s7), 2 }
 0x12f   : > { %s494_s12 = sshll.u32 %s824_s7, 2 }
 0x130   : > { %p497_p9 = scmp.eq.s32.totalorder %s494_s12, 0 }
 0x131   : > { %s787_s14 = sshrl.u32 (!%p497_p9), %s824_s7, 1 }
 0x132   : > { %282 = sbr.rel (%p497_p9) target bundleno = 341 (0x155), region = 40  ;;  %p498_p10 = scmp.le.s32.totalorder (!%p497_p9), %s787_s14, 0 }
 0x137   : > { %441 = sbr.rel (%p498_p10) target bundleno = 324 (0x144), region = 112  ;;  %s669_s15 = smov (!%p498_p10), %s781_s11  }
 0x138   : > { %s673_s17 = smov (!%p498_p10), %s770_s6   ;;  %s677_s18 = smov (!%p498_p10), 0  }
 0x139   : > { %s681_s20 = smov (!%p498_p10), 0  }
 0x13c LB: >> { %v299_v52 = vld [vmem:[%s675_s17] sm:$0xf]  ;;  %v301_v53 = vld [vmem:[%s675_s17 + $0x4] sm:$0xf]  ;;  %s303_s21 = sadd.s32 1, %s679_s18  ;;  %s293_s20 = sadd.s32 1, %s683_s20   ;;  %s683_s20 = sphi %s681_s20, %s293_s20   ;;  %s679_s18 = sphi %s677_s18, %s678_s18   ;;  %s675_s17 = sphi %s673_s17, %s308_s17   ;;  %s671_s15 = sphi %s669_s15, %s309_s15  }
 0x13d   : >> { %300 = vst [vmem:[%s671_s15] sm:$0xf] %v299_v52  ;;  %p304_p11 = scmp.ge.s32.totalorder %s303_s21, %s787_s14  ;;  %p292_p12 = scmp.ge.s32.totalorder %s293_s20, %s787_s14 }
 0x13e   : >> { %302 = vst [vmem:[%s671_s15 + $0x4] sm:$0xf] %v301_v53 }
 0x13f   : >> { %s826_s21 = smov (%p304_p11, %s303_s21), 0  ;;  %295 = sbr.rel (!%p292_p12) target bundleno = 316 (0x13c), region = 118 }
 0x140   : >> { %s499_s22 = sshll.u32 %s826_s21, 3  ;;  %s678_s18 = smov %s826_s21  }
 0x141   : >> { %s308_s17 = scalar_lea.vmem %s770_s6, %s499_s22 [#allocation2]   ;;  %s309_s15 = scalar_lea.vmem %s781_s11, %s499_s22  }
 0x144 PF: > { %s797_s23 = sand.u32 1, %s824_s7   ;;  %s510_s24 = sshll.u32 %s787_s14, 3 }
 0x145   : > { %s314_s25 = scalar_lea.vmem %s770_s6, %s510_s24 [#allocation2]   ;;  %s316_s26 = scalar_lea.vmem %s781_s11, %s510_s24  }
 0x146   : > { %p504_p13 = scmp.le.s32.totalorder %s797_s23, 0 }
 0x147   : > { %s685_s27 = smov (!%p504_p13), %s316_s26   ;;  %s689_s28 = smov (!%p504_p13), %s314_s25  }
 0x148   : > { %455 = sbr.rel (%p504_p13) target bundleno = 341 (0x155), region = 123  ;;  %s693_s29 = smov (!%p504_p13), 0  }
 0x149   : > { %s697_s30 = smov (!%p504_p13), 0  }
 0x14d LB: >> { %v326_v54 = vld [vmem:[%s691_s28] sm:$0xf]  ;;  %s328_s4 = sadd.s32 1, %s695_s29  ;;  %s320_s30 = sadd.s32 1, %s699_s30   ;;  %s699_s30 = sphi %s697_s30, %s320_s30   ;;  %s695_s29 = sphi %s693_s29, %s694_s29   ;;  %s691_s28 = sphi %s689_s28, %s333_s28   ;;  %s687_s27 = sphi %s685_s27, %s334_s27  }
 0x14e   : >> { %327 = vst [vmem:[%s687_s27] sm:$0xf] %v326_v54  ;;  %p329_p0 = scmp.ge.s32.totalorder %s328_s4, %s797_s23  ;;  %p319_p1 = scmp.ge.s32.totalorder %s320_s30, %s797_s23 }
 0x150   : >> { %s828_s4 = smov (%p329_p0, %s328_s4), 0  ;;  %322 = sbr.rel (!%p319_p1) target bundleno = 333 (0x14d), region = 129 }
 0x151   : >> { %s505_s5 = sshll.u32 %s828_s4, 2  ;;  %s694_s29 = smov %s828_s4  }
 0x152   : >> { %s333_s28 = scalar_lea.vmem %s314_s25, %s505_s5 [#allocation2]   ;;  %s334_s27 = scalar_lea.vmem %s316_s26, %s505_s5  }
 0x155 PF: > { %p10_p2 = scmp.ge.s32.totalorder %s737_s16, 4   ;;  %s820_s12 = smov %s663_s13 }
 0x156   : > { %s821_s13 = smov %s745_s19  ;;  %s822_s14 = smov %s737_s16 }
 0x157   :  { %12 = sbr.rel (!%p10_p2) target bundleno = 2 (0x2), region = 140 }

// kernel: fwd.13
= control target key start
LH: loop header
LB: loop body
LE: loop exit
PB: predicated region body
PF: predicated region fallthrough
CT: control target
= control target key end

     0   :  { %s1577_s25 = smov 0   ;;  %s1803_s0 = inlined_call_operand.vmem [shape: bf16[2,12,32], index: 0, kind: input, shape index: {}]   ;;  %s1804_s1 = inlined_call_operand.vmem [shape: f32[1,32], index: 1, kind: input, shape index: {}]   ;;  %s1805_s2 = inlined_call_operand.vmem [shape: f32[1,32], index: 2, kind: input, shape index: {}]   ;;  %s1806_s3 = inlined_call_operand.vmem [shape: bf16[32,96], index: 3, kind: input, shape index: {}]   ;;  %s1807_s4 = inlined_call_operand.vmem [shape: f32[1,96], index: 4, kind: input, shape index: {}]   ;;  %s1808_s5 = inlined_call_operand.vmem [shape: bf16[32,32], index: 5, kind: input, shape index: {}]   ;;  %s1809_s6 = inlined_call_operand.vmem [shape: f32[1,32], index: 6, kind: input, shape index: {}]   ;;  %s1810_s7 = inlined_call_operand.vmem [shape: f32[1,32], index: 7, kind: input, shape index: {}]   ;;  %s1811_s8 = inlined_call_operand.vmem [shape: f32[1,32], index: 8, kind: input, shape index: {}]   ;;  %s1812_s9 = inlined_call_operand.vmem [shape: bf16[32,128], index: 9, kind: input, shape index: {}]   ;;  %s1813_s10 = inlined_call_operand.vmem [shape: f32[1,128], index: 10, kind: input, shape index: {}]   ;;  %s1814_s11 = inlined_call_operand.vmem [shape: bf16[128,32], index: 11, kind: input, shape index: {}]   ;;  %s1815_s12 = inlined_call_operand.vmem [shape: f32[1,32], index: 12, kind: input, shape index: {}]   ;;  %s1816_s13 = inlined_call_operand.vmem [shape: bf16[2,12,32], index: 13, kind: output, shape index: {}]  }
   0x1 LB: > { %s1276_s26 = sadd.s32 4294967295, %s1490_s25   ;;  %p1280_p0 = scmp.ge.s32.totalorder %s1490_s25, 1  ;;  %s1490_s25 = sphi %s1577_s25, %s23_s25  }
   0x2   : > { %p387_p1 = scmp.lt.s32.totalorder %s1490_s25, 3 }
   0x4   : > { %p388_p2 = pnand %p1280_p0, %p387_p1 }
   0x5   : > { %p431_p3 = scmp.lt.s32.totalorder (!%p388_p2), %s1276_s26, 1  ;;  %s1493_s24 = smov (!%p388_p2), 64  }
   0x6   : > { %391 = sbr.rel (%p388_p2) target bundleno = 2300 (0x8fc), region = 72  ;;  %s1494_s28 = smov (!%p388_p2), 96  }
   0x7   : > { %s1495_s29 = smov (!%p388_p2), 120   ;;  %s1497_s14 = smov (!%p388_p2), 72  }
   0x8   : > { %s1498_s15 = smov (!%p388_p2), 80   ;;  %s1499_s16 = smov (!%p388_p2), 104  }
   0x9   : > { %s1500_s17 = smov (!%p388_p2), 112   ;;  %s1501_s18 = smov (!%p388_p2), 56  }
   0xa   : > { %s1502_s19 = smov (!%p388_p2), 40   ;;  %s1503_s20 = smov (!%p388_p2), 48  }
   0xb   : > { %s1818_s26 = smov (!%p431_p3, %s1276_s26), 1  ;;  %vm448_vm0 = vcmask 261120   ;;  %vm452_vm1 = vcmask 257024   ;;  %v1492_v6 = vmov 32.0   ;;  %v1377_v23 = vld [vmem:[%s1806_s3 + $0x8] sm:$0xff]  ;;  %v1376_v25 = vld [vmem:[%s1806_s3] sm:$0xff] }
   0xc   : > { %s1374_s27 = sshll.u32 %s1818_s26, 3  ;;  %1438 = vrcp.f32 %v1492_v6  ;;  %541 = vmatpush.bf16.msra.mxu0 %v1377_v23  ;;  %v1430_v44 = vld [vmem:[%s1804_s1] ss:$0 sm:$0xff]  ;;  %vm555_vm9 = vcmask 64512   ;;  %vm589_vm10 = vcmask 97280   ;;  %vm593_vm11 = vcmask 93184  }
   0xd   : > { %s435_s30 = scalar_lea.vmem %s1803_s0, %s1374_s27  ;;  %v1431_v49 = vld [vmem:[%s1805_s2] ss:$0 sm:$0xff]  ;;  %vm624_vm12 = vcmask 1043456   ;;  %s1504_s21 = smov 8   ;;  %vm973_vm13 = vcmask 130048   ;;  %vm976_vm14 = vcmask 195584  }
   0xe   : > { %v442_v0 = vld [vmem:[%s435_s30] sm:$0xf]  ;;  %v443_v2 = vld [vmem:[%s435_s30 + $0x4] sm:$0x3]  ;;  %s1496_s30 = smov 88   ;;  %s1505_s22 = smov 16  }
   0xf   : > { %v1593_v1 = vunpack.c.l.bf16 %v442_v0  ;;  %v1597_v4 = vunpack.c.l.bf16 %v443_v2  ;;  %v1432_v54 = vld [vmem:[%s1807_s4] ss:$0 sm:$0xff]  ;;  %s1506_s23 = smov 24  }
  0x10   : > { %542 = vmatpush.bf16.msra.mxu0 %v1376_v25 }
  0x11   : > { %v449_v3 = vsel %vm448_vm0, %v1593_v1, 0.0  ;;  %v453_v5 = vsel %vm452_vm1, %v1597_v4, 0.0 }
  0x12   : > { %450 = vadd.xlane.f32.xlu0 %v449_v3  ;;  %v1439_v7 = vpop.eup %1438 }
  0x13   : > { %v457_v8 = vmul.f32 32.0, %v1439_v7  ;;  %vm461_vm2 = vweird.f32 %v1439_v7 }
  0x15   : > { %v458_v9 = vsub.f32 1.0, %v457_v8 }
  0x17   : > { %v459_v10 = vmul.f32 %v1439_v7, %v458_v9 }
  0x19   : > { %v460_v11 = vadd.f32 %v1439_v7, %v459_v10 }
  0x1a   : > { %454 = vadd.xlane.f32.xlu0 %v453_v5 }
  0x1b   : > { %v1601_v12 = vsel %vm461_vm2, %v1439_v7, %v460_v11 }
  0x85   : > { %v451_v13 = vpop.xlane.xlu0 %450 }
  0x86   : > { %v463_v14 = vmul.f32 %v1601_v12, %v451_v13 }
  0x88   : > { %v465_v15 = vsub.f32 %v1593_v1, %v463_v14 }
  0x8a   : > { %v467_v16 = vmul.f32 %v465_v15, %v465_v15 }
  0x8c   : > { %v469_v17 = vsel %vm448_vm0, %v467_v16, 0.0 }
  0x8d   : > { %470 = vadd.xlane.f32.xlu1 %v469_v17  ;;  %v455_v18 = vpop.xlane.xlu0 %454 }
  0x8e   : > { %v464_v19 = vmul.f32 %v1601_v12, %v455_v18 }
  0x90   : > { %v466_v20 = vsub.f32 %v1597_v4, %v464_v19 }
  0x92   : > { %v468_v21 = vmul.f32 %v466_v20, %v466_v20 }
  0x94   : > { %v472_v22 = vsel %vm452_vm1, %v468_v21, 0.0 }
  0x95   : > { %473 = vadd.xlane.f32.xlu1 %v472_v22 }
 0x100   : > { %v471_v24 = vpop.xlane.xlu1 %470 }
 0x101   : > { %v475_v26 = vmul.f32 %v471_v24, %v1601_v12 }
 0x103   : > { %v477_v27 = vadd.f32 1e-05, %v475_v26 }
 0x105   : > { %1440 = vrsqrt.f32 %v477_v27  ;;  %vm485_vm4 = vweird.f32 %v477_v27 }
 0x108   : > { %v474_v28 = vpop.xlane.xlu1 %473 }
 0x109   : > { %v476_v29 = vmul.f32 %v474_v28, %v1601_v12 }
 0x10b   : > { %v1441_v30 = vpop.eup %1440  ;;  %v478_v31 = vadd.f32 1e-05, %v476_v29 }
 0x10c   : > { %v480_v32 = vmul.f32 %v1441_v30, %v477_v27  ;;  %vm486_vm3 = vweird.f32 %v1441_v30 }
 0x10d   : > { %1442 = vrsqrt.f32 %v478_v31  ;;  %vm487_vm5 = vmor %vm485_vm4, %vm486_vm3  ;;  %vm495_vm7 = vweird.f32 %v478_v31 }
 0x10e   : > { %v481_v33 = vmul.f32 %v1441_v30, %v480_v32 }
 0x110   : > { %v482_v34 = vmul.f32 0.5, %v481_v33 }
 0x112   : > { %v483_v35 = vsub.f32 1.5, %v482_v34 }
 0x113   : > { %v1443_v36 = vpop.eup %1442 }
 0x114   : > { %v484_v37 = vmul.f32 %v1441_v30, %v483_v35  ;;  %v490_v38 = vmul.f32 %v1443_v36, %v478_v31  ;;  %vm496_vm6 = vweird.f32 %v1443_v36 }
 0x115   : > { %vm497_vm8 = vmor %vm495_vm7, %vm496_vm6 }
 0x116   : > { %v491_v39 = vmul.f32 %v1443_v36, %v490_v38  ;;  %v488_v40 = vsel %vm487_vm5, %v1441_v30, %v484_v37 }
 0x117   : > { %v499_v43 = vmul.f32 %v488_v40, %v465_v15 }
 0x118   : > { %v492_v41 = vmul.f32 0.5, %v491_v39 }
 0x119   : > { %v504_v48 = vmul.f32 %v1430_v44, %v499_v43 }
 0x11a   : > { %v493_v42 = vsub.f32 1.5, %v492_v41 }
 0x11b   : > { %v509_v51 = vadd.f32 %v1431_v49, %v504_v48 }
 0x11c   : > { %v494_v45 = vmul.f32 %v1443_v36, %v493_v42 }
 0x11e   : > { %v498_v46 = vsel %vm497_vm8, %v1443_v36, %v494_v45 }
 0x11f   : > { %v500_v47 = vmul.f32 %v498_v46, %v466_v20 }
 0x121   : > { %v505_v50 = vmul.f32 %v1430_v44, %v500_v47 }
 0x123   : > { %v510_v52 = vadd.f32 %v1431_v49, %v505_v50 }
 0x125   : > { %v511_v53 = vpack.c.bf16 %v510_v52, %v509_v51 }
 0x127   : > { %1293 = vmatmul.msk.bf16.vlgmr.msra.gmra.mxu0 %vm448_vm0, %v511_v53 }
 0x1a4   : > { %v544_v55 = vpop.f32.mrf.mxu0 }
 0x1a5   : > { %v1627_v56 = vadd.f32 %v1432_v54, %v544_v55 }
 0x1a7   : > { %613 = vrot.lane.b32.xlu1 %v1627_v56, %s1493_s24 }
 0x1ac   : > { %v546_v57 = vpop.f32.mrf.mxu0 }
 0x1ad   : > { %v1630_v58 = vadd.f32 %v1432_v54, %v546_v57 }
 0x1af   : > { %553 = vrot.lane.b32.xlu2 %v1630_v58, %s1494_s28  ;;  %650 = vrot.lane.b32.xlu1 %v1627_v56, %s1495_s29 }
 0x1b7   : > { %551 = vrot.lane.b32.xlu2 %v1627_v56, %s1494_s28 }
 0x209   : > { %v554_v59 = vpop.permute.xlu2 %553 }
 0x20a   : > { %1294 = vmatpush.xpose.msk.msra.mxu1 %vm555_vm9, %v554_v59 }
 0x211   : > { %v552_v60 = vpop.permute.xlu2 %551 }
 0x212   : > { %1295 = vmatpush.xpose.msk.msra.mxu1 %vm555_vm9, %v552_v60 }
 0x215   : > { %1296 = vmatmul.msk.f32.vlgmr.msra.gmra.mxu1 %vm555_vm9, %v1627_v56 }
 0x219   : > { %v614_v5 = vpop.permute.xlu1 %613 }
 0x21d   : > { %1297 = vmatmul.msk.f32.gmra.mxu1 %vm555_vm9, %v1630_v58 }
 0x221   : > { %v651_v6 = vpop.permute.xlu1 %650 }
 0x292   : > { %v581_v61 = vpop.f32.mrf.mxu1 }
 0x293   : > { %v587_v62 = vmul.f32 0.35355338, %v581_v61 }
 0x295   : > { %v590_v63 = vsel %vm589_vm10, %v587_v62, -inf }
 0x296   : > { %591 = vmax.xlane.f32.xlu0 %v590_v63 }
 0x29a   : > { %v584_v0 = vpop.f32.mrf.mxu1 }
 0x29b   : > { %v588_v2 = vmul.f32 0.35355338, %v584_v0 }
 0x29d   : > { %v594_v3 = vsel %vm593_vm11, %v588_v2, -inf }
 0x29e   : > { %595 = vmax.xlane.f32.xlu1 %v594_v3 }
 0x2aa   : > { %615 = vrot.lane.b32.xlu0 %v1630_v58, %s1493_s24 }
 0x2b2   : > { %656 = vrot.lane.b32.xlu0 %v1630_v58, %s1496_s30 }
 0x2b7   : > { %852 = vrot.lane.b32.xlu1 %v1627_v56, %s1497_s14 }
 0x2ba   : > { %654 = vrot.lane.b32.xlu0 %v1627_v56, %s1496_s30 }
 0x2bf   : > { %755 = vrot.lane.b32.xlu1 %v1630_v58, %s1498_s15 }
 0x2c2   : > { %854 = vrot.lane.b32.xlu0 %v1630_v58, %s1497_s14 }
 0x2ca   : > { %848 = vrot.lane.b32.xlu0 %v1627_v56, %s1499_s16 }
 0x2d2   : > { %753 = vrot.lane.b32.xlu0 %v1627_v56, %s1498_s15 }
 0x2da   : > { %751 = vrot.lane.b32.xlu0 %v1630_v58, %s1500_s17 }
 0x309   : > { %v592_v7 = vpop.xlane.xlu0 %591 }
 0x30a   : > { %v597_v8 = vsub.f32 %v587_v62, %v592_v7 }
 0x30c   : > { %v599_v9 = vmul.f32 1.442695, %v597_v8 }
 0x30e   : > { %1444 = vpow2.f32 %v599_v9 }
 0x311   : > { %v596_v10 = vpop.xlane.xlu1 %595 }
 0x312   : > { %v598_v11 = vsub.f32 %v588_v2, %v596_v10 }
 0x314   : > { %v1445_v13 = vpop.eup %1444  ;;  %v601_v14 = vmul.f32 1.442695, %v598_v11 }
 0x315   : > { %v603_v15 = vsel %vm589_vm10, %v1445_v13, 0.0 }
 0x316   : > { %1446 = vpow2.f32 %v601_v14  ;;  %604 = vadd.xlane.f32.xlu2 %v603_v15 }
 0x31c   : > { %v1447_v16 = vpop.eup %1446  ;;  %v616_v17 = vpop.permute.xlu0 %615 }
 0x31d   : > { %1298 = vmatpush.msk.msra.mxu2 %vm624_vm12, %v616_v17  ;;  %v606_v18 = vsel %vm593_vm11, %v1447_v16, 0.0 }
 0x31e   : > { %607 = vadd.xlane.f32.xlu1 %v606_v18 }
 0x31f   : > { %642 = vmatpush.msra.mxu2 %v614_v5 }
 0x324   : > { %v657_v19 = vpop.permute.xlu0 %656 }
 0x325   : > { %1301 = vmatpush.xpose.msk.msrb.mxu2 %vm555_vm9, %v657_v19  ;;  %1390 = vmatpush.xpose.msk.msra.mxu3 %vm555_vm9, %v657_v19 }
 0x329   : > { %v853_v20 = vpop.permute.xlu1 %852 }
 0x32c   : > { %v655_v21 = vpop.permute.xlu0 %654 }
 0x32d   : > { %1302 = vmatpush.xpose.msk.msrb.mxu2 %vm555_vm9, %v655_v21  ;;  %1391 = vmatpush.xpose.msk.msra.mxu3 %vm555_vm9, %v655_v21 }
 0x32e   : > { %652 = vrot.lane.b32.xlu2 %v1630_v58, %s1495_s29 }
 0x331   : > { %v756_v22 = vpop.permute.xlu1 %755 }
 0x332   : > { %1308 = vmatpush.xpose.msk.msrb.mxu0 %vm555_vm9, %v756_v22 }
 0x334   : > { %v855_v23 = vpop.permute.xlu0 %854 }
 0x335   : > { %1315 = vmatpush.xpose.msk.msrb.mxu3 %vm555_vm9, %v855_v23 }
 0x336   : > { %749 = vrot.lane.b32.xlu2 %v1627_v56, %s1500_s17 }
 0x337   : > { %850 = vrot.lane.b32.xlu1 %v1630_v58, %s1499_s16 }
 0x339   : > { %1316 = vmatpush.xpose.msk.msrb.mxu3 %vm555_vm9, %v853_v20 }
 0x33c   : > { %v849_v24 = vpop.permute.xlu0 %848 }
 0x344   : > { %v754_v25 = vpop.permute.xlu0 %753 }
 0x345   : > { %1309 = vmatpush.xpose.msk.msrb.mxu0 %vm555_vm9, %v754_v25 }
 0x34c   : > { %v752_v34 = vpop.permute.xlu0 %751 }
 0x389   : > { %v605_v26 = vpop.xlane.xlu2 %604 }
 0x38a   : > { %1448 = vrcp.f32 %v605_v26 }
 0x390   : > { %v1449_v27 = vpop.eup %1448 }
 0x391   : > { %v653_v28 = vpop.permute.xlu2 %652  ;;  %v608_v29 = vpop.xlane.xlu1 %607  ;;  %v611_v30 = vmul.f32 %v1449_v27, %v1445_v13 }
 0x392   : > { %1450 = vrcp.f32 %v608_v29  ;;  %1304 = vmatmul.msk.f32.vlgmr.msra.gmra.mxu3 %vm555_vm9, %v653_v28 }
 0x393   : > { %1299 = vmatmul.msk.f32.vlgmr.msra.gmra.mxu2 %vm589_vm10, %v611_v30 }
 0x398   : > { %v1451_v31 = vpop.eup %1450 }
 0x399   : > { %v750_v32 = vpop.permute.xlu2 %749  ;;  %v612_v33 = vmul.f32 %v1451_v31, %v1447_v16 }
 0x39a   : > { %1310 = vmatmul.msk.f32.vlgmr.msrb.gmra.mxu0 %vm555_vm9, %v750_v32  ;;  %1317 = vmatmul.msk.f32.vlgmr.msrb.gmra.mxu3 %vm555_vm9, %v849_v24 }
 0x39b   : > { %1300 = vmatmul.msk.f32.gmra.mxu2 %vm589_vm10, %v612_v33 }
 0x3a2   : > { %1311 = vmatmul.msk.f32.gmra.mxu0 %vm555_vm9, %v752_v34 }
 0x3a3   : > { %1303 = vmatmul.msk.f32.vlgmr.msrb.gmra.mxu2 %vm555_vm9, %v651_v6 }
 0x3a9   : > { %v851_v35 = vpop.permute.xlu1 %850 }
 0x3aa   : > { %1318 = vmatmul.msk.f32.gmra.mxu3 %vm555_vm9, %v851_v35 }
 0x415   : > { %v686_v36 = vpop.f32.mrf.mxu3 }
 0x416   : > { %v690_v37 = vmul.f32 0.35355338, %v686_v36  ;;  %v1680_v38 = vpop.f32.mrf.mxu2 }
 0x417   : > { %v782_v39 = vpop.f32.mrf.mxu0 }
 0x418   : > { %v694_v40 = vsel %vm593_vm11, %v690_v37, -inf  ;;  %v788_v41 = vmul.f32 0.35355338, %v782_v39 }
 0x419   : > { %695 = vmax.xlane.f32.xlu2 %v694_v40 }
 0x41a   : > { %v790_v46 = vsel %vm589_vm10, %v788_v41, -inf }
 0x41d   : > { %v881_v42 = vpop.f32.mrf.mxu3 }
 0x41e   : > { %v887_v43 = vmul.f32 0.35355338, %v881_v42  ;;  %v1683_v44 = vpop.f32.mrf.mxu2 }
 0x41f   : > { %v785_v47 = vpop.f32.mrf.mxu0 }
 0x420   : > { %v889_v45 = vsel %vm589_vm10, %v887_v43, -inf  ;;  %v789_v48 = vmul.f32 0.35355338, %v785_v47 }
 0x421   : > { %890 = vmax.xlane.f32.xlu0 %v889_v45  ;;  %791 = vmax.xlane.f32.xlu2 %v790_v46 }
 0x422   : > { %v793_v51 = vsel %vm593_vm11, %v789_v48, -inf }
 0x426   : > { %v683_v49 = vpop.f32.mrf.mxu2 }
 0x427   : > { %v689_v50 = vmul.f32 0.35355338, %v683_v49 }
 0x429   : > { %794 = vmax.xlane.f32.xlu0 %v793_v51  ;;  %v691_v52 = vsel %vm589_vm10, %v689_v50, -inf }
 0x42a   : > { %692 = vmax.xlane.f32.xlu1 %v691_v52 }
 0x42d   : > { %v884_v53 = vpop.f32.mrf.mxu3 }
 0x42e   : > { %v888_v54 = vmul.f32 0.35355338, %v884_v53 }
 0x430   : > { %v892_v55 = vsel %vm593_vm11, %v888_v54, -inf }
 0x432   : > { %893 = vmax.xlane.f32.xlu1 %v892_v55 }
 0x439   : > { %713 = vrot.lane.b32.xlu2 %v1627_v56, %s1501_s18 }
 0x441   : > { %911 = vrot.lane.b32.xlu2 %v1627_v56, %s1502_s19 }
 0x44b   : > { %715 = vrot.lane.b32.xlu1 %v1630_v58, %s1501_s18  ;;  %s440_s18 = scalar_lea.vmem %s1816_s13, %s1374_s27 }
 0x453   : > { %913 = vrot.lane.b32.xlu1 %v1630_v58, %s1502_s19 }
 0x45b   : > { %814 = vrot.lane.b32.xlu1 %v1630_v58, %s1503_s20 }
 0x48c   : > { %v696_v57 = vpop.xlane.xlu2 %695 }
 0x48d   : > { %v698_v59 = vsub.f32 %v690_v37, %v696_v57 }
 0x48f   : > { %v701_v60 = vmul.f32 1.442695, %v698_v59 }
 0x491   : > { %1452 = vpow2.f32 %v701_v60 }
 0x494   : > { %v891_v61 = vpop.xlane.xlu0 %890  ;;  %v792_v62 = vpop.xlane.xlu2 %791 }
 0x495   : > { %v895_v63 = vsub.f32 %v887_v43, %v891_v61  ;;  %v796_v3 = vsub.f32 %v788_v41, %v792_v62  ;;  %v1379_v62 = vld [vmem:[%s1808_s5 + $0x8] sm:$0xff] }
 0x496   : > { %1009 = vmatpush.bf16.msra.mxu0 %v1379_v62 }
 0x497   : > { %v1696_v0 = vpop.eup %1452  ;;  %v897_v2 = vmul.f32 1.442695, %v895_v63  ;;  %v798_v6 = vmul.f32 1.442695, %v796_v3  ;;  %v1378_v63 = vld [vmem:[%s1808_s5] sm:$0xff] }
 0x498   : > { %v706_v5 = vsel %vm593_vm11, %v1696_v0, 0.0 }
 0x499   : > { %1454 = vpow2.f32 %v897_v2  ;;  %707 = vadd.xlane.f32.xlu0 %v706_v5 }
 0x49a   : > { %1456 = vpow2.f32 %v798_v6  ;;  %1010 = vmatpush.bf16.msra.mxu0 %v1378_v63 }
 0x49c   : > { %v795_v13 = vpop.xlane.xlu0 %794  ;;  %v714_v26 = vpop.permute.xlu2 %713 }
 0x49d   : > { %v693_v7 = vpop.xlane.xlu1 %692  ;;  %v797_v17 = vsub.f32 %v789_v48, %v795_v13 }
 0x49e   : > { %v697_v8 = vsub.f32 %v689_v50, %v693_v7 }
 0x49f   : > { %v1455_v58 = vpop.eup %1454  ;;  %v800_v21 = vmul.f32 1.442695, %v797_v17 }
 0x4a0   : > { %v699_v9 = vmul.f32 1.442695, %v697_v8  ;;  %v901_v10 = vsel %vm589_vm10, %v1455_v58, 0.0  ;;  %v1457_v11 = vpop.eup %1456 }
 0x4a1   : > { %902 = vadd.xlane.f32.xlu0 %v901_v10  ;;  %v802_v19 = vsel %vm589_vm10, %v1457_v11, 0.0 }
 0x4a2   : > { %1458 = vpow2.f32 %v699_v9 }
 0x4a4   : > { %v912_v29 = vpop.permute.xlu2 %911 }
 0x4a5   : > { %v894_v14 = vpop.xlane.xlu1 %893 }
 0x4a6   : > { %v896_v15 = vsub.f32 %v888_v54, %v894_v14 }
 0x4a8   : > { %v1459_v16 = vpop.eup %1458  ;;  %v899_v18 = vmul.f32 1.442695, %v896_v15 }
 0x4a9   : > { %803 = vadd.xlane.f32.xlu0 %v802_v19  ;;  %v703_v20 = vsel %vm589_vm10, %v1459_v16, 0.0 }
 0x4aa   : > { %1460 = vpow2.f32 %v899_v18  ;;  %704 = vadd.xlane.f32.xlu2 %v703_v20  ;;  %v1433_v18 = vld [vmem:[%s1809_s6] ss:$0 sm:$0xff] }
 0x4ab   : > { %1462 = vpow2.f32 %v800_v21 }
 0x4b0   : > { %v1461_v22 = vpop.eup %1460 }
 0x4b1   : > { %v904_v23 = vsel %vm593_vm11, %v1461_v22, 0.0  ;;  %v1463_v24 = vpop.eup %1462 }
 0x4b2   : > { %905 = vadd.xlane.f32.xlu0 %v904_v23  ;;  %v805_v25 = vsel %vm593_vm11, %v1463_v24, 0.0 }
 0x4ba   : > { %806 = vadd.xlane.f32.xlu0 %v805_v25 }
 0x4bd   : > { %v716_v27 = vpop.permute.xlu1 %715 }
 0x4be   : > { %1305 = vmatpush.msk.msra.mxu2 %vm624_vm12, %v716_v27 }
 0x4c0   : > { %741 = vmatpush.msra.mxu2 %v714_v26 }
 0x4c2   : > { %812 = vrot.lane.b32.xlu2 %v1627_v56, %s1503_s20 }
 0x4c5   : > { %v914_v28 = vpop.permute.xlu1 %913 }
 0x4c6   : > { %1319 = vmatpush.msk.msrb.mxu2 %vm624_vm12, %v914_v28 }
 0x4c8   : > { %939 = vmatpush.msrb.mxu2 %v912_v29 }
 0x4cd   : > { %v815_v30 = vpop.permute.xlu1 %814 }
 0x4ce   : > { %1312 = vmatpush.msk.msrb.mxu1 %vm624_vm12, %v815_v30 }
 0x50c   : > { %v708_v31 = vpop.xlane.xlu0 %707 }
 0x514   : > { %v903_v32 = vpop.xlane.xlu0 %902 }
 0x51c   : > { %v804_v33 = vpop.xlane.xlu0 %803 }
 0x51d   : > { %1464 = vrcp.f32 %v804_v33  ;;  %v705_v34 = vpop.xlane.xlu2 %704  ;;  %v1381_v33 = vld [vmem:[%s1812_s9 + $0x8] sm:$0xff] }
 0x51e   : > { %1466 = vrcp.f32 %v705_v34 }
 0x51f   : > { %1468 = vrcp.f32 %v708_v31 }
 0x520   : > { %1470 = vrcp.f32 %v903_v32 }
 0x523   : > { %v1465_v35 = vpop.eup %1464 }
 0x524   : > { %v1467_v36 = vpop.eup %1466  ;;  %v810_v37 = vmul.f32 %v1465_v35, %v1457_v11 }
 0x525   : > { %v711_v39 = vmul.f32 %v1467_v36, %v1459_v16  ;;  %v813_v56 = vpop.permute.xlu2 %812  ;;  %v906_v40 = vpop.xlane.xlu0 %905 }
 0x526   : > { %840 = vmatpush.msrb.mxu1 %v813_v56  ;;  %v1469_v41 = vpop.eup %1468 }
 0x527   : > { %1306 = vmatmul.msk.f32.vlgmr.msra.gmra.mxu2 %vm589_vm10, %v711_v39  ;;  %1313 = vmatmul.msk.f32.vlgmr.msrb.gmra.mxu1 %vm589_vm10, %v810_v37  ;;  %v712_v43 = vmul.f32 %v1469_v41, %v1696_v0  ;;  %v1471_v45 = vpop.eup %1470  ;;  %v1380_v37 = vld [vmem:[%s1812_s9] sm:$0xff] }
 0x528   : > { %v909_v47 = vmul.f32 %v1471_v45, %v1455_v58  ;;  %1105 = vmatpush.bf16.msra.mxu1 %v1381_v33 }
 0x52c   : > { %1106 = vmatpush.bf16.msra.mxu1 %v1380_v37 }
 0x52d   : > { %v807_v42 = vpop.xlane.xlu0 %806 }
 0x52e   : > { %1472 = vrcp.f32 %v807_v42 }
 0x52f   : > { %1307 = vmatmul.msk.f32.gmra.mxu2 %vm589_vm10, %v712_v43  ;;  %1474 = vrcp.f32 %v906_v40 }
 0x534   : > { %v1473_v46 = vpop.eup %1472 }
 0x535   : > { %v811_v48 = vmul.f32 %v1473_v46, %v1463_v24  ;;  %v1475_v49 = vpop.eup %1474 }
 0x536   : > { %v910_v50 = vmul.f32 %v1475_v49, %v1461_v22 }
 0x537   : > { %1314 = vmatmul.msk.f32.gmra.mxu1 %vm589_vm10, %v811_v48  ;;  %1320 = vmatmul.msk.f32.vlgmr.msrb.gmra.mxu2 %vm589_vm10, %v909_v47 }
 0x53f   : > { %1321 = vmatmul.msk.f32.gmra.mxu2 %vm589_vm10, %v910_v50 }
 0x5a4   : > { %v842_v52 = vpop.f32.mrf.mxu1 }
 0x5aa   : > { %v743_v51 = vpop.f32.mrf.mxu2 }
 0x5b2   : > { %v746_v53 = vpop.f32.mrf.mxu2 }
 0x5b3   : > { %v1415_v54 = vpack.i.bf16 %v746_v53, %v743_v51 }
 0x5b4   : > { %v845_v55 = vpop.f32.mrf.mxu1 }
 0x5b5   : > { %v1420_v57 = vpack.i.bf16 %v845_v55, %v842_v52  ;;  %1416 = vrot.lane.b32.xlu1 %v1415_v54, %s1504_s21 }
 0x5b7   : > { %1421 = vrot.lane.b32.xlu0 %v1420_v57, %s1505_s22 }
 0x5ba   : > { %v941_v59 = vpop.f32.mrf.mxu2 }
 0x5c2   : > { %v944_v60 = vpop.f32.mrf.mxu2 }
 0x5c3   : > { %v1425_v61 = vpack.i.bf16 %v944_v60, %v941_v59  ;;  %v1435_v59 = vld [vmem:[%s1811_s8] ss:$0 sm:$0xff] }
 0x5c5   : > { %1426 = vrot.lane.b32.xlu2 %v1425_v61, %s1506_s23 }
 0x61f   : > { %v1427_v2 = vpop.permute.xlu2 %1426 }
 0x620   : > { %v1429_v10 = vunpack.i.h.bf16 %v1427_v2  ;;  %v1428_v11 = vunpack.i.l.bf16 %v1427_v2 }
 0x627   : > { %v1417_v0 = vpop.permute.xlu1 %1416 }
 0x628   : > { %v1419_v3 = vunpack.i.h.bf16 %v1417_v0  ;;  %v1418_v5 = vunpack.i.l.bf16 %v1417_v0 }
 0x629   : > { %v1422_v6 = vpop.permute.xlu0 %1421 }
 0x62a   : > { %v972_v7 = vsel %vm555_vm9, %v1683_v44, %v1419_v3  ;;  %v971_v8 = vsel %vm555_vm9, %v1680_v38, %v1418_v5  ;;  %v1424_v58 = vunpack.i.h.bf16 %v1422_v6  ;;  %v1423_v9 = vunpack.i.l.bf16 %v1422_v6  ;;  %v1389_v3 = vld [vmem:[%s1814_s11 + $0x38] sm:$0xff]  ;;  %v1388_v5 = vld [vmem:[%s1814_s11 + $0x30] sm:$0xff]  ;;  %v1387_v6 = vld [vmem:[%s1814_s11 + $0x28] sm:$0xff] }
 0x62b   : > { %1200 = vmatpush.bf16.msra.mxu3 %v1389_v3 }
 0x62c   : > { %v974_v13 = vsel %vm973_vm13, %v971_v8, %v1423_v9  ;;  %v975_v14 = vsel %vm973_vm13, %v972_v7, %v1424_v58  ;;  %v1386_v7 = vld [vmem:[%s1814_s11 + $0x20] sm:$0xff]  ;;  %v1385_v8 = vld [vmem:[%s1814_s11 + $0x18] sm:$0xff]  ;;  %v1384_v58 = vld [vmem:[%s1814_s11 + $0x10] sm:$0xff] }
 0x62d   : > { %v977_v15 = vsel %vm976_vm14, %v974_v13, %v1428_v11  ;;  %v978_v16 = vsel %vm976_vm14, %v975_v14, %v1429_v10  ;;  %v1383_v9 = vld [vmem:[%s1814_s11 + $0x8] sm:$0xff]  ;;  %v1436_v10 = vld [vmem:[%s1813_s10] ss:$0 sm:$0xff] }
 0x62e   : > { %v979_v17 = vpack.c.bf16 %v978_v16, %v977_v15  ;;  %v1382_v13 = vld [vmem:[%s1814_s11] sm:$0xff] }
 0x62f   : > { %1201 = vmatpush.bf16.msra.mxu3 %v1388_v5 }
 0x630   : > { %1330 = vmatmul.msk.bf16.vlgmr.msra.gmra.mxu0 %vm448_vm0, %v979_v17 }
 0x633   : > { %1202 = vmatpush.bf16.msra.mxu3 %v1387_v6 }
 0x637   : > { %1203 = vmatpush.bf16.msra.mxu3 %v1386_v7 }
 0x63b   : > { %1204 = vmatpush.bf16.msra.mxu3 %v1385_v8 }
 0x63f   : > { %1205 = vmatpush.bf16.msra.mxu3 %v1384_v58 }
 0x643   : > { %1206 = vmatpush.bf16.msra.mxu3 %v1383_v9 }
 0x647   : > { %1207 = vmatpush.bf16.msra.mxu3 %v1382_v13 }
 0x6ad   : > { %v1012_v19 = vpop.f32.mrf.mxu0 }
 0x6ae   : > { %v1013_v44 = vadd.f32 %v1433_v18, %v1012_v19 }
 0x6b0   : > { %v1732_v20 = vadd.f32 %v1013_v44, %v1593_v1 }
 0x6b2   : > { %v1021_v38 = vsel %vm448_vm0, %v1732_v20, 0.0 }
 0x6b3   : > { %1022 = vadd.xlane.f32.xlu1 %v1021_v38 }
 0x6b5   : > { %v1014_v21 = vpop.f32.mrf.mxu0 }
 0x6b6   : > { %v1015_v22 = vadd.f32 %v1433_v18, %v1014_v21 }
 0x6b8   : > { %v1737_v23 = vadd.f32 %v1015_v22, %v1597_v4 }
 0x6ba   : > { %v1024_v24 = vsel %vm452_vm1, %v1737_v23, 0.0 }
 0x6bb   : > { %1025 = vadd.xlane.f32.xlu2 %v1024_v24 }
 0x726   : > { %v1023_v25 = vpop.xlane.xlu1 %1022 }
 0x727   : > { %v1027_v26 = vmul.f32 %v1023_v25, %v1601_v12 }
 0x729   : > { %v1029_v27 = vsub.f32 %v1732_v20, %v1027_v26 }
 0x72b   : > { %v1031_v1 = vmul.f32 %v1029_v27, %v1029_v27 }
 0x72d   : > { %v1033_v28 = vsel %vm448_vm0, %v1031_v1, 0.0 }
 0x72e   : > { %v1026_v29 = vpop.xlane.xlu2 %1025  ;;  %1034 = vadd.xlane.f32.xlu0 %v1033_v28 }
 0x72f   : > { %v1028_v30 = vmul.f32 %v1026_v29, %v1601_v12 }
 0x731   : > { %v1030_v31 = vsub.f32 %v1737_v23, %v1028_v30 }
 0x733   : > { %v1032_v4 = vmul.f32 %v1030_v31, %v1030_v31 }
 0x735   : > { %v1036_v32 = vsel %vm452_vm1, %v1032_v4, 0.0 }
 0x736   : > { %1037 = vadd.xlane.f32.xlu1 %v1036_v32 }
 0x7a1   : > { %v1035_v34 = vpop.xlane.xlu0 %1034 }
 0x7a2   : > { %v1039_v35 = vmul.f32 %v1035_v34, %v1601_v12  ;;  %v1437_v34 = vld [vmem:[%s1815_s12] ss:$0 sm:$0xff] }
 0x7a4   : > { %v1041_v36 = vadd.f32 1e-05, %v1039_v35 }
 0x7a6   : > { %1476 = vrsqrt.f32 %v1041_v36  ;;  %vm1049_vm2 = vweird.f32 %v1041_v36 }
 0x7a9   : > { %v1038_v39 = vpop.xlane.xlu1 %1037 }
 0x7aa   : > { %v1040_v56 = vmul.f32 %v1038_v39, %v1601_v12  ;;  %v1434_v12 = vld [vmem:[%s1810_s7] ss:$0 sm:$0xff] }
 0x7ac   : > { %v1477_v40 = vpop.eup %1476  ;;  %v1042_v41 = vadd.f32 1e-05, %v1040_v56 }
 0x7ad   : > { %v1044_v42 = vmul.f32 %v1477_v40, %v1041_v36  ;;  %vm1050_vm15 = vweird.f32 %v1477_v40 }
 0x7ae   : > { %1478 = vrsqrt.f32 %v1042_v41  ;;  %vm1051_vm3 = vmor %vm1049_vm2, %vm1050_vm15  ;;  %vm1059_vm5 = vweird.f32 %v1042_v41 }
 0x7af   : > { %v1045_v43 = vmul.f32 %v1477_v40, %v1044_v42 }
 0x7b1   : > { %v1046_v45 = vmul.f32 0.5, %v1045_v43 }
 0x7b3   : > { %v1047_v46 = vsub.f32 1.5, %v1046_v45 }
 0x7b4   : > { %v1479_v47 = vpop.eup %1478 }
 0x7b5   : > { %v1048_v48 = vmul.f32 %v1477_v40, %v1047_v46  ;;  %v1054_v49 = vmul.f32 %v1479_v47, %v1042_v41  ;;  %vm1060_vm4 = vweird.f32 %v1479_v47 }
 0x7b6   : > { %vm1061_vm6 = vmor %vm1059_vm5, %vm1060_vm4 }
 0x7b7   : > { %v1055_v50 = vmul.f32 %v1479_v47, %v1054_v49  ;;  %v1052_v51 = vsel %vm1051_vm3, %v1477_v40, %v1048_v48 }
 0x7b8   : > { %v1063_v54 = vmul.f32 %v1052_v51, %v1029_v27 }
 0x7b9   : > { %v1056_v52 = vmul.f32 0.5, %v1055_v50 }
 0x7ba   : > { %v1068_v60 = vmul.f32 %v1434_v12, %v1063_v54 }
 0x7bb   : > { %v1057_v53 = vsub.f32 1.5, %v1056_v52 }
 0x7bc   : > { %v1073_v63 = vadd.f32 %v1435_v59, %v1068_v60 }
 0x7bd   : > { %v1058_v55 = vmul.f32 %v1479_v47, %v1057_v53 }
 0x7bf   : > { %v1062_v57 = vsel %vm1061_vm6, %v1479_v47, %v1058_v55 }
 0x7c0   : > { %v1064_v61 = vmul.f32 %v1062_v57, %v1030_v31 }
 0x7c2   : > { %v1069_v62 = vmul.f32 %v1434_v12, %v1064_v61 }
 0x7c4   : > { %v1074_v0 = vadd.f32 %v1435_v59, %v1069_v62 }
 0x7c6   : > { %v1075_v2 = vpack.c.bf16 %v1074_v0, %v1073_v63 }
 0x7c8   : > { %1339 = vmatmul.msk.bf16.vlgmr.msra.gmra.mxu1 %vm448_vm0, %v1075_v2  ;;  %vm1219_vm0 = vcmask 254976  }
 0x845   : > { %v1108_v11 = vpop.f32.mrf.mxu1 }
 0x846   : > { %v1109_v14 = vadd.f32 %v1436_v10, %v1108_v11 }
 0x848   : > { %v1113_v15 = vmul.f32 %v1109_v14, %v1109_v14 }
 0x84a   : > { %v1115_v16 = vmul.f32 %v1113_v15, %v1109_v14 }
 0x84c   : > { %v1117_v17 = vmul.f32 0.044715, %v1115_v16 }
 0x84d   : > { %v1110_v18 = vpop.f32.mrf.mxu1 }
 0x84e   : > { %v1119_v19 = vadd.f32 %v1117_v17, %v1109_v14  ;;  %v1111_v44 = vadd.f32 %v1436_v10, %v1110_v18 }
 0x850   : > { %v1121_v38 = vmul.f32 0.7978846, %v1119_v19  ;;  %v1114_v21 = vmul.f32 %v1111_v44, %v1111_v44 }
 0x852   : > { %v1116_v22 = vmul.f32 %v1114_v21, %v1111_v44  ;;  %1480 = vtanh.f32 %v1121_v38 }
 0x854   : > { %v1118_v24 = vmul.f32 0.044715, %v1116_v22 }
 0x856   : > { %v1120_v25 = vadd.f32 %v1118_v24, %v1111_v44 }
 0x858   : > { %v1122_v26 = vmul.f32 0.7978846, %v1120_v25  ;;  %v1481_v27 = vpop.eup %1480 }
 0x859   : > { %v1125_v1 = vadd.f32 1.0, %v1481_v27 }
 0x85a   : > { %1482 = vtanh.f32 %v1122_v26 }
 0x85b   : > { %v1127_v29 = vmul.f32 0.5, %v1125_v1 }
 0x85d   : > { %v1129_v4 = vmul.f32 %v1127_v29, %v1109_v14 }
 0x860   : > { %v1483_v28 = vpop.eup %1482 }
 0x861   : > { %v1126_v30 = vadd.f32 1.0, %v1483_v28 }
 0x863   : > { %v1128_v31 = vmul.f32 0.5, %v1126_v30 }
 0x865   : > { %v1130_v32 = vmul.f32 %v1128_v31, %v1111_v44 }
 0x867   : > { %v1131_v33 = vpack.c.bf16 %v1130_v32, %v1129_v4 }
 0x869   : > { %1208 = vmatmul.bf16.vlgmr.msra.gmra.mxu3 %v1131_v33 }
 0x8ec   : > { %v1209_v35 = vpop.f32.mrf.mxu3 }
 0x8ed   : > { %v1210_v36 = vadd.f32 %v1437_v34, %v1209_v35 }
 0x8ef   : > { %v1214_v37 = vadd.f32 %v1210_v36, %v1732_v20 }
 0x8f1   : > { %v1216_v39 = vpack.c.bf16 %v1214_v37, %v1214_v37 }
 0x8f3   : > { %1218 = vst.msk [vmem:[%s440_s18] sm:$0xf] %vm452_vm1, %v1216_v39 }
 0x8f4   : > { %v1211_v56 = vpop.f32.mrf.mxu3 }
 0x8f5   : > { %v1212_v40 = vadd.f32 %v1437_v34, %v1211_v56 }
 0x8f7   : > { %v1215_v41 = vadd.f32 %v1212_v40, %v1737_v23 }
 0x8f9   : > { %v1217_v42 = vpack.c.bf16 %v1215_v41, %v1215_v41 }
 0x8fb   : > { %1220 = vst.msk [vmem:[%s440_s18 + $0x4] sm:$0x3] %vm1219_vm0, %v1217_v42 }
 0x8fc PF: > { %s23_s25 = sadd.s32 1, %s1490_s25  }
 0x8fd   : > { %p20_p4 = scmp.ge.s32.totalorder %s23_s25, 4  }
 0x8ff   :  { %22 = sbr.rel (!%p20_p4) target bundleno = 1 (0x1), region = 102 }

// kernel: fwd.19
= control target key start
LH: loop header
LB: loop body
LE: loop exit
PB: predicated region body
PF: predicated region fallthrough
CT: control target
= control target key end

     0   :  { %s392_s12 = smov 0   ;;  %s436_s0 = inlined_call_operand.vmem [shape: bf16[48,32], index: 0, kind: input, shape index: {}]   ;;  %s437_s1 = inlined_call_operand.vmem [shape: f32[1,32], index: 1, kind: input, shape index: {}]   ;;  %s438_s2 = inlined_call_operand.vmem [shape: f32[1,32], index: 2, kind: input, shape index: {}]   ;;  %s439_s3 = inlined_call_operand.vmem [shape: bf16[48,32], index: 3, kind: output, shape index: {}]  }
   0x1 LB: > { %s331_s13 = sadd.s32 4294967295, %s369_s12   ;;  %p335_p0 = scmp.ge.s32.totalorder %s369_s12, 1  ;;  %s369_s12 = sphi %s392_s12, %s13_s12  }
   0x2   : > { %p138_p1 = scmp.lt.s32.totalorder %s369_s12, 3 }
   0x4   : > { %p139_p2 = pnand %p335_p0, %p138_p1 }
   0x5   : > { %s162_s14 = smul.u32 (!%p139_p2), 3, %s331_s13 }
   0x6   : > { %142 = sbr.rel (%p139_p2) target bundleno = 304 (0x130), region = 32 }
   0x7   : > { %p163_p3 = scmp.lt.s32.totalorder (!%p139_p2), %s162_s14, 5 }
   0xb   : > { %s441_s14 = smov (!%p163_p3, %s162_s14), 5  ;;  %vm182_vm0 = vcmask 261120   ;;  %v371_v8 = vmov 32.0   ;;  %v353_v47 = vld [vmem:[%s437_s1] ss:$0 sm:$0xff]  ;;  %vm271_vm6 = vcmask 257024  }
   0xc   : > { %s336_s15 = sshll.u32 %s441_s14, 2  ;;  %355 = vrcp.f32 %v371_v8  ;;  %v354_v50 = vld [vmem:[%s438_s2] ss:$0 sm:$0xff] }
   0xd   : > { %s166_s18 = scalar_lea.vmem %s436_s0, %s336_s15  ;;  %s172_s25 = scalar_lea.vmem %s439_s3, %s336_s15 }
   0xe   : > { %v341_v0 = vld [vmem:[%s166_s18] sm:$0xff]   ;;  %v176_v1 = vld [vmem:[%s166_s18 + $0x8] sm:$0xf] }
   0xf   : > { %v342_v2 = vunpack.c.l.bf16 %v341_v0  ;;  %v179_v3 = vunpack.c.l.bf16 %v176_v1  ;;  %v343_v6 = vunpack.c.h.bf16 %v341_v0 }
  0x11   : > { %v183_v4 = vsel %vm182_vm0, %v342_v2, 0.0  ;;  %v189_v5 = vsel %vm182_vm0, %v179_v3, 0.0  ;;  %v186_v7 = vsel %vm182_vm0, %v343_v6, 0.0 }
  0x12   : > { %184 = vadd.xlane.f32.xlu0 %v183_v4  ;;  %190 = vadd.xlane.f32.xlu1 %v189_v5  ;;  %v356_v9 = vpop.eup %355 }
  0x13   : > { %v193_v10 = vmul.f32 32.0, %v356_v9  ;;  %vm197_vm1 = vweird.f32 %v356_v9 }
  0x15   : > { %v194_v11 = vsub.f32 1.0, %v193_v10 }
  0x17   : > { %v195_v12 = vmul.f32 %v356_v9, %v194_v11 }
  0x19   : > { %v196_v13 = vadd.f32 %v356_v9, %v195_v12 }
  0x1a   : > { %187 = vadd.xlane.f32.xlu0 %v186_v7 }
  0x1b   : > { %v198_v14 = vsel %vm197_vm1, %v356_v9, %v196_v13 }
  0x85   : > { %v185_v15 = vpop.xlane.xlu0 %184  ;;  %v191_v19 = vpop.xlane.xlu1 %190 }
  0x86   : > { %v199_v16 = vmul.f32 %v198_v14, %v185_v15  ;;  %v201_v23 = vmul.f32 %v198_v14, %v191_v19 }
  0x88   : > { %v202_v17 = vsub.f32 %v342_v2, %v199_v16  ;;  %v412_v25 = vsub.f32 %v179_v3, %v201_v23 }
  0x8a   : > { %v205_v18 = vmul.f32 %v202_v17, %v202_v17  ;;  %v207_v28 = vmul.f32 %v412_v25, %v412_v25 }
  0x8c   : > { %v208_v20 = vsel %vm182_vm0, %v205_v18, 0.0  ;;  %v214_v29 = vsel %vm182_vm0, %v207_v28, 0.0 }
  0x8d   : > { %209 = vadd.xlane.f32.xlu1 %v208_v20  ;;  %v188_v21 = vpop.xlane.xlu0 %187 }
  0x8e   : > { %v200_v22 = vmul.f32 %v198_v14, %v188_v21 }
  0x90   : > { %v203_v24 = vsub.f32 %v343_v6, %v200_v22 }
  0x92   : > { %v206_v26 = vmul.f32 %v203_v24, %v203_v24 }
  0x94   : > { %v211_v27 = vsel %vm182_vm0, %v206_v26, 0.0 }
  0x95   : > { %212 = vadd.xlane.f32.xlu2 %v211_v27 }
  0x9d   : > { %215 = vadd.xlane.f32.xlu2 %v214_v29 }
 0x100   : > { %v210_v30 = vpop.xlane.xlu1 %209 }
 0x101   : > { %v217_v31 = vmul.f32 %v210_v30, %v198_v14 }
 0x103   : > { %v220_v32 = vadd.f32 1e-05, %v217_v31 }
 0x105   : > { %357 = vrsqrt.f32 %v220_v32  ;;  %vm229_vm3 = vweird.f32 %v220_v32 }
 0x108   : > { %v213_v33 = vpop.xlane.xlu2 %212 }
 0x109   : > { %v218_v34 = vmul.f32 %v213_v33, %v198_v14 }
 0x10b   : > { %v358_v35 = vpop.eup %357  ;;  %v221_v36 = vadd.f32 1e-05, %v218_v34 }
 0x10c   : > { %v224_v37 = vmul.f32 %v358_v35, %v220_v32  ;;  %vm230_vm2 = vweird.f32 %v358_v35 }
 0x10d   : > { %359 = vrsqrt.f32 %v221_v36  ;;  %vm231_vm4 = vmor %vm229_vm3, %vm230_vm2  ;;  %vm239_vm7 = vweird.f32 %v221_v36 }
 0x10e   : > { %v225_v38 = vmul.f32 %v358_v35, %v224_v37 }
 0x110   : > { %v226_v39 = vmul.f32 0.5, %v225_v38  ;;  %v216_v40 = vpop.xlane.xlu2 %215 }
 0x111   : > { %v219_v41 = vmul.f32 %v216_v40, %v198_v14 }
 0x112   : > { %v227_v42 = vsub.f32 1.5, %v226_v39 }
 0x113   : > { %v360_v43 = vpop.eup %359  ;;  %v222_v44 = vadd.f32 1e-05, %v219_v41 }
 0x114   : > { %v228_v45 = vmul.f32 %v358_v35, %v227_v42  ;;  %v234_v46 = vmul.f32 %v360_v43, %v221_v36  ;;  %vm240_vm5 = vweird.f32 %v360_v43 }
 0x115   : > { %361 = vrsqrt.f32 %v222_v44  ;;  %vm241_vm8 = vmor %vm239_vm7, %vm240_vm5  ;;  %vm249_vm10 = vweird.f32 %v222_v44 }
 0x116   : > { %v232_v48 = vsel %vm231_vm4, %v358_v35, %v228_v45  ;;  %v235_v49 = vmul.f32 %v360_v43, %v234_v46 }
 0x117   : > { %v253_v51 = vmul.f32 %v232_v48, %v202_v17 }
 0x118   : > { %v236_v52 = vmul.f32 0.5, %v235_v49 }
 0x119   : > { %v259_v53 = vmul.f32 %v353_v47, %v253_v51 }
 0x11a   : > { %v237_v54 = vsub.f32 1.5, %v236_v52 }
 0x11b   : > { %v362_v55 = vpop.eup %361  ;;  %v265_v56 = vadd.f32 %v354_v50, %v259_v53 }
 0x11c   : > { %v238_v57 = vmul.f32 %v360_v43, %v237_v54  ;;  %v244_v58 = vmul.f32 %v362_v55, %v222_v44  ;;  %vm250_vm9 = vweird.f32 %v362_v55 }
 0x11d   : > { %v268_v59 = vpack.c.bf16 %v265_v56, %v265_v56  ;;  %vm251_vm11 = vmor %vm249_vm10, %vm250_vm9 }
 0x11e   : > { %v242_v60 = vsel %vm241_vm8, %v360_v43, %v238_v57  ;;  %v245_v61 = vmul.f32 %v362_v55, %v244_v58 }
 0x11f   : > { %272 = vst.msk [vmem:[%s172_s25] sm:$0xf] %vm271_vm6, %v268_v59  ;;  %v254_v62 = vmul.f32 %v242_v60, %v203_v24 }
 0x120   : > { %v246_v63 = vmul.f32 0.5, %v245_v61 }
 0x121   : > { %v260_v0 = vmul.f32 %v353_v47, %v254_v62 }
 0x122   : > { %v247_v1 = vsub.f32 1.5, %v246_v63 }
 0x123   : > { %v266_v2 = vadd.f32 %v354_v50, %v260_v0 }
 0x124   : > { %v248_v3 = vmul.f32 %v362_v55, %v247_v1 }
 0x125   : > { %v269_v4 = vpack.c.bf16 %v266_v2, %v266_v2 }
 0x126   : > { %v252_v5 = vsel %vm251_vm11, %v362_v55, %v248_v3 }
 0x127   : > { %273 = vst.msk [vmem:[%s172_s25 + $0x4] sm:$0xf] %vm271_vm6, %v269_v4  ;;  %v255_v6 = vmul.f32 %v252_v5, %v412_v25 }
 0x129   : > { %v261_v7 = vmul.f32 %v353_v47, %v255_v6 }
 0x12b   : > { %v267_v8 = vadd.f32 %v354_v50, %v261_v7 }
 0x12d   : > { %v270_v9 = vpack.c.bf16 %v267_v8, %v267_v8 }
 0x12f   : > { %274 = vst.msk [vmem:[%s172_s25 + $0x8] sm:$0xf] %vm271_vm6, %v270_v9 }
 0x130 PF: > { %s13_s12 = sadd.s32 1, %s369_s12  }
 0x131   : > { %p10_p4 = scmp.ge.s32.totalorder %s13_s12, 4  }
 0x133   :  { %12 = sbr.rel (!%p10_p4) target bundleno = 1 (0x1), region = 62 }

// kernel: fwd.18
= control target key start
LH: loop header
LB: loop body
LE: loop exit
PB: predicated region body
PF: predicated region fallthrough
CT: control target
= control target key end

     0   :  { %s1895_s29 = smov 0   ;;  %s2239_s0 = inlined_call_operand.vmem [shape: bf16[2,24,32], index: 0, kind: input, shape index: {}]   ;;  %s2240_s1 = inlined_call_operand.vmem [shape: f32[24,32], index: 1, kind: input, shape index: {}]   ;;  %s2241_s2 = inlined_call_operand.vmem [shape: f32[1,32], index: 2, kind: input, shape index: {}]   ;;  %s2242_s3 = inlined_call_operand.vmem [shape: f32[1,32], index: 3, kind: input, shape index: {}]   ;;  %s2243_s4 = inlined_call_operand.vmem [shape: bf16[32,96], index: 4, kind: input, shape index: {}]   ;;  %s2244_s5 = inlined_call_operand.vmem [shape: f32[1,96], index: 5, kind: input, shape index: {}]   ;;  %s2245_s6 = inlined_call_operand.vmem [shape: bf16[32,32], index: 6, kind: input, shape index: {}]   ;;  %s2246_s7 = inlined_call_operand.vmem [shape: f32[1,32], index: 7, kind: input, shape index: {}]   ;;  %s2247_s8 = inlined_call_operand.vmem [shape: f32[1,32], index: 8, kind: input, shape index: {}]   ;;  %s2248_s9 = inlined_call_operand.vmem [shape: f32[1,32], index: 9, kind: input, shape index: {}]   ;;  %s2249_s10 = inlined_call_operand.vmem [shape: bf16[32,128], index: 10, kind: input, shape index: {}]   ;;  %s2250_s11 = inlined_call_operand.vmem [shape: f32[1,128], index: 11, kind: input, shape index: {}]   ;;  %s2251_s12 = inlined_call_operand.vmem [shape: bf16[128,32], index: 12, kind: input, shape index: {}]   ;;  %s2252_s13 = inlined_call_operand.vmem [shape: f32[1,32], index: 13, kind: input, shape index: {}]   ;;  %s2253_s14 = inlined_call_operand.vmem [shape: bf16[2,24,32], index: 14, kind: output, shape index: {}]  }
   0x1 LB: > { %s1535_s30 = sadd.s32 4294967295, %s1803_s29   ;;  %p1539_p0 = scmp.ge.s32.totalorder %s1803_s29, 1  ;;  %s1803_s29 = sphi %s1895_s29, %s24_s29  }
   0x2   : > { %p412_p1 = scmp.lt.s32.totalorder %s1803_s29, 3 }
   0x4   : > { %p413_p2 = pnand %p1539_p0, %p412_p1 }
   0x5   : > { %p458_p3 = scmp.lt.s32.totalorder (!%p413_p2), %s1535_s30, 1  ;;  %s1806_s22 = smov (!%p413_p2), 96  }
   0x6   : > { %416 = sbr.rel (%p413_p2) target bundleno = 2056 (0x808), region = 76  ;;  %s1807_s23 = smov (!%p413_p2), 88  }
   0x7   : > { %s1808_s24 = smov (!%p413_p2), 120   ;;  %s1809_s25 = smov (!%p413_p2), 80  }
   0x8   : > { %s1810_s26 = smov (!%p413_p2), 72   ;;  %s1811_s27 = smov (!%p413_p2), 112  }
   0x9   : > { %s1812_s28 = smov (!%p413_p2), 104   ;;  %s1813_s16 = smov (!%p413_p2), 64  }
   0xa   : > { %s1814_s17 = smov (!%p413_p2), 56   ;;  %s1816_s19 = smov (!%p413_p2), 48  }
   0xb   : > { %s2255_s30 = smov (!%p458_p3, %s1535_s30), 1  ;;  %v477_v0 = vld [vmem:[%s2240_s1 + $0x10] sm:$0xff]  ;;  %v476_v3 = vld [vmem:[%s2240_s1 + $0x8] sm:$0xff]  ;;  %vm483_vm0 = vcmask 261120   ;;  %v475_v9 = vld [vmem:[%s2240_s1] sm:$0xff]  ;;  %v1805_v14 = vmov 32.0  }
   0xc   : > { %s1662_s15 = smul.u32 12, %s2255_s30  ;;  %1729 = vrcp.f32 %v1805_v14  ;;  %v1643_v36 = vld [vmem:[%s2243_s4 + $0x8] sm:$0xff]  ;;  %v1642_v37 = vld [vmem:[%s2243_s4] sm:$0xff]  ;;  %vm624_vm11 = vcmask 64512   ;;  %vm666_vm12 = vcmask 195584   ;;  %s1817_s20 = smov 8  }
   0xd   : > { %1660 = vmatpush.bf16.msra.mxu2 %v1643_v36  ;;  %603 = vmatpush.bf16.msra.mxu0 %v1643_v36  ;;  %v1721_v55 = vld [vmem:[%s2241_s2] ss:$0 sm:$0xff]  ;;  %s1818_s21 = smov 24   ;;  %vm1173_vm13 = vcmask 130048  }
   0xe   : > { %s462_s18 = scalar_lea.vmem %s2239_s0, %s1662_s15  ;;  %v1722_v59 = vld [vmem:[%s2242_s3] ss:$0 sm:$0xff] }
   0xf   : > { %v471_v1 = vld [vmem:[%s462_s18 + $0x8] sm:$0xf]  ;;  %v1657_v2 = vld [vmem:[%s462_s18] sm:$0xff]   ;;  %s1815_s18 = smov 40  }
  0x10   : > { %v474_v4 = vunpack.c.l.bf16 %v471_v1  ;;  %v1659_v5 = vunpack.c.h.bf16 %v1657_v2  ;;  %v1658_v7 = vunpack.c.l.bf16 %v1657_v2 }
  0x11   : > { %1661 = vmatpush.bf16.msra.mxu2 %v1642_v37  ;;  %604 = vmatpush.bf16.msra.mxu0 %v1642_v37 }
  0x12   : > { %v1917_v6 = vadd.f32 %v477_v0, %v474_v4  ;;  %v1919_v8 = vadd.f32 %v1659_v5, %v476_v3  ;;  %v1928_v12 = vadd.f32 %v1658_v7, %v475_v9  ;;  %v1730_v15 = vpop.eup %1729 }
  0x13   : > { %v494_v16 = vmul.f32 32.0, %v1730_v15  ;;  %vm498_vm1 = vweird.f32 %v1730_v15 }
  0x14   : > { %v490_v10 = vsel %vm483_vm0, %v1917_v6, 0.0  ;;  %v487_v11 = vsel %vm483_vm0, %v1919_v8, 0.0  ;;  %v484_v13 = vsel %vm483_vm0, %v1928_v12, 0.0 }
  0x15   : > { %491 = vadd.xlane.f32.xlu0 %v490_v10  ;;  %488 = vadd.xlane.f32.xlu1 %v487_v11  ;;  %v495_v17 = vsub.f32 1.0, %v494_v16 }
  0x17   : > { %v496_v18 = vmul.f32 %v1730_v15, %v495_v17 }
  0x19   : > { %v497_v19 = vadd.f32 %v1730_v15, %v496_v18 }
  0x1b   : > { %v1932_v20 = vsel %vm498_vm1, %v1730_v15, %v497_v19 }
  0x1d   : > { %485 = vadd.xlane.f32.xlu0 %v484_v13 }
  0x88   : > { %v492_v21 = vpop.xlane.xlu0 %491  ;;  %v489_v25 = vpop.xlane.xlu1 %488 }
  0x89   : > { %v502_v22 = vmul.f32 %v1932_v20, %v492_v21  ;;  %v501_v29 = vmul.f32 %v1932_v20, %v489_v25  ;;  %v1723_v21 = vld [vmem:[%s2244_s5] ss:$0 sm:$0xff] }
  0x8b   : > { %v505_v23 = vsub.f32 %v1917_v6, %v502_v22  ;;  %v1941_v31 = vsub.f32 %v1919_v8, %v501_v29 }
  0x8d   : > { %v508_v24 = vmul.f32 %v505_v23, %v505_v23  ;;  %v507_v34 = vmul.f32 %v1941_v31, %v1941_v31 }
  0x8f   : > { %v515_v26 = vsel %vm483_vm0, %v508_v24, 0.0  ;;  %v512_v35 = vsel %vm483_vm0, %v507_v34, 0.0 }
  0x90   : > { %516 = vadd.xlane.f32.xlu1 %v515_v26  ;;  %v486_v27 = vpop.xlane.xlu0 %485 }
  0x91   : > { %v500_v28 = vmul.f32 %v1932_v20, %v486_v27 }
  0x93   : > { %v503_v30 = vsub.f32 %v1928_v12, %v500_v28 }
  0x95   : > { %v506_v32 = vmul.f32 %v503_v30, %v503_v30 }
  0x97   : > { %v509_v33 = vsel %vm483_vm0, %v506_v32, 0.0 }
  0x98   : > { %510 = vadd.xlane.f32.xlu2 %v509_v33 }
  0xa0   : > { %513 = vadd.xlane.f32.xlu2 %v512_v35 }
 0x103   : > { %v517_v38 = vpop.xlane.xlu1 %516 }
 0x104   : > { %v520_v39 = vmul.f32 %v517_v38, %v1932_v20 }
 0x106   : > { %v523_v40 = vadd.f32 1e-05, %v520_v39 }
 0x108   : > { %1731 = vrsqrt.f32 %v523_v40  ;;  %vm550_vm3 = vweird.f32 %v523_v40 }
 0x10b   : > { %v511_v41 = vpop.xlane.xlu2 %510 }
 0x10c   : > { %v518_v42 = vmul.f32 %v511_v41, %v1932_v20 }
 0x10e   : > { %v1732_v43 = vpop.eup %1731  ;;  %v521_v44 = vadd.f32 1e-05, %v518_v42 }
 0x10f   : > { %v545_v45 = vmul.f32 %v1732_v43, %v523_v40  ;;  %vm551_vm2 = vweird.f32 %v1732_v43 }
 0x110   : > { %1733 = vrsqrt.f32 %v521_v44  ;;  %vm552_vm4 = vmor %vm550_vm3, %vm551_vm2  ;;  %vm530_vm6 = vweird.f32 %v521_v44 }
 0x111   : > { %v546_v46 = vmul.f32 %v1732_v43, %v545_v45 }
 0x113   : > { %v547_v47 = vmul.f32 0.5, %v546_v46  ;;  %v514_v48 = vpop.xlane.xlu2 %513 }
 0x114   : > { %v519_v49 = vmul.f32 %v514_v48, %v1932_v20 }
 0x115   : > { %v548_v50 = vsub.f32 1.5, %v547_v47 }
 0x116   : > { %v1734_v51 = vpop.eup %1733  ;;  %v522_v52 = vadd.f32 1e-05, %v519_v49 }
 0x117   : > { %v549_v53 = vmul.f32 %v1732_v43, %v548_v50  ;;  %v525_v54 = vmul.f32 %v1734_v51, %v521_v44  ;;  %vm531_vm5 = vweird.f32 %v1734_v51 }
 0x118   : > { %1735 = vrsqrt.f32 %v522_v52  ;;  %vm532_vm7 = vmor %vm530_vm6, %vm531_vm5  ;;  %vm540_vm9 = vweird.f32 %v522_v52 }
 0x119   : > { %v553_v56 = vsel %vm552_vm4, %v1732_v43, %v549_v53  ;;  %v526_v57 = vmul.f32 %v1734_v51, %v525_v54 }
 0x11a   : > { %v556_v58 = vmul.f32 %v553_v56, %v505_v23 }
 0x11b   : > { %v527_v60 = vmul.f32 0.5, %v526_v57 }
 0x11c   : > { %v562_v61 = vmul.f32 %v1721_v55, %v556_v58 }
 0x11d   : > { %v528_v62 = vsub.f32 1.5, %v527_v60 }
 0x11e   : > { %v1736_v63 = vpop.eup %1735  ;;  %v568_v0 = vadd.f32 %v1722_v59, %v562_v61 }
 0x11f   : > { %v529_v1 = vmul.f32 %v1734_v51, %v528_v62  ;;  %v535_v2 = vmul.f32 %v1736_v63, %v522_v52  ;;  %vm541_vm8 = vweird.f32 %v1736_v63 }
 0x120   : > { %v570_v3 = vpack.c.bf16 %v568_v0, %v568_v0  ;;  %vm542_vm10 = vmor %vm540_vm9, %vm541_vm8 }
 0x121   : > { %v536_v4 = vmul.f32 %v1736_v63, %v535_v2  ;;  %v533_v5 = vsel %vm532_vm7, %v1734_v51, %v529_v1 }
 0x122   : > { %1551 = vmatmul.msk.bf16.vlgmr.msra.gmra.mxu2 %vm483_vm0, %v570_v3  ;;  %v554_v10 = vmul.f32 %v533_v5, %v503_v30 }
 0x123   : > { %v537_v7 = vmul.f32 0.5, %v536_v4 }
 0x124   : > { %v560_v15 = vmul.f32 %v1721_v55, %v554_v10 }
 0x125   : > { %v538_v9 = vsub.f32 1.5, %v537_v7 }
 0x126   : > { %v566_v17 = vadd.f32 %v1722_v59, %v560_v15 }
 0x127   : > { %v539_v11 = vmul.f32 %v1736_v63, %v538_v9 }
 0x129   : > { %v543_v13 = vsel %vm542_vm10, %v1736_v63, %v539_v11 }
 0x12a   : > { %v555_v14 = vmul.f32 %v543_v13, %v1941_v31 }
 0x12c   : > { %v561_v16 = vmul.f32 %v1721_v55, %v555_v14 }
 0x12e   : > { %v567_v18 = vadd.f32 %v1722_v59, %v561_v16 }
 0x130   : > { %v569_v19 = vpack.c.bf16 %v567_v18, %v566_v17 }
 0x132   : > { %1550 = vmatmul.msk.bf16.vlgmr.msra.gmra.mxu0 %vm483_vm0, %v569_v19 }
 0x1a5   : > { %v611_v22 = vpop.f32.mrf.mxu2 }
 0x1a6   : > { %v1968_v23 = vadd.f32 %v1723_v21, %v611_v22 }
 0x1a8   : > { %622 = vrot.lane.b32.xlu0 %v1968_v23, %s1806_s22 }
 0x1ad   : > { %v613_v24 = vpop.f32.mrf.mxu2 }
 0x1af   : > { %v606_v25 = vpop.f32.mrf.mxu0 }
 0x1b0   : > { %v1971_v26 = vadd.f32 %v1723_v21, %v606_v25  ;;  %754 = vrot.lane.b32.xlu0 %v1968_v23, %s1807_s23 }
 0x1b2   : > { %618 = vrot.lane.b32.xlu2 %v1971_v26, %s1806_s22 }
 0x1b7   : > { %v608_v27 = vpop.f32.mrf.mxu0 }
 0x1b8   : > { %v609_v28 = vadd.f32 %v1723_v21, %v608_v27  ;;  %744 = vrot.lane.b32.xlu0 %v1971_v26, %s1808_s24 }
 0x1ba   : > { %620 = vrot.lane.b32.xlu1 %v609_v28, %s1806_s22  ;;  %752 = vrot.lane.b32.xlu2 %v609_v28, %s1807_s23  ;;  %v1988_v29 = vpack.i.bf16 %v609_v28, %v1968_v23  ;;  %s1819_s22 = smov 16  }
 0x1c0   : > { %884 = vrot.lane.b32.xlu0 %v1968_v23, %s1809_s25 }
 0x1c2   : > { %750 = vrot.lane.b32.xlu1 %v1971_v26, %s1807_s23  ;;  %746 = vrot.lane.b32.xlu2 %v609_v28, %s1808_s24 }
 0x1c8   : > { %1012 = vrot.lane.b32.xlu0 %v609_v28, %s1810_s26 }
 0x1ca   : > { %748 = vrot.lane.b32.xlu1 %v1968_v23, %s1808_s24  ;;  %1014 = vrot.lane.b32.xlu2 %v1968_v23, %s1810_s26 }
 0x1d0   : > { %874 = vrot.lane.b32.xlu0 %v1971_v26, %s1811_s27 }
 0x1d2   : > { %882 = vrot.lane.b32.xlu1 %v609_v28, %s1809_s25  ;;  %880 = vrot.lane.b32.xlu2 %v1971_v26, %s1809_s25 }
 0x1d8   : > { %1006 = vrot.lane.b32.xlu0 %v609_v28, %s1812_s28 }
 0x1da   : > { %1010 = vrot.lane.b32.xlu1 %v1971_v26, %s1810_s26  ;;  %1004 = vrot.lane.b32.xlu2 %v1971_v26, %s1812_s28 }
 0x1e2   : > { %876 = vrot.lane.b32.xlu1 %v609_v28, %s1811_s27  ;;  %878 = vrot.lane.b32.xlu2 %v1968_v23, %s1811_s27 }
 0x1ea   : > { %1008 = vrot.lane.b32.xlu1 %v1968_v23, %s1812_s28  ;;  %700 = vrot.lane.b32.xlu2 %v1971_v26, %s1813_s16 }
 0x1f2   : > { %1687 = vrot.lane.b32.xlu1 %v1988_v29, %s1813_s16 }
 0x20c   : > { %v619_v30 = vpop.permute.xlu2 %618 }
 0x214   : > { %v753_v31 = vpop.permute.xlu2 %752 }
 0x21a   : > { %v623_v32 = vpop.permute.xlu0 %622 }
 0x21b   : > { %1552 = vmatpush.xpose.msk.msra.mxu1 %vm624_vm11, %v623_v32 }
 0x21c   : > { %v747_v33 = vpop.permute.xlu2 %746 }
 0x222   : > { %v755_v34 = vpop.permute.xlu0 %754 }
 0x223   : > { %1561 = vmatpush.xpose.msk.msra.mxu3 %vm624_vm11, %v755_v34 }
 0x224   : > { %v1015_v35 = vpop.permute.xlu2 %1014 }
 0x225   : > { %1579 = vmatpush.xpose.msk.msrb.mxu0 %vm624_vm11, %v1015_v35 }
 0x227   : > { %1562 = vmatpush.xpose.msk.msra.mxu3 %vm624_vm11, %v753_v31 }
 0x22a   : > { %v745_v36 = vpop.permute.xlu0 %744 }
 0x22c   : > { %v621_v37 = vpop.permute.xlu1 %620  ;;  %v881_v43 = vpop.permute.xlu2 %880 }
 0x22d   : > { %1553 = vmatpush.xpose.msk.msra.mxu1 %vm624_vm11, %v621_v37 }
 0x231   : > { %1554 = vmatpush.xpose.msk.msra.mxu1 %vm624_vm11, %v619_v30 }
 0x232   : > { %v885_v38 = vpop.permute.xlu0 %884 }
 0x234   : > { %v751_v39 = vpop.permute.xlu1 %750  ;;  %1555 = vmatmul.msk.f32.vlgmr.msra.gmra.mxu1 %vm624_vm11, %v1971_v26  ;;  %v1005_v46 = vpop.permute.xlu2 %1004 }
 0x235   : > { %1570 = vmatpush.xpose.msk.msrb.mxu1 %vm624_vm11, %v885_v38  ;;  %1563 = vmatpush.xpose.msk.msra.mxu3 %vm624_vm11, %v751_v39 }
 0x238   : > { %1564 = vmatmul.msk.f32.vlgmr.msra.gmra.mxu3 %vm624_vm11, %v745_v36 }
 0x23a   : > { %v1013_v40 = vpop.permute.xlu0 %1012 }
 0x23b   : > { %1580 = vmatpush.xpose.msk.msrb.mxu0 %vm624_vm11, %v1013_v40 }
 0x23c   : > { %v749_v41 = vpop.permute.xlu1 %748  ;;  %1556 = vmatmul.msk.f32.gmra.mxu1 %vm624_vm11, %v609_v28  ;;  %v879_v49 = vpop.permute.xlu2 %878 }
 0x240   : > { %1565 = vmatmul.msk.f32.gmra.mxu3 %vm624_vm11, %v747_v33 }
 0x242   : > { %v875_v44 = vpop.permute.xlu0 %874 }
 0x244   : > { %v883_v42 = vpop.permute.xlu1 %882  ;;  %1557 = vmatmul.msk.f32.gmra.mxu1 %vm624_vm11, %v1968_v23  ;;  %v701_v54 = vpop.permute.xlu2 %700 }
 0x245   : > { %1571 = vmatpush.xpose.msk.msrb.mxu1 %vm624_vm11, %v883_v42 }
 0x248   : > { %1566 = vmatmul.msk.f32.gmra.mxu3 %vm624_vm11, %v749_v41 }
 0x249   : > { %1572 = vmatpush.xpose.msk.msrb.mxu1 %vm624_vm11, %v881_v43 }
 0x24a   : > { %v1007_v48 = vpop.permute.xlu0 %1006 }
 0x24c   : > { %v1011_v45 = vpop.permute.xlu1 %1010  ;;  %1573 = vmatmul.msk.f32.vlgmr.msrb.gmra.mxu1 %vm624_vm11, %v875_v44 }
 0x24d   : > { %1581 = vmatpush.xpose.msk.msrb.mxu0 %vm624_vm11, %v1011_v45 }
 0x250   : > { %1582 = vmatmul.msk.f32.vlgmr.msrb.gmra.mxu0 %vm624_vm11, %v1005_v46 }
 0x254   : > { %v877_v47 = vpop.permute.xlu1 %876 }
 0x255   : > { %1574 = vmatmul.msk.f32.gmra.mxu1 %vm624_vm11, %v877_v47 }
 0x258   : > { %1583 = vmatmul.msk.f32.gmra.mxu0 %vm624_vm11, %v1007_v48 }
 0x25c   : > { %v1009_v50 = vpop.permute.xlu1 %1008 }
 0x25d   : > { %1575 = vmatmul.msk.f32.gmra.mxu1 %vm624_vm11, %v879_v49 }
 0x260   : > { %1584 = vmatmul.msk.f32.gmra.mxu0 %vm624_vm11, %v1009_v50 }
 0x264   : > { %v1688_v51 = vpop.permute.xlu1 %1687 }
 0x265   : > { %v1689_v52 = vunpack.i.l.bf16 %v1688_v51  ;;  %v1690_v53 = vunpack.i.h.bf16 %v1688_v51 }
 0x267   : > { %731 = vmatpush.msrb.mxu2 %v1689_v52 }
 0x269   : > { %732 = vmatpush.msrb.mxu2 %v1690_v53 }
 0x26b   : > { %733 = vmatpush.msrb.mxu2 %v701_v54 }
 0x2b1   : > { %v654_v55 = vpop.f32.mrf.mxu1 }
 0x2b2   : > { %v663_v56 = vmul.f32 0.35355338, %v654_v55 }
 0x2b4   : > { %v667_v57 = vsel %vm666_vm12, %v663_v56, -inf }
 0x2b5   : > { %668 = vmax.xlane.f32.xlu0 %v667_v57 }
 0x2b9   : > { %v657_v58 = vpop.f32.mrf.mxu1 }
 0x2ba   : > { %v664_v4 = vmul.f32 0.35355338, %v657_v58 }
 0x2bb   : > { %v785_v59 = vpop.f32.mrf.mxu3 }
 0x2bc   : > { %v794_v60 = vmul.f32 0.35355338, %v785_v59  ;;  %v670_v7 = vsel %vm666_vm12, %v664_v4, -inf }
 0x2be   : > { %v797_v61 = vsel %vm666_vm12, %v794_v60, -inf }
 0x2bf   : > { %798 = vmax.xlane.f32.xlu0 %v797_v61 }
 0x2c1   : > { %v660_v62 = vpop.f32.mrf.mxu1 }
 0x2c2   : > { %v2019_v63 = vmul.f32 0.35355338, %v660_v62 }
 0x2c3   : > { %v788_v16 = vpop.f32.mrf.mxu3 }
 0x2c4   : > { %v673_v0 = vsel %vm666_vm12, %v2019_v63, -inf  ;;  %v795_v17 = vmul.f32 0.35355338, %v788_v16 }
 0x2c5   : > { %674 = vmax.xlane.f32.xlu1 %v673_v0 }
 0x2c6   : > { %v800_v19 = vsel %vm666_vm12, %v795_v17, -inf }
 0x2c9   : > { %v915_v13 = vpop.f32.mrf.mxu1 }
 0x2ca   : > { %v2034_v18 = vmul.f32 0.35355338, %v915_v13 }
 0x2cb   : > { %v791_v25 = vpop.f32.mrf.mxu3 }
 0x2cc   : > { %v927_v21 = vsel %vm666_vm12, %v2034_v18, -inf  ;;  %v2044_v27 = vmul.f32 0.35355338, %v791_v25 }
 0x2cd   : > { %v1045_v1 = vpop.f32.mrf.mxu0 }
 0x2ce   : > { %v1054_v2 = vmul.f32 0.35355338, %v1045_v1  ;;  %v803_v28 = vsel %vm666_vm12, %v2044_v27, -inf }
 0x2d0   : > { %v1057_v3 = vsel %vm666_vm12, %v1054_v2, -inf }
 0x2d1   : > { %1058 = vmax.xlane.f32.xlu2 %v1057_v3 }
 0x2d2   : > { %v918_v22 = vpop.f32.mrf.mxu1 }
 0x2d3   : > { %v2039_v23 = vmul.f32 0.35355338, %v918_v22 }
 0x2d5   : > { %v1048_v5 = vpop.f32.mrf.mxu0  ;;  %v930_v24 = vsel %vm666_vm12, %v2039_v23, -inf }
 0x2d6   : > { %v2025_v9 = vmul.f32 0.35355338, %v1048_v5 }
 0x2d8   : > { %v1060_v14 = vsel %vm666_vm12, %v2025_v9, -inf }
 0x2d9   : > { %671 = vmax.xlane.f32.xlu2 %v670_v7 }
 0x2da   : > { %v921_v30 = vpop.f32.mrf.mxu1 }
 0x2db   : > { %v2048_v31 = vmul.f32 0.35355338, %v921_v30 }
 0x2dd   : > { %v1051_v10 = vpop.f32.mrf.mxu0  ;;  %v933_v32 = vsel %vm666_vm12, %v2048_v31, -inf }
 0x2de   : > { %v2027_v11 = vmul.f32 0.35355338, %v1051_v10  ;;  %1692 = vrot.lane.b32.xlu1 %v1988_v29, %s1814_s17 }
 0x2e0   : > { %v1063_v15 = vsel %vm666_vm12, %v2027_v11, -inf }
 0x2e1   : > { %1061 = vmax.xlane.f32.xlu2 %v1060_v14  ;;  %1064 = vmax.xlane.f32.xlu0 %v1063_v15 }
 0x2e9   : > { %801 = vmax.xlane.f32.xlu2 %v800_v19  ;;  %928 = vmax.xlane.f32.xlu0 %v927_v21 }
 0x2f1   : > { %931 = vmax.xlane.f32.xlu0 %v930_v24 }
 0x301   : > { %830 = vrot.lane.b32.xlu2 %v1971_v26, %s1814_s17 }
 0x308   : > { %804 = vmax.xlane.f32.xlu1 %v803_v28 }
 0x310   : > { %934 = vmax.xlane.f32.xlu1 %v933_v32 }
 0x328   : > { %v669_v33 = vpop.xlane.xlu0 %668 }
 0x329   : > { %v676_v34 = vsub.f32 %v663_v56, %v669_v33 }
 0x32b   : > { %v679_v35 = vmul.f32 1.442695, %v676_v34 }
 0x32d   : > { %1737 = vpow2.f32 %v679_v35 }
 0x332   : > { %v799_v38 = vpop.xlane.xlu0 %798 }
 0x333   : > { %v2052_v36 = vpop.eup %1737  ;;  %v806_v41 = vsub.f32 %v794_v60, %v799_v38 }
 0x334   : > { %v685_v37 = vsel %vm666_vm12, %v2052_v36, 0.0 }
 0x335   : > { %686 = vadd.xlane.f32.xlu1 %v685_v37  ;;  %v809_v44 = vmul.f32 1.442695, %v806_v41 }
 0x338   : > { %v675_v43 = vpop.xlane.xlu1 %674 }
 0x339   : > { %v678_v59 = vsub.f32 %v2019_v63, %v675_v43 }
 0x33b   : > { %v683_v62 = vmul.f32 1.442695, %v678_v59 }
 0x344   : > { %v1059_v39 = vpop.xlane.xlu2 %1058 }
 0x345   : > { %v1066_v40 = vsub.f32 %v1054_v2, %v1059_v39 }
 0x347   : > { %v1069_v42 = vmul.f32 1.442695, %v1066_v40 }
 0x349   : > { %1739 = vpow2.f32 %v1069_v42 }
 0x34a   : > { %1741 = vpow2.f32 %v809_v44 }
 0x34c   : > { %v672_v45 = vpop.xlane.xlu2 %671 }
 0x34d   : > { %v677_v47 = vsub.f32 %v664_v4, %v672_v45 }
 0x34e   : > { %1702 = vrot.lane.b32.xlu1 %v1988_v29, %s1815_s18 }
 0x34f   : > { %v2058_v46 = vpop.eup %1739  ;;  %v681_v51 = vmul.f32 1.442695, %v677_v47 }
 0x350   : > { %v1693_v48 = vpop.permute.xlu1 %1692  ;;  %v1075_v49 = vsel %vm666_vm12, %v2058_v46, 0.0  ;;  %v2062_v54 = vpop.eup %1741 }
 0x351   : > { %v1694_v50 = vunpack.i.l.bf16 %v1693_v48  ;;  %1076 = vadd.xlane.f32.xlu0 %v1075_v49  ;;  %v1695_v52 = vunpack.i.h.bf16 %v1693_v48  ;;  %1743 = vpow2.f32 %v681_v51  ;;  %v815_v55 = vsel %vm666_vm12, %v2062_v54, 0.0 }
 0x353   : > { %861 = vmatpush.msra.mxu2 %v1694_v50 }
 0x354   : > { %v1062_v53 = vpop.xlane.xlu2 %1061 }
 0x355   : > { %862 = vmatpush.msra.mxu2 %v1695_v52  ;;  %v1067_v1 = vsub.f32 %v2025_v9, %v1062_v53 }
 0x357   : > { %v2066_v57 = vpop.eup %1743  ;;  %v1071_v4 = vmul.f32 1.442695, %v1067_v1 }
 0x358   : > { %v688_v61 = vsel %vm666_vm12, %v2066_v57, 0.0 }
 0x359   : > { %816 = vadd.xlane.f32.xlu0 %v815_v55 }
 0x35c   : > { %v802_v56 = vpop.xlane.xlu2 %801 }
 0x35d   : > { %v807_v58 = vsub.f32 %v795_v17, %v802_v56  ;;  %v1065_v17 = vpop.xlane.xlu0 %1064 }
 0x35e   : > { %v1068_v32 = vsub.f32 %v2027_v11, %v1065_v17 }
 0x35f   : > { %v811_v60 = vmul.f32 1.442695, %v807_v58 }
 0x360   : > { %v1073_v35 = vmul.f32 1.442695, %v1068_v32 }
 0x361   : > { %1745 = vpow2.f32 %v811_v60  ;;  %689 = vadd.xlane.f32.xlu0 %v688_v61 }
 0x362   : > { %1747 = vpow2.f32 %v683_v62 }
 0x363   : > { %1749 = vpow2.f32 %v1071_v4 }
 0x364   : > { %v831_v0 = vpop.permute.xlu2 %830 }
 0x365   : > { %863 = vmatpush.msra.mxu2 %v831_v0  ;;  %v929_v19 = vpop.xlane.xlu0 %928 }
 0x366   : > { %v936_v21 = vsub.f32 %v2034_v18, %v929_v19 }
 0x367   : > { %v2072_v2 = vpop.eup %1745 }
 0x368   : > { %v818_v3 = vsel %vm666_vm12, %v2072_v2, 0.0  ;;  %v2076_v63 = vpop.eup %1747  ;;  %v939_v24 = vmul.f32 1.442695, %v936_v21 }
 0x369   : > { %819 = vadd.xlane.f32.xlu0 %v818_v3  ;;  %v691_v5 = vsel %vm666_vm12, %v2076_v63, 0.0  ;;  %v2080_v7 = vpop.eup %1749 }
 0x36a   : > { %v1078_v9 = vsel %vm666_vm12, %v2080_v7, 0.0 }
 0x36d   : > { %v932_v25 = vpop.xlane.xlu0 %931 }
 0x371   : > { %692 = vadd.xlane.f32.xlu0 %v691_v5 }
 0x378   : > { %1079 = vadd.xlane.f32.xlu1 %v1078_v9 }
 0x37b   : > { %v805_v10 = vpop.xlane.xlu1 %804 }
 0x37c   : > { %v808_v13 = vsub.f32 %v2044_v27, %v805_v10  ;;  %v937_v27 = vsub.f32 %v2039_v23, %v932_v25 }
 0x37e   : > { %v813_v14 = vmul.f32 1.442695, %v808_v13  ;;  %v941_v28 = vmul.f32 1.442695, %v937_v27 }
 0x380   : > { %1751 = vpow2.f32 %v813_v14 }
 0x381   : > { %1753 = vpow2.f32 %v939_v24 }
 0x383   : > { %v935_v22 = vpop.xlane.xlu1 %934 }
 0x384   : > { %v938_v38 = vsub.f32 %v2048_v31, %v935_v22 }
 0x385   : > { %1697 = vrot.lane.b32.xlu0 %v1988_v29, %s1816_s19 }
 0x386   : > { %v2086_v15 = vpop.eup %1751  ;;  %v943_v40 = vmul.f32 1.442695, %v938_v38  ;;  %v1645_v38 = vld [vmem:[%s2245_s6 + $0x8] sm:$0xff] }
 0x387   : > { %v821_v16 = vsel %vm666_vm12, %v2086_v15, 0.0  ;;  %v2095_v30 = vpop.eup %1753  ;;  %1214 = vmatpush.bf16.msra.mxu1 %v1645_v38 }
 0x388   : > { %822 = vadd.xlane.f32.xlu2 %v821_v16  ;;  %v945_v18 = vsel %vm666_vm12, %v2095_v30, 0.0 }
 0x3a0   : > { %960 = vrot.lane.b32.xlu2 %v1971_v26, %s1816_s19 }
 0x3a8   : > { %1090 = vrot.lane.b32.xlu2 %v1971_v26, %s1815_s18  ;;  %v687_v29 = vpop.xlane.xlu1 %686 }
 0x3a9   : > { %1755 = vrcp.f32 %v687_v29 }
 0x3aa   : > { %1757 = vpow2.f32 %v941_v28 }
 0x3ab   : > { %1759 = vpow2.f32 %v1073_v35 }
 0x3ac   : > { %1761 = vpow2.f32 %v943_v40 }
 0x3af   : > { %v1756_v33 = vpop.eup %1755  ;;  %946 = vadd.xlane.f32.xlu0 %v945_v18 }
 0x3b0   : > { %v697_v34 = vmul.f32 %v1756_v33, %v2052_v36  ;;  %v2102_v23 = vpop.eup %1757 }
 0x3b1   : > { %v948_v26 = vsel %vm666_vm12, %v2102_v23, 0.0  ;;  %v2106_v37 = vpop.eup %1759 }
 0x3b2   : > { %1558 = vmatmul.msk.f32.vlgmr.msrb.gmra.mxu2 %vm666_vm12, %v697_v34  ;;  %v1081_v11 = vsel %vm666_vm12, %v2106_v37, 0.0  ;;  %v2111_v44 = vpop.eup %1761 }
 0x3b3   : > { %v951_v45 = vsel %vm666_vm12, %v2111_v44, 0.0 }
 0x3b7   : > { %949 = vadd.xlane.f32.xlu0 %v948_v26 }
 0x3bf   : > { %1082 = vadd.xlane.f32.xlu0 %v1081_v11 }
 0x3c0   : > { %v1703_v39 = vpop.permute.xlu1 %1702 }
 0x3c1   : > { %v1704_v36 = vunpack.i.l.bf16 %v1703_v39  ;;  %v1705_v41 = vunpack.i.h.bf16 %v1703_v39  ;;  %v1644_v39 = vld [vmem:[%s2245_s6] sm:$0xff] }
 0x3c2   : > { %1215 = vmatpush.bf16.msra.mxu1 %v1644_v39 }
 0x3c3   : > { %1121 = vmatpush.msrb.mxu2 %v1704_v36 }
 0x3c4   : > { %v1077_v42 = vpop.xlane.xlu0 %1076 }
 0x3c5   : > { %1122 = vmatpush.msrb.mxu2 %v1705_v41 }
 0x3cc   : > { %v817_v43 = vpop.xlane.xlu0 %816 }
 0x3d1   : > { %952 = vadd.xlane.f32.xlu2 %v951_v45 }
 0x3d4   : > { %v690_v47 = vpop.xlane.xlu0 %689 }
 0x3d5   : > { %1763 = vrcp.f32 %v690_v47 }
 0x3db   : > { %v1764_v48 = vpop.eup %1763 }
 0x3dc   : > { %v820_v31 = vpop.xlane.xlu0 %819  ;;  %v698_v49 = vmul.f32 %v1764_v48, %v2066_v57 }
 0x3de   : > { %1559 = vmatmul.msk.f32.gmra.mxu2 %vm666_vm12, %v698_v49 }
 0x3e4   : > { %v693_v50 = vpop.xlane.xlu0 %692 }
 0x3e5   : > { %1765 = vrcp.f32 %v693_v50 }
 0x3e6   : > { %1767 = vrcp.f32 %v817_v43 }
 0x3e7   : > { %1769 = vrcp.f32 %v820_v31 }
 0x3eb   : > { %v1766_v51 = vpop.eup %1765 }
 0x3ec   : > { %v699_v52 = vmul.f32 %v1766_v51, %v2076_v63  ;;  %v1768_v53 = vpop.eup %1767 }
 0x3ed   : > { %v827_v55 = vmul.f32 %v1768_v53, %v2062_v54  ;;  %v1770_v59 = vpop.eup %1769  ;;  %v1080_v54 = vpop.xlane.xlu1 %1079 }
 0x3ee   : > { %1560 = vmatmul.msk.f32.gmra.mxu2 %vm666_vm12, %v699_v52  ;;  %v828_v61 = vmul.f32 %v1770_v59, %v2072_v2 }
 0x3f6   : > { %1567 = vmatmul.msk.f32.vlgmr.msra.gmra.mxu2 %vm666_vm12, %v827_v55 }
 0x3f7   : > { %v1698_v56 = vpop.permute.xlu0 %1697 }
 0x3f8   : > { %v1699_v58 = vunpack.i.l.bf16 %v1698_v56  ;;  %v1700_v57 = vunpack.i.h.bf16 %v1698_v56 }
 0x3fa   : > { %991 = vmatpush.msrb.mxu3 %v1699_v58 }
 0x3fb   : > { %v823_v60 = vpop.xlane.xlu2 %822 }
 0x3fc   : > { %1771 = vrcp.f32 %v823_v60  ;;  %992 = vmatpush.msrb.mxu3 %v1700_v57 }
 0x3fd   : > { %1773 = vrcp.f32 %v1077_v42 }
 0x3fe   : > { %1568 = vmatmul.msk.f32.gmra.mxu2 %vm666_vm12, %v828_v61  ;;  %1775 = vrcp.f32 %v1080_v54 }
 0x402   : > { %v1772_v62 = vpop.eup %1771 }
 0x403   : > { %v961_v0 = vpop.permute.xlu2 %960  ;;  %v829_v1 = vmul.f32 %v1772_v62, %v2086_v15  ;;  %v1774_v3 = vpop.eup %1773 }
 0x404   : > { %993 = vmatpush.msrb.mxu3 %v961_v0  ;;  %v1087_v63 = vmul.f32 %v1774_v3, %v2058_v46  ;;  %v1776_v2 = vpop.eup %1775  ;;  %v1724_v0 = vld [vmem:[%s2246_s7] ss:$0 sm:$0xff] }
 0x405   : > { %v1088_v5 = vmul.f32 %v1776_v2, %v2080_v7 }
 0x406   : > { %1569 = vmatmul.msk.f32.gmra.mxu2 %vm666_vm12, %v829_v1 }
 0x40b   : > { %v1091_v4 = vpop.permute.xlu2 %1090 }
 0x40c   : > { %1123 = vmatpush.msrb.mxu2 %v1091_v4 }
 0x40e   : > { %1585 = vmatmul.msk.f32.vlgmr.msrb.gmra.mxu2 %vm666_vm12, %v1087_v63 }
 0x416   : > { %1586 = vmatmul.msk.f32.gmra.mxu2 %vm666_vm12, %v1088_v5 }
 0x422   : > { %v947_v9 = vpop.xlane.xlu0 %946 }
 0x423   : > { %1777 = vrcp.f32 %v947_v9 }
 0x429   : > { %v1778_v10 = vpop.eup %1777 }
 0x42a   : > { %v950_v13 = vpop.xlane.xlu0 %949  ;;  %v957_v14 = vmul.f32 %v1778_v10, %v2095_v30 }
 0x42b   : > { %1779 = vrcp.f32 %v950_v13 }
 0x42c   : > { %1576 = vmatmul.msk.f32.vlgmr.msrb.gmra.mxu3 %vm666_vm12, %v957_v14 }
 0x431   : > { %v1780_v15 = vpop.eup %1779 }
 0x432   : > { %v1083_v16 = vpop.xlane.xlu0 %1082  ;;  %v958_v46 = vmul.f32 %v1780_v15, %v2102_v23 }
 0x433   : > { %1781 = vrcp.f32 %v1083_v16 }
 0x434   : > { %1577 = vmatmul.msk.f32.gmra.mxu3 %vm666_vm12, %v958_v46 }
 0x435   : > { %v735_v24 = vpop.f32.mrf.mxu2 }
 0x439   : > { %v1782_v17 = vpop.eup %1781 }
 0x43a   : > { %v1089_v7 = vmul.f32 %v1782_v17, %v2106_v37 }
 0x43c   : > { %1587 = vmatmul.msk.f32.gmra.mxu2 %vm666_vm12, %v1089_v7 }
 0x444   : > { %v953_v19 = vpop.xlane.xlu2 %952 }
 0x445   : > { %1783 = vrcp.f32 %v953_v19 }
 0x44b   : > { %v1784_v21 = vpop.eup %1783 }
 0x44c   : > { %v959_v22 = vmul.f32 %v1784_v21, %v2111_v44 }
 0x44e   : > { %1578 = vmatmul.msk.f32.gmra.mxu3 %vm666_vm12, %v959_v22 }
 0x461   : > { %v738_v25 = vpop.f32.mrf.mxu2 }
 0x471   : > { %v741_v27 = vpop.f32.mrf.mxu2 }
 0x479   : > { %v865_v29 = vpop.f32.mrf.mxu2 }
 0x481   : > { %v868_v28 = vpop.f32.mrf.mxu2 }
 0x482   : > { %v1706_v30 = vpack.i.bf16 %v868_v28, %v865_v29 }
 0x484   : > { %1707 = vrot.lane.b32.xlu0 %v1706_v30, %s1817_s20 }
 0x489   : > { %v871_v32 = vpop.f32.mrf.mxu2 }
 0x48a   : > { %1141 = vrot.lane.b32.xlu2 %v871_v32, %s1817_s20  ;;  %v1647_v32 = vld [vmem:[%s2249_s10 + $0x8] sm:$0xff]  ;;  %s467_s20 = scalar_lea.vmem %s2253_s14, %s1662_s15 }
 0x48b   : > { %1343 = vmatpush.bf16.msra.mxu3 %v1647_v32 }
 0x491   : > { %v1125_v18 = vpop.f32.mrf.mxu2 }
 0x499   : > { %v1128_v33 = vpop.f32.mrf.mxu2 }
 0x49a   : > { %v1716_v34 = vpack.i.bf16 %v1128_v33, %v1125_v18 }
 0x49c   : > { %1717 = vrot.lane.b32.xlu0 %v1716_v34, %s1818_s21 }
 0x4af   : > { %v995_v35 = vpop.f32.mrf.mxu3 }
 0x4b7   : > { %v998_v23 = vpop.f32.mrf.mxu3 }
 0x4b8   : > { %v1711_v26 = vpack.i.bf16 %v998_v23, %v995_v35  ;;  %v1646_v35 = vld [vmem:[%s2249_s10] sm:$0xff] }
 0x4b9   : > { %1344 = vmatpush.bf16.msra.mxu3 %v1646_v35 }
 0x4ba   : > { %1712 = vrot.lane.b32.xlu1 %v1711_v26, %s1819_s22 }
 0x4bf   : > { %v1131_v11 = vpop.f32.mrf.mxu2 }
 0x4d1   : > { %v1001_v37 = vpop.f32.mrf.mxu3 }
 0x4d2   : > { %1153 = vrot.lane.b32.xlu0 %v1001_v37, %s1819_s22 }
 0x4da   : > { %1165 = vrot.lane.b32.xlu0 %v1131_v11, %s1818_s21 }
 0x4e4   : > { %v1142_v58 = vpop.permute.xlu2 %1141 }
 0x4e5   : > { %v1172_v59 = vsel %vm624_vm11, %v741_v27, %v1142_v58 }
 0x4f6   : > { %v1708_v36 = vpop.permute.xlu0 %1707 }
 0x4f7   : > { %v1710_v40 = vunpack.i.h.bf16 %v1708_v36  ;;  %v1709_v41 = vunpack.i.l.bf16 %v1708_v36 }
 0x4f9   : > { %v1171_v47 = vsel %vm624_vm11, %v738_v25, %v1710_v40  ;;  %v1170_v48 = vsel %vm624_vm11, %v735_v24, %v1709_v41 }
 0x50e   : > { %v1718_v42 = vpop.permute.xlu0 %1717 }
 0x50f   : > { %v1720_v31 = vunpack.i.h.bf16 %v1718_v42  ;;  %v1719_v49 = vunpack.i.l.bf16 %v1718_v42 }
 0x52c   : > { %v1713_v43 = vpop.permute.xlu1 %1712 }
 0x52d   : > { %v1715_v44 = vunpack.i.h.bf16 %v1713_v43  ;;  %v1714_v45 = vunpack.i.l.bf16 %v1713_v43 }
 0x52f   : > { %v1175_v50 = vsel %vm1173_vm13, %v1171_v47, %v1715_v44  ;;  %v1174_v51 = vsel %vm1173_vm13, %v1170_v48, %v1714_v45 }
 0x530   : > { %v1178_v52 = vsel %vm666_vm12, %v1175_v50, %v1720_v31  ;;  %v1177_v53 = vsel %vm666_vm12, %v1174_v51, %v1719_v49  ;;  %v1725_v31 = vld [vmem:[%s2247_s8] ss:$0 sm:$0xff] }
 0x531   : > { %v1180_v55 = vpack.c.bf16 %v1178_v52, %v1177_v53 }
 0x533   : > { %1596 = vmatmul.msk.bf16.vlgmr.msra.gmra.mxu1 %vm483_vm0, %v1180_v55  ;;  %v1726_v55 = vld [vmem:[%s2248_s9] ss:$0 sm:$0xff] }
 0x544   : > { %v1154_v56 = vpop.permute.xlu0 %1153 }
 0x545   : > { %v1176_v57 = vsel %vm1173_vm13, %v1172_v59, %v1154_v56 }
 0x54c   : > { %v1166_v60 = vpop.permute.xlu0 %1165 }
 0x54d   : > { %v1179_v61 = vsel %vm666_vm12, %v1176_v57, %v1166_v60 }
 0x54e   : > { %v1181_v62 = vpack.c.bf16 %v1179_v61, %v1179_v61 }
 0x550   : > { %1597 = vmatmul.msk.bf16.gmra.mxu1 %vm483_vm0, %v1181_v62 }
 0x5b0   : > { %v1217_v1 = vpop.f32.mrf.mxu1 }
 0x5b1   : > { %v1218_v54 = vadd.f32 %v1724_v0, %v1217_v1 }
 0x5b3   : > { %v2158_v3 = vadd.f32 %v1218_v54, %v1928_v12 }
 0x5b5   : > { %v1231_v4 = vsel %vm483_vm0, %v2158_v3, 0.0 }
 0x5b6   : > { %1232 = vadd.xlane.f32.xlu1 %v1231_v4 }
 0x5b8   : > { %v1219_v63 = vpop.f32.mrf.mxu1 }
 0x5b9   : > { %v1220_v2 = vadd.f32 %v1724_v0, %v1219_v63 }
 0x5bb   : > { %v2163_v5 = vadd.f32 %v1220_v2, %v1919_v8 }
 0x5bd   : > { %v1234_v9 = vsel %vm483_vm0, %v2163_v5, 0.0 }
 0x5be   : > { %1235 = vadd.xlane.f32.xlu0 %v1234_v9 }
 0x5cd   : > { %v1222_v10 = vpop.f32.mrf.mxu1 }
 0x5ce   : > { %v1223_v13 = vadd.f32 %v1724_v0, %v1222_v10 }
 0x5d0   : > { %v2168_v14 = vadd.f32 %v1223_v13, %v1917_v6 }
 0x5d2   : > { %v1237_v12 = vsel %vm483_vm0, %v2168_v14, 0.0 }
 0x5d3   : > { %1238 = vadd.xlane.f32.xlu2 %v1237_v12 }
 0x5d5   : > { %v1224_v15 = vpop.f32.mrf.mxu1 }
 0x5d6   : > { %v1655_v15 = vld [vmem:[%s2251_s12 + $0x38] sm:$0xff] }
 0x5d7   : > { %1452 = vmatpush.bf16.msra.mxu0 %v1655_v15 }
 0x629   : > { %v1233_v16 = vpop.xlane.xlu1 %1232 }
 0x62a   : > { %v1240_v46 = vmul.f32 %v1233_v16, %v1932_v20  ;;  %v1654_v16 = vld [vmem:[%s2251_s12 + $0x30] sm:$0xff] }
 0x62b   : > { %1453 = vmatpush.bf16.msra.mxu0 %v1654_v16 }
 0x62c   : > { %v1243_v8 = vsub.f32 %v2158_v3, %v1240_v46  ;;  %v1653_v46 = vld [vmem:[%s2251_s12 + $0x28] sm:$0xff] }
 0x62e   : > { %v1246_v17 = vmul.f32 %v1243_v8, %v1243_v8 }
 0x62f   : > { %1454 = vmatpush.bf16.msra.mxu0 %v1653_v46 }
 0x630   : > { %v1249_v7 = vsel %vm483_vm0, %v1246_v17, 0.0  ;;  %v1651_v17 = vld [vmem:[%s2251_s12 + $0x18] sm:$0xff] }
 0x631   : > { %1250 = vadd.xlane.f32.xlu1 %v1249_v7  ;;  %v1236_v19 = vpop.xlane.xlu0 %1235  ;;  %v1650_v7 = vld [vmem:[%s2251_s12 + $0x10] sm:$0xff] }
 0x632   : > { %v1241_v21 = vmul.f32 %v1236_v19, %v1932_v20  ;;  %v1649_v19 = vld [vmem:[%s2251_s12 + $0x8] sm:$0xff] }
 0x634   : > { %v1244_v6 = vsub.f32 %v2163_v5, %v1241_v21  ;;  %v1727_v21 = vld [vmem:[%s2250_s11] ss:$0 sm:$0xff] }
 0x636   : > { %v1247_v22 = vmul.f32 %v1244_v6, %v1244_v6 }
 0x638   : > { %v1252_v24 = vsel %vm483_vm0, %v1247_v22, 0.0  ;;  %v1648_v22 = vld [vmem:[%s2251_s12] sm:$0xff] }
 0x639   : > { %1253 = vadd.xlane.f32.xlu0 %v1252_v24 }
 0x646   : > { %v1239_v25 = vpop.xlane.xlu2 %1238 }
 0x647   : > { %v1242_v27 = vmul.f32 %v1239_v25, %v1932_v20 }
 0x649   : > { %v1245_v29 = vsub.f32 %v2168_v14, %v1242_v27 }
 0x64b   : > { %v1248_v28 = vmul.f32 %v1245_v29, %v1245_v29 }
 0x64d   : > { %v1255_v30 = vsel %vm483_vm0, %v1248_v28, 0.0 }
 0x64e   : > { %1256 = vadd.xlane.f32.xlu1 %v1255_v30 }
 0x6a4   : > { %v1251_v18 = vpop.xlane.xlu1 %1250 }
 0x6a5   : > { %v1258_v33 = vmul.f32 %v1251_v18, %v1932_v20 }
 0x6a7   : > { %v1261_v34 = vadd.f32 1e-05, %v1258_v33 }
 0x6a9   : > { %1785 = vrsqrt.f32 %v1261_v34  ;;  %vm1270_vm15 = vweird.f32 %v1261_v34 }
 0x6ac   : > { %v1254_v23 = vpop.xlane.xlu0 %1253 }
 0x6ad   : > { %v1259_v26 = vmul.f32 %v1254_v23, %v1932_v20 }
 0x6af   : > { %v1786_v37 = vpop.eup %1785  ;;  %v1262_v11 = vadd.f32 1e-05, %v1259_v26 }
 0x6b0   : > { %v1265_v38 = vmul.f32 %v1786_v37, %v1261_v34  ;;  %vm1271_vm14 = vweird.f32 %v1786_v37 }
 0x6b1   : > { %1787 = vrsqrt.f32 %v1262_v11  ;;  %vm1272_vm1 = vmor %vm1270_vm15, %vm1271_vm14  ;;  %vm1280_vm3 = vweird.f32 %v1262_v11 }
 0x6b2   : > { %v1266_v39 = vmul.f32 %v1786_v37, %v1265_v38 }
 0x6b4   : > { %v1267_v36 = vmul.f32 0.5, %v1266_v39 }
 0x6b6   : > { %v1268_v40 = vsub.f32 1.5, %v1267_v36 }
 0x6b7   : > { %v1788_v41 = vpop.eup %1787 }
 0x6b8   : > { %v1269_v42 = vmul.f32 %v1786_v37, %v1268_v40  ;;  %v1275_v43 = vmul.f32 %v1788_v41, %v1262_v11  ;;  %vm1281_vm2 = vweird.f32 %v1788_v41 }
 0x6b9   : > { %vm1282_vm4 = vmor %vm1280_vm3, %vm1281_vm2 }
 0x6ba   : > { %v1276_v44 = vmul.f32 %v1788_v41, %v1275_v43  ;;  %v1273_v45 = vsel %vm1272_vm1, %v1786_v37, %v1269_v42 }
 0x6bb   : > { %v1294_v49 = vmul.f32 %v1273_v45, %v1243_v8  ;;  %v1652_v8 = vld [vmem:[%s2251_s12 + $0x20] sm:$0xff] }
 0x6bc   : > { %v1277_v47 = vmul.f32 0.5, %v1276_v44  ;;  %1455 = vmatpush.bf16.msra.mxu0 %v1652_v8 }
 0x6bd   : > { %v1300_v56 = vmul.f32 %v1725_v31, %v1294_v49 }
 0x6be   : > { %v1278_v48 = vsub.f32 1.5, %v1277_v47 }
 0x6bf   : > { %v1306_v60 = vadd.f32 %v1726_v55, %v1300_v56 }
 0x6c0   : > { %v1279_v50 = vmul.f32 %v1788_v41, %v1278_v48  ;;  %1456 = vmatpush.bf16.msra.mxu0 %v1651_v17 }
 0x6c1   : > { %v1257_v51 = vpop.xlane.xlu1 %1256 }
 0x6c2   : > { %v1283_v52 = vsel %vm1282_vm4, %v1788_v41, %v1279_v50  ;;  %v1260_v53 = vmul.f32 %v1257_v51, %v1932_v20 }
 0x6c3   : > { %v1295_v58 = vmul.f32 %v1283_v52, %v1244_v6 }
 0x6c4   : > { %v1263_v59 = vadd.f32 1e-05, %v1260_v53  ;;  %1457 = vmatpush.bf16.msra.mxu0 %v1650_v7 }
 0x6c5   : > { %v1301_v57 = vmul.f32 %v1725_v31, %v1295_v58 }
 0x6c6   : > { %1789 = vrsqrt.f32 %v1263_v59  ;;  %vm1290_vm6 = vweird.f32 %v1263_v59 }
 0x6c7   : > { %v1307_v61 = vadd.f32 %v1726_v55, %v1301_v57 }
 0x6c8   : > { %1458 = vmatpush.bf16.msra.mxu0 %v1649_v19 }
 0x6c9   : > { %v1309_v62 = vpack.c.bf16 %v1307_v61, %v1306_v60 }
 0x6cb   : > { %1606 = vmatmul.msk.bf16.vlgmr.msra.gmra.mxu3 %vm483_vm0, %v1309_v62 }
 0x6cc   : > { %v1790_v0 = vpop.eup %1789  ;;  %1459 = vmatpush.bf16.msra.mxu0 %v1648_v22 }
 0x6cd   : > { %v1285_v1 = vmul.f32 %v1790_v0, %v1263_v59  ;;  %vm1291_vm5 = vweird.f32 %v1790_v0  ;;  %v1728_v59 = vld [vmem:[%s2252_s13] ss:$0 sm:$0xff] }
 0x6ce   : > { %vm1292_vm7 = vmor %vm1290_vm6, %vm1291_vm5 }
 0x6cf   : > { %v1286_v54 = vmul.f32 %v1790_v0, %v1285_v1 }
 0x6d1   : > { %v1287_v4 = vmul.f32 0.5, %v1286_v54 }
 0x6d3   : > { %v1288_v63 = vsub.f32 1.5, %v1287_v4 }
 0x6d5   : > { %v1289_v20 = vmul.f32 %v1790_v0, %v1288_v63 }
 0x6d7   : > { %v1293_v2 = vsel %vm1292_vm7, %v1790_v0, %v1289_v20 }
 0x6d8   : > { %v1296_v9 = vmul.f32 %v1293_v2, %v1245_v29 }
 0x6da   : > { %v1302_v10 = vmul.f32 %v1725_v31, %v1296_v9 }
 0x6dc   : > { %v1308_v13 = vadd.f32 %v1726_v55, %v1302_v10 }
 0x6de   : > { %v1310_v12 = vpack.c.bf16 %v1308_v13, %v1308_v13 }
 0x6e0   : > { %1607 = vmatmul.msk.bf16.gmra.mxu3 %vm483_vm0, %v1310_v12  ;;  %vm1476_vm0 = vcmask 257024  }
 0x74e   : > { %v1346_v6 = vpop.f32.mrf.mxu3 }
 0x74f   : > { %v1347_v24 = vadd.f32 %v1727_v21, %v1346_v6 }
 0x751   : > { %v1355_v25 = vmul.f32 %v1347_v24, %v1347_v24 }
 0x753   : > { %v1358_v27 = vmul.f32 %v1355_v25, %v1347_v24 }
 0x755   : > { %v1361_v29 = vmul.f32 0.044715, %v1358_v27 }
 0x756   : > { %v1348_v28 = vpop.f32.mrf.mxu3 }
 0x757   : > { %v1364_v30 = vadd.f32 %v1361_v29, %v1347_v24  ;;  %v1349_v32 = vadd.f32 %v1727_v21, %v1348_v28 }
 0x759   : > { %v1367_v18 = vmul.f32 0.7978846, %v1364_v30  ;;  %v1356_v33 = vmul.f32 %v1349_v32, %v1349_v32 }
 0x75b   : > { %v1359_v34 = vmul.f32 %v1356_v33, %v1349_v32  ;;  %1791 = vtanh.f32 %v1367_v18 }
 0x75d   : > { %v1362_v35 = vmul.f32 0.044715, %v1359_v34 }
 0x75f   : > { %v1365_v23 = vadd.f32 %v1362_v35, %v1349_v32 }
 0x761   : > { %v1368_v26 = vmul.f32 0.7978846, %v1365_v23  ;;  %v1792_v37 = vpop.eup %1791 }
 0x762   : > { %v1373_v39 = vadd.f32 1.0, %v1792_v37 }
 0x763   : > { %1793 = vtanh.f32 %v1368_v26  ;;  %v1351_v11 = vpop.f32.mrf.mxu3 }
 0x764   : > { %v1352_v38 = vadd.f32 %v1727_v21, %v1351_v11  ;;  %v1376_v42 = vmul.f32 0.5, %v1373_v39 }
 0x766   : > { %v1357_v36 = vmul.f32 %v1352_v38, %v1352_v38  ;;  %v1379_v31 = vmul.f32 %v1376_v42, %v1347_v24 }
 0x768   : > { %v1360_v40 = vmul.f32 %v1357_v36, %v1352_v38 }
 0x769   : > { %v1794_v41 = vpop.eup %1793 }
 0x76a   : > { %v1374_v43 = vadd.f32 1.0, %v1794_v41  ;;  %v1363_v44 = vmul.f32 0.044715, %v1360_v40 }
 0x76b   : > { %v1353_v45 = vpop.f32.mrf.mxu3 }
 0x76c   : > { %v1377_v47 = vmul.f32 0.5, %v1374_v43  ;;  %v1366_v48 = vadd.f32 %v1363_v44, %v1352_v38 }
 0x76e   : > { %v1380_v49 = vmul.f32 %v1377_v47, %v1349_v32  ;;  %v1369_v50 = vmul.f32 0.7978846, %v1366_v48 }
 0x770   : > { %v1382_v51 = vpack.c.bf16 %v1380_v49, %v1379_v31  ;;  %1795 = vtanh.f32 %v1369_v50 }
 0x772   : > { %1460 = vmatmul.bf16.vlgmr.msra.gmra.mxu0 %v1382_v51 }
 0x776   : > { %v1796_v52 = vpop.eup %1795 }
 0x777   : > { %v1375_v53 = vadd.f32 1.0, %v1796_v52 }
 0x779   : > { %v1378_v55 = vmul.f32 0.5, %v1375_v53 }
 0x77b   : > { %v1381_v56 = vmul.f32 %v1378_v55, %v1352_v38 }
 0x77d   : > { %v1383_v58 = vpack.c.bf16 %v1381_v56, %v1381_v56 }
 0x782   : > { %1465 = vmatmul.bf16.gmra.mxu0 %v1383_v58 }
 0x7ef   : > { %v1461_v57 = vpop.f32.mrf.mxu0 }
 0x7f0   : > { %v1462_v60 = vadd.f32 %v1728_v59, %v1461_v57 }
 0x7f2   : > { %v1470_v61 = vadd.f32 %v1462_v60, %v2158_v3 }
 0x7f4   : > { %v1473_v62 = vpack.c.bf16 %v1470_v61, %v1470_v61 }
 0x7f6   : > { %1477 = vst.msk [vmem:[%s467_s20] sm:$0xf] %vm1476_vm0, %v1473_v62 }
 0x7f7   : > { %v1463_v0 = vpop.f32.mrf.mxu0 }
 0x7f8   : > { %v1464_v1 = vadd.f32 %v1728_v59, %v1463_v0 }
 0x7fa   : > { %v1471_v54 = vadd.f32 %v1464_v1, %v2163_v5 }
 0x7fc   : > { %v1474_v4 = vpack.c.bf16 %v1471_v54, %v1471_v54 }
 0x7fe   : > { %1478 = vst.msk [vmem:[%s467_s20 + $0x4] sm:$0xf] %vm1476_vm0, %v1474_v4 }
 0x7ff   : > { %v1466_v63 = vpop.f32.mrf.mxu0 }
 0x800   : > { %v1467_v20 = vadd.f32 %v1728_v59, %v1466_v63 }
 0x802   : > { %v1472_v2 = vadd.f32 %v1467_v20, %v2168_v14 }
 0x804   : > { %v1475_v9 = vpack.c.bf16 %v1472_v2, %v1472_v2 }
 0x806   : > { %1479 = vst.msk [vmem:[%s467_s20 + $0x8] sm:$0xf] %vm1476_vm0, %v1475_v9 }
 0x807   : > { %v1468_v3 = vpop.f32.mrf.mxu0 }
 0x808 PF: > { %s24_s29 = sadd.s32 1, %s1803_s29  }
 0x809   : > { %p21_p4 = scmp.ge.s32.totalorder %s24_s29, 4  }
 0x80b   :  { %23 = sbr.rel (!%p21_p4) target bundleno = 1 (0x1), region = 106 }

// kernel: fwd.17
= control target key start
LH: loop header
LB: loop body
LE: loop exit
PB: predicated region body
PF: predicated region fallthrough
CT: control target
= control target key end

     0   :  { %s522_s18 = smov 0   ;;  %s574_s0 = inlined_call_operand.vmem [shape: bf16[48,32], index: 0, kind: input, shape index: {}]   ;;  %s575_s1 = inlined_call_operand.vmem [shape: f32[1,32], index: 1, kind: input, shape index: {}]   ;;  %s576_s2 = inlined_call_operand.vmem [shape: f32[1,32], index: 2, kind: input, shape index: {}]   ;;  %s577_s3 = inlined_call_operand.vmem [shape: bf16[32,128], index: 3, kind: input, shape index: {}]   ;;  %s578_s4 = inlined_call_operand.vmem [shape: f32[1,128], index: 4, kind: input, shape index: {}]   ;;  %s579_s5 = inlined_call_operand.vmem [shape: bf16[48,128], index: 5, kind: output, shape index: {}]  }
   0x1 LB: > { %s431_s19 = sadd.s32 4294967295, %s489_s18   ;;  %p435_p0 = scmp.ge.s32.totalorder %s489_s18, 1  ;;  %s489_s18 = sphi %s522_s18, %s15_s18  }
   0x2   : > { %p188_p1 = scmp.lt.s32.totalorder %s489_s18, 3 }
   0x4   : > { %p189_p2 = pnand %p435_p0, %p188_p1 }
   0x5   : > { %s216_s20 = smul.u32 (!%p189_p2), 3, %s431_s19 }
   0x6   : > { %192 = sbr.rel (%p189_p2) target bundleno = 437 (0x1b5), region = 40 }
   0x7   : > { %p217_p3 = scmp.lt.s32.totalorder (!%p189_p2), %s216_s20, 5 }
   0xb   : > { %s581_s20 = smov (!%p217_p3, %s216_s20), 5  ;;  %vm237_vm0 = vcmask 261120   ;;  %v491_v8 = vmov 32.0   ;;  %v451_v30 = vld [vmem:[%s577_s3 + $0x8] sm:$0xff]  ;;  %v450_v33 = vld [vmem:[%s577_s3] sm:$0xff] }
   0xc   : > { %s436_s21 = sshll.u32 %s581_s20, 2  ;;  %475 = vrcp.f32 %v491_v8  ;;  %357 = vmatpush.bf16.msra.mxu0 %v451_v30  ;;  %461 = vmatpush.bf16.msra.mxu1 %v451_v30  ;;  %v472_v55 = vld [vmem:[%s575_s1] ss:$0 sm:$0xff] }
   0xd   : > { %s220_s24 = scalar_lea.vmem %s574_s0, %s436_s21  ;;  %v473_v62 = vld [vmem:[%s576_s2] ss:$0 sm:$0xff]  ;;  %s226_s12 = scalar_lea.vmem %s579_s5, %s436_s21 }
   0xe   : > { %v453_v0 = vld [vmem:[%s220_s24] sm:$0xff]   ;;  %v231_v1 = vld [vmem:[%s220_s24 + $0x8] sm:$0xf] }
   0xf   : > { %v454_v2 = vunpack.c.l.bf16 %v453_v0  ;;  %v234_v3 = vunpack.c.l.bf16 %v231_v1  ;;  %v455_v6 = vunpack.c.h.bf16 %v453_v0 }
  0x10   : > { %358 = vmatpush.bf16.msra.mxu0 %v450_v33  ;;  %462 = vmatpush.bf16.msra.mxu1 %v450_v33 }
  0x11   : > { %v238_v4 = vsel %vm237_vm0, %v454_v2, 0.0  ;;  %v244_v5 = vsel %vm237_vm0, %v234_v3, 0.0  ;;  %v241_v7 = vsel %vm237_vm0, %v455_v6, 0.0 }
  0x12   : > { %239 = vadd.xlane.f32.xlu0 %v238_v4  ;;  %245 = vadd.xlane.f32.xlu1 %v244_v5  ;;  %v476_v9 = vpop.eup %475 }
  0x13   : > { %v248_v10 = vmul.f32 32.0, %v476_v9  ;;  %vm252_vm1 = vweird.f32 %v476_v9 }
  0x15   : > { %v249_v11 = vsub.f32 1.0, %v248_v10 }
  0x17   : > { %v250_v12 = vmul.f32 %v476_v9, %v249_v11 }
  0x19   : > { %v251_v13 = vadd.f32 %v476_v9, %v250_v12  ;;  %v474_v12 = vld [vmem:[%s578_s4] ss:$0 sm:$0xff] }
  0x1a   : > { %242 = vadd.xlane.f32.xlu0 %v241_v7 }
  0x1b   : > { %v253_v14 = vsel %vm252_vm1, %v476_v9, %v251_v13 }
  0x85   : > { %v240_v15 = vpop.xlane.xlu0 %239  ;;  %v246_v19 = vpop.xlane.xlu1 %245 }
  0x86   : > { %v254_v16 = vmul.f32 %v253_v14, %v240_v15  ;;  %v256_v23 = vmul.f32 %v253_v14, %v246_v19 }
  0x88   : > { %v257_v17 = vsub.f32 %v454_v2, %v254_v16  ;;  %v542_v25 = vsub.f32 %v234_v3, %v256_v23 }
  0x8a   : > { %v260_v18 = vmul.f32 %v257_v17, %v257_v17  ;;  %v262_v28 = vmul.f32 %v542_v25, %v542_v25 }
  0x8c   : > { %v263_v20 = vsel %vm237_vm0, %v260_v18, 0.0  ;;  %v269_v29 = vsel %vm237_vm0, %v262_v28, 0.0 }
  0x8d   : > { %264 = vadd.xlane.f32.xlu1 %v263_v20  ;;  %v243_v21 = vpop.xlane.xlu0 %242 }
  0x8e   : > { %v255_v22 = vmul.f32 %v253_v14, %v243_v21 }
  0x90   : > { %v258_v24 = vsub.f32 %v455_v6, %v255_v22 }
  0x92   : > { %v261_v26 = vmul.f32 %v258_v24, %v258_v24 }
  0x94   : > { %v266_v27 = vsel %vm237_vm0, %v261_v26, 0.0 }
  0x95   : > { %267 = vadd.xlane.f32.xlu2 %v266_v27 }
  0x9d   : > { %270 = vadd.xlane.f32.xlu2 %v269_v29 }
 0x100   : > { %v265_v31 = vpop.xlane.xlu1 %264 }
 0x101   : > { %v272_v32 = vmul.f32 %v265_v31, %v253_v14 }
 0x103   : > { %v275_v34 = vadd.f32 1e-05, %v272_v32 }
 0x105   : > { %477 = vrsqrt.f32 %v275_v34  ;;  %vm284_vm3 = vweird.f32 %v275_v34 }
 0x108   : > { %v268_v35 = vpop.xlane.xlu2 %267 }
 0x109   : > { %v273_v36 = vmul.f32 %v268_v35, %v253_v14 }
 0x10b   : > { %v478_v37 = vpop.eup %477  ;;  %v276_v38 = vadd.f32 1e-05, %v273_v36 }
 0x10c   : > { %v279_v39 = vmul.f32 %v478_v37, %v275_v34  ;;  %vm285_vm2 = vweird.f32 %v478_v37 }
 0x10d   : > { %479 = vrsqrt.f32 %v276_v38  ;;  %vm286_vm4 = vmor %vm284_vm3, %vm285_vm2  ;;  %vm294_vm6 = vweird.f32 %v276_v38 }
 0x10e   : > { %v280_v40 = vmul.f32 %v478_v37, %v279_v39 }
 0x110   : > { %v281_v41 = vmul.f32 0.5, %v280_v40  ;;  %v271_v42 = vpop.xlane.xlu2 %270 }
 0x111   : > { %v274_v43 = vmul.f32 %v271_v42, %v253_v14 }
 0x112   : > { %v282_v44 = vsub.f32 1.5, %v281_v41 }
 0x113   : > { %v480_v45 = vpop.eup %479  ;;  %v277_v46 = vadd.f32 1e-05, %v274_v43 }
 0x114   : > { %v283_v47 = vmul.f32 %v478_v37, %v282_v44  ;;  %v289_v48 = vmul.f32 %v480_v45, %v276_v38  ;;  %vm295_vm5 = vweird.f32 %v480_v45 }
 0x115   : > { %481 = vrsqrt.f32 %v277_v46  ;;  %vm296_vm7 = vmor %vm294_vm6, %vm295_vm5  ;;  %vm304_vm9 = vweird.f32 %v277_v46 }
 0x116   : > { %v290_v49 = vmul.f32 %v480_v45, %v289_v48  ;;  %v287_v50 = vsel %vm286_vm4, %v478_v37, %v283_v47 }
 0x117   : > { %v308_v54 = vmul.f32 %v287_v50, %v257_v17 }
 0x118   : > { %v291_v51 = vmul.f32 0.5, %v290_v49 }
 0x119   : > { %v314_v61 = vmul.f32 %v472_v55, %v308_v54 }
 0x11a   : > { %v292_v52 = vsub.f32 1.5, %v291_v51 }
 0x11b   : > { %v482_v53 = vpop.eup %481  ;;  %v320_v2 = vadd.f32 %v473_v62, %v314_v61 }
 0x11c   : > { %v293_v56 = vmul.f32 %v480_v45, %v292_v52  ;;  %v299_v57 = vmul.f32 %v482_v53, %v277_v46  ;;  %vm305_vm8 = vweird.f32 %v482_v53 }
 0x11d   : > { %vm306_vm10 = vmor %vm304_vm9, %vm305_vm8 }
 0x11e   : > { %v297_v58 = vsel %vm296_vm7, %v480_v45, %v293_v56  ;;  %v300_v59 = vmul.f32 %v482_v53, %v299_v57 }
 0x11f   : > { %v309_v60 = vmul.f32 %v297_v58, %v258_v24 }
 0x120   : > { %v301_v63 = vmul.f32 0.5, %v300_v59 }
 0x121   : > { %v315_v0 = vmul.f32 %v472_v55, %v309_v60 }
 0x122   : > { %v302_v1 = vsub.f32 1.5, %v301_v63 }
 0x123   : > { %v321_v3 = vadd.f32 %v473_v62, %v315_v0 }
 0x124   : > { %v303_v4 = vmul.f32 %v482_v53, %v302_v1 }
 0x125   : > { %v323_v5 = vpack.c.bf16 %v321_v3, %v320_v2 }
 0x126   : > { %v307_v6 = vsel %vm306_vm10, %v482_v53, %v303_v4 }
 0x127   : > { %446 = vmatmul.msk.bf16.vlgmr.msra.gmra.mxu0 %vm237_vm0, %v323_v5  ;;  %v310_v7 = vmul.f32 %v307_v6, %v542_v25 }
 0x129   : > { %v316_v8 = vmul.f32 %v472_v55, %v310_v7 }
 0x12b   : > { %v322_v9 = vadd.f32 %v473_v62, %v316_v8 }
 0x12d   : > { %v324_v10 = vpack.c.bf16 %v322_v9, %v322_v9 }
 0x12f   : > { %447 = vmatmul.msk.bf16.vlgmr.msra.gmra.mxu1 %vm237_vm0, %v324_v10 }
 0x1a4   : > { %v360_v11 = vpop.f32.mrf.mxu0 }
 0x1a5   : > { %v361_v15 = vadd.f32 %v474_v12, %v360_v11 }
 0x1ac   : > { %v362_v13 = vpop.f32.mrf.mxu0  ;;  %v365_v14 = vpop.f32.mrf.mxu1 }
 0x1ad   : > { %v363_v16 = vadd.f32 %v474_v12, %v362_v13  ;;  %v366_v17 = vadd.f32 %v474_v12, %v365_v14 }
 0x1af   : > { %v459_v18 = vpack.c.bf16 %v363_v16, %v361_v15  ;;  %v371_v19 = vpack.c.bf16 %v366_v17, %v366_v17 }
 0x1b1   : > { %460 = vst [vmem:[%s226_s12] sm:$0xff] %v459_v18  }
 0x1b2   : > { %374 = vst [vmem:[%s226_s12 + $0x8] sm:$0xf] %v371_v19 }
 0x1b4   : > { %v367_v20 = vpop.f32.mrf.mxu1 }
 0x1b5 PF: > { %s15_s18 = sadd.s32 1, %s489_s18  }
 0x1b6   : > { %p12_p4 = scmp.ge.s32.totalorder %s15_s18, 4  }
 0x1b8   :  { %14 = sbr.rel (!%p12_p4) target bundleno = 1 (0x1), region = 70 }

// kernel: fwd.21
= control target key start
LH: loop header
LB: loop body
LE: loop exit
PB: predicated region body
PF: predicated region fallthrough
CT: control target
= control target key end

     0   :  { %s1857_s25 = smov 0   ;;  %s2192_s0 = inlined_call_operand.vmem [shape: bf16[2,24,32], index: 0, kind: input, shape index: {}]   ;;  %s2193_s1 = inlined_call_operand.vmem [shape: f32[1,32], index: 1, kind: input, shape index: {}]   ;;  %s2194_s2 = inlined_call_operand.vmem [shape: f32[1,32], index: 2, kind: input, shape index: {}]   ;;  %s2195_s3 = inlined_call_operand.vmem [shape: bf16[32,96], index: 3, kind: input, shape index: {}]   ;;  %s2196_s4 = inlined_call_operand.vmem [shape: f32[1,96], index: 4, kind: input, shape index: {}]   ;;  %s2197_s5 = inlined_call_operand.vmem [shape: bf16[32,32], index: 5, kind: input, shape index: {}]   ;;  %s2198_s6 = inlined_call_operand.vmem [shape: f32[1,32], index: 6, kind: input, shape index: {}]   ;;  %s2199_s7 = inlined_call_operand.vmem [shape: f32[1,32], index: 7, kind: input, shape index: {}]   ;;  %s2200_s8 = inlined_call_operand.vmem [shape: f32[1,32], index: 8, kind: input, shape index: {}]   ;;  %s2201_s9 = inlined_call_operand.vmem [shape: bf16[32,128], index: 9, kind: input, shape index: {}]   ;;  %s2202_s10 = inlined_call_operand.vmem [shape: f32[1,128], index: 10, kind: input, shape index: {}]   ;;  %s2203_s11 = inlined_call_operand.vmem [shape: bf16[128,32], index: 11, kind: input, shape index: {}]   ;;  %s2204_s12 = inlined_call_operand.vmem [shape: f32[1,32], index: 12, kind: input, shape index: {}]   ;;  %s2205_s13 = inlined_call_operand.vmem [shape: bf16[2,24,32], index: 13, kind: output, shape index: {}]  }
   0x1 LB: > { %s1502_s26 = sadd.s32 4294967295, %s1770_s25   ;;  %p1506_p0 = scmp.ge.s32.totalorder %s1770_s25, 1  ;;  %s1770_s25 = sphi %s1857_s25, %s23_s25  }
   0x2   : > { %p387_p1 = scmp.lt.s32.totalorder %s1770_s25, 3 }
   0x4   : > { %p388_p2 = pnand %p1506_p0, %p387_p1 }
   0x5   : > { %p431_p3 = scmp.lt.s32.totalorder (!%p388_p2), %s1502_s26, 1  ;;  %s1773_s24 = smov (!%p388_p2), 96  }
   0x6   : > { %391 = sbr.rel (%p388_p2) target bundleno = 2054 (0x806), region = 72  ;;  %s1774_s28 = smov (!%p388_p2), 88  }
   0x7   : > { %s1775_s29 = smov (!%p388_p2), 120   ;;  %s1777_s14 = smov (!%p388_p2), 72  }
   0x8   : > { %s1778_s15 = smov (!%p388_p2), 112   ;;  %s1779_s16 = smov (!%p388_p2), 104  }
   0x9   : > { %s1780_s17 = smov (!%p388_p2), 64   ;;  %s1781_s18 = smov (!%p388_p2), 56  }
   0xa   : > { %s1782_s19 = smov (!%p388_p2), 40   ;;  %s1783_s20 = smov (!%p388_p2), 48  }
   0xb   : > { %s2207_s26 = smov (!%p431_p3, %s1502_s26), 1  ;;  %vm450_vm0 = vcmask 261120   ;;  %v1772_v8 = vmov 32.0   ;;  %v1610_v30 = vld [vmem:[%s2195_s3 + $0x8] sm:$0xff]  ;;  %v1609_v31 = vld [vmem:[%s2195_s3] sm:$0xff]  ;;  %vm591_vm11 = vcmask 64512  }
   0xc   : > { %s1629_s27 = smul.u32 12, %s2207_s26  ;;  %1696 = vrcp.f32 %v1772_v8  ;;  %1627 = vmatpush.bf16.msra.mxu2 %v1610_v30  ;;  %570 = vmatpush.bf16.msra.mxu0 %v1610_v30  ;;  %v1688_v49 = vld [vmem:[%s2193_s1] ss:$0 sm:$0xff]  ;;  %vm633_vm12 = vcmask 195584   ;;  %s1784_s21 = smov 8   ;;  %vm1140_vm13 = vcmask 130048  }
   0xd   : > { %v1689_v53 = vld [vmem:[%s2194_s2] ss:$0 sm:$0xff]  ;;  %s1785_s22 = smov 24   ;;  %s1786_s23 = smov 16  }
   0xe   : > { %s435_s30 = scalar_lea.vmem %s2192_s0, %s1629_s27 }
   0xf   : > { %v444_v0 = vld [vmem:[%s435_s30 + $0x8] sm:$0xf]  ;;  %v1624_v1 = vld [vmem:[%s435_s30] sm:$0xff]   ;;  %s1776_s30 = smov 80  }
  0x10   : > { %v1873_v2 = vunpack.c.l.bf16 %v444_v0  ;;  %v1875_v3 = vunpack.c.h.bf16 %v1624_v1  ;;  %v1881_v6 = vunpack.c.l.bf16 %v1624_v1  ;;  %1628 = vmatpush.bf16.msra.mxu2 %v1609_v31  ;;  %571 = vmatpush.bf16.msra.mxu0 %v1609_v31 }
  0x12   : > { %v457_v4 = vsel %vm450_vm0, %v1873_v2, 0.0  ;;  %v454_v5 = vsel %vm450_vm0, %v1875_v3, 0.0  ;;  %v451_v7 = vsel %vm450_vm0, %v1881_v6, 0.0  ;;  %v1697_v9 = vpop.eup %1696 }
  0x13   : > { %458 = vadd.xlane.f32.xlu0 %v457_v4  ;;  %455 = vadd.xlane.f32.xlu1 %v454_v5  ;;  %v461_v10 = vmul.f32 32.0, %v1697_v9  ;;  %vm465_vm1 = vweird.f32 %v1697_v9 }
  0x15   : > { %v462_v11 = vsub.f32 1.0, %v461_v10 }
  0x17   : > { %v463_v12 = vmul.f32 %v1697_v9, %v462_v11 }
  0x19   : > { %v464_v13 = vadd.f32 %v1697_v9, %v463_v12 }
  0x1b   : > { %452 = vadd.xlane.f32.xlu0 %v451_v7  ;;  %v1885_v14 = vsel %vm465_vm1, %v1697_v9, %v464_v13 }
  0x86   : > { %v459_v15 = vpop.xlane.xlu0 %458  ;;  %v456_v19 = vpop.xlane.xlu1 %455 }
  0x87   : > { %v469_v16 = vmul.f32 %v1885_v14, %v459_v15  ;;  %v468_v23 = vmul.f32 %v1885_v14, %v456_v19  ;;  %v1690_v15 = vld [vmem:[%s2196_s4] ss:$0 sm:$0xff] }
  0x89   : > { %v472_v17 = vsub.f32 %v1873_v2, %v469_v16  ;;  %v1894_v25 = vsub.f32 %v1875_v3, %v468_v23 }
  0x8b   : > { %v475_v18 = vmul.f32 %v472_v17, %v472_v17  ;;  %v474_v28 = vmul.f32 %v1894_v25, %v1894_v25 }
  0x8d   : > { %v482_v20 = vsel %vm450_vm0, %v475_v18, 0.0  ;;  %v479_v29 = vsel %vm450_vm0, %v474_v28, 0.0 }
  0x8e   : > { %483 = vadd.xlane.f32.xlu1 %v482_v20  ;;  %v453_v21 = vpop.xlane.xlu0 %452 }
  0x8f   : > { %v467_v22 = vmul.f32 %v1885_v14, %v453_v21 }
  0x91   : > { %v470_v24 = vsub.f32 %v1881_v6, %v467_v22 }
  0x93   : > { %v473_v26 = vmul.f32 %v470_v24, %v470_v24 }
  0x95   : > { %v476_v27 = vsel %vm450_vm0, %v473_v26, 0.0 }
  0x96   : > { %477 = vadd.xlane.f32.xlu2 %v476_v27 }
  0x9e   : > { %480 = vadd.xlane.f32.xlu2 %v479_v29 }
 0x101   : > { %v484_v32 = vpop.xlane.xlu1 %483 }
 0x102   : > { %v487_v33 = vmul.f32 %v484_v32, %v1885_v14 }
 0x104   : > { %v490_v34 = vadd.f32 1e-05, %v487_v33 }
 0x106   : > { %1698 = vrsqrt.f32 %v490_v34  ;;  %vm517_vm3 = vweird.f32 %v490_v34 }
 0x109   : > { %v478_v35 = vpop.xlane.xlu2 %477 }
 0x10a   : > { %v485_v36 = vmul.f32 %v478_v35, %v1885_v14 }
 0x10c   : > { %v1699_v37 = vpop.eup %1698  ;;  %v488_v38 = vadd.f32 1e-05, %v485_v36 }
 0x10d   : > { %v512_v39 = vmul.f32 %v1699_v37, %v490_v34  ;;  %vm518_vm2 = vweird.f32 %v1699_v37 }
 0x10e   : > { %1700 = vrsqrt.f32 %v488_v38  ;;  %vm519_vm4 = vmor %vm517_vm3, %vm518_vm2  ;;  %vm497_vm6 = vweird.f32 %v488_v38 }
 0x10f   : > { %v513_v40 = vmul.f32 %v1699_v37, %v512_v39 }
 0x111   : > { %v514_v41 = vmul.f32 0.5, %v513_v40  ;;  %v481_v42 = vpop.xlane.xlu2 %480 }
 0x112   : > { %v486_v43 = vmul.f32 %v481_v42, %v1885_v14 }
 0x113   : > { %v515_v44 = vsub.f32 1.5, %v514_v41 }
 0x114   : > { %v1701_v45 = vpop.eup %1700  ;;  %v489_v46 = vadd.f32 1e-05, %v486_v43 }
 0x115   : > { %v516_v47 = vmul.f32 %v1699_v37, %v515_v44  ;;  %v492_v48 = vmul.f32 %v1701_v45, %v488_v38  ;;  %vm498_vm5 = vweird.f32 %v1701_v45 }
 0x116   : > { %1702 = vrsqrt.f32 %v489_v46  ;;  %vm499_vm7 = vmor %vm497_vm6, %vm498_vm5  ;;  %vm507_vm9 = vweird.f32 %v489_v46 }
 0x117   : > { %v520_v50 = vsel %vm519_vm4, %v1699_v37, %v516_v47  ;;  %v493_v51 = vmul.f32 %v1701_v45, %v492_v48 }
 0x118   : > { %v523_v52 = vmul.f32 %v520_v50, %v472_v17 }
 0x119   : > { %v494_v54 = vmul.f32 0.5, %v493_v51 }
 0x11a   : > { %v529_v55 = vmul.f32 %v1688_v49, %v523_v52 }
 0x11b   : > { %v495_v56 = vsub.f32 1.5, %v494_v54 }
 0x11c   : > { %v1703_v57 = vpop.eup %1702  ;;  %v535_v58 = vadd.f32 %v1689_v53, %v529_v55 }
 0x11d   : > { %v496_v59 = vmul.f32 %v1701_v45, %v495_v56  ;;  %v502_v60 = vmul.f32 %v1703_v57, %v489_v46  ;;  %vm508_vm8 = vweird.f32 %v1703_v57 }
 0x11e   : > { %v537_v61 = vpack.c.bf16 %v535_v58, %v535_v58  ;;  %vm509_vm10 = vmor %vm507_vm9, %vm508_vm8 }
 0x11f   : > { %v503_v62 = vmul.f32 %v1703_v57, %v502_v60  ;;  %v500_v63 = vsel %vm499_vm7, %v1701_v45, %v496_v59 }
 0x120   : > { %1518 = vmatmul.msk.bf16.vlgmr.msra.gmra.mxu2 %vm450_vm0, %v537_v61  ;;  %v521_v4 = vmul.f32 %v500_v63, %v470_v24 }
 0x121   : > { %v504_v0 = vmul.f32 0.5, %v503_v62 }
 0x122   : > { %v527_v9 = vmul.f32 %v1688_v49, %v521_v4 }
 0x123   : > { %v505_v1 = vsub.f32 1.5, %v504_v0 }
 0x124   : > { %v533_v11 = vadd.f32 %v1689_v53, %v527_v9 }
 0x125   : > { %v506_v5 = vmul.f32 %v1703_v57, %v505_v1 }
 0x127   : > { %v510_v7 = vsel %vm509_vm10, %v1703_v57, %v506_v5 }
 0x128   : > { %v522_v8 = vmul.f32 %v510_v7, %v1894_v25 }
 0x12a   : > { %v528_v10 = vmul.f32 %v1688_v49, %v522_v8 }
 0x12c   : > { %v534_v12 = vadd.f32 %v1689_v53, %v528_v10 }
 0x12e   : > { %v536_v13 = vpack.c.bf16 %v534_v12, %v533_v11 }
 0x130   : > { %1517 = vmatmul.msk.bf16.vlgmr.msra.gmra.mxu0 %vm450_vm0, %v536_v13 }
 0x1a3   : > { %v578_v16 = vpop.f32.mrf.mxu2 }
 0x1a4   : > { %v1921_v17 = vadd.f32 %v1690_v15, %v578_v16 }
 0x1a6   : > { %589 = vrot.lane.b32.xlu0 %v1921_v17, %s1773_s24 }
 0x1ab   : > { %v580_v18 = vpop.f32.mrf.mxu2 }
 0x1ad   : > { %v573_v19 = vpop.f32.mrf.mxu0 }
 0x1ae   : > { %v1924_v20 = vadd.f32 %v1690_v15, %v573_v19  ;;  %721 = vrot.lane.b32.xlu0 %v1921_v17, %s1774_s28 }
 0x1b0   : > { %585 = vrot.lane.b32.xlu2 %v1924_v20, %s1773_s24 }
 0x1b5   : > { %v575_v21 = vpop.f32.mrf.mxu0 }
 0x1b6   : > { %v576_v22 = vadd.f32 %v1690_v15, %v575_v21  ;;  %711 = vrot.lane.b32.xlu0 %v1924_v20, %s1775_s29 }
 0x1b8   : > { %587 = vrot.lane.b32.xlu1 %v576_v22, %s1773_s24  ;;  %719 = vrot.lane.b32.xlu2 %v576_v22, %s1774_s28  ;;  %v1941_v23 = vpack.i.bf16 %v576_v22, %v1921_v17 }
 0x1be   : > { %851 = vrot.lane.b32.xlu0 %v1921_v17, %s1776_s30 }
 0x1c0   : > { %717 = vrot.lane.b32.xlu1 %v1924_v20, %s1774_s28  ;;  %713 = vrot.lane.b32.xlu2 %v576_v22, %s1775_s29 }
 0x1c6   : > { %979 = vrot.lane.b32.xlu0 %v576_v22, %s1777_s14 }
 0x1c8   : > { %715 = vrot.lane.b32.xlu1 %v1921_v17, %s1775_s29  ;;  %981 = vrot.lane.b32.xlu2 %v1921_v17, %s1777_s14 }
 0x1ce   : > { %841 = vrot.lane.b32.xlu0 %v1924_v20, %s1778_s15 }
 0x1d0   : > { %849 = vrot.lane.b32.xlu1 %v576_v22, %s1776_s30  ;;  %847 = vrot.lane.b32.xlu2 %v1924_v20, %s1776_s30 }
 0x1d6   : > { %973 = vrot.lane.b32.xlu0 %v576_v22, %s1779_s16 }
 0x1d8   : > { %977 = vrot.lane.b32.xlu1 %v1924_v20, %s1777_s14  ;;  %971 = vrot.lane.b32.xlu2 %v1924_v20, %s1779_s16 }
 0x1e0   : > { %843 = vrot.lane.b32.xlu1 %v576_v22, %s1778_s15  ;;  %845 = vrot.lane.b32.xlu2 %v1921_v17, %s1778_s15 }
 0x1e8   : > { %975 = vrot.lane.b32.xlu1 %v1921_v17, %s1779_s16  ;;  %667 = vrot.lane.b32.xlu2 %v1924_v20, %s1780_s17 }
 0x1f0   : > { %1654 = vrot.lane.b32.xlu1 %v1941_v23, %s1780_s17 }
 0x20a   : > { %v586_v24 = vpop.permute.xlu2 %585 }
 0x212   : > { %v720_v25 = vpop.permute.xlu2 %719 }
 0x218   : > { %v590_v26 = vpop.permute.xlu0 %589 }
 0x219   : > { %1519 = vmatpush.xpose.msk.msra.mxu1 %vm591_vm11, %v590_v26 }
 0x21a   : > { %v714_v27 = vpop.permute.xlu2 %713 }
 0x220   : > { %v722_v28 = vpop.permute.xlu0 %721 }
 0x221   : > { %1528 = vmatpush.xpose.msk.msra.mxu3 %vm591_vm11, %v722_v28 }
 0x222   : > { %v982_v29 = vpop.permute.xlu2 %981 }
 0x223   : > { %1546 = vmatpush.xpose.msk.msrb.mxu0 %vm591_vm11, %v982_v29 }
 0x225   : > { %1529 = vmatpush.xpose.msk.msra.mxu3 %vm591_vm11, %v720_v25 }
 0x228   : > { %v712_v30 = vpop.permute.xlu0 %711 }
 0x22a   : > { %v588_v31 = vpop.permute.xlu1 %587  ;;  %v848_v37 = vpop.permute.xlu2 %847 }
 0x22b   : > { %1520 = vmatpush.xpose.msk.msra.mxu1 %vm591_vm11, %v588_v31 }
 0x22f   : > { %1521 = vmatpush.xpose.msk.msra.mxu1 %vm591_vm11, %v586_v24 }
 0x230   : > { %v852_v32 = vpop.permute.xlu0 %851 }
 0x232   : > { %v718_v33 = vpop.permute.xlu1 %717  ;;  %1522 = vmatmul.msk.f32.vlgmr.msra.gmra.mxu1 %vm591_vm11, %v1924_v20  ;;  %v972_v40 = vpop.permute.xlu2 %971 }
 0x233   : > { %1537 = vmatpush.xpose.msk.msrb.mxu1 %vm591_vm11, %v852_v32  ;;  %1530 = vmatpush.xpose.msk.msra.mxu3 %vm591_vm11, %v718_v33 }
 0x236   : > { %1531 = vmatmul.msk.f32.vlgmr.msra.gmra.mxu3 %vm591_vm11, %v712_v30 }
 0x238   : > { %v980_v34 = vpop.permute.xlu0 %979 }
 0x239   : > { %1547 = vmatpush.xpose.msk.msrb.mxu0 %vm591_vm11, %v980_v34 }
 0x23a   : > { %v716_v35 = vpop.permute.xlu1 %715  ;;  %1523 = vmatmul.msk.f32.gmra.mxu1 %vm591_vm11, %v576_v22  ;;  %v846_v43 = vpop.permute.xlu2 %845 }
 0x23e   : > { %1532 = vmatmul.msk.f32.gmra.mxu3 %vm591_vm11, %v714_v27 }
 0x240   : > { %v842_v38 = vpop.permute.xlu0 %841 }
 0x242   : > { %v850_v36 = vpop.permute.xlu1 %849  ;;  %1524 = vmatmul.msk.f32.gmra.mxu1 %vm591_vm11, %v1921_v17  ;;  %v668_v48 = vpop.permute.xlu2 %667 }
 0x243   : > { %1538 = vmatpush.xpose.msk.msrb.mxu1 %vm591_vm11, %v850_v36 }
 0x246   : > { %1533 = vmatmul.msk.f32.gmra.mxu3 %vm591_vm11, %v716_v35 }
 0x247   : > { %1539 = vmatpush.xpose.msk.msrb.mxu1 %vm591_vm11, %v848_v37 }
 0x248   : > { %v974_v42 = vpop.permute.xlu0 %973 }
 0x24a   : > { %v978_v39 = vpop.permute.xlu1 %977  ;;  %1540 = vmatmul.msk.f32.vlgmr.msrb.gmra.mxu1 %vm591_vm11, %v842_v38 }
 0x24b   : > { %1548 = vmatpush.xpose.msk.msrb.mxu0 %vm591_vm11, %v978_v39 }
 0x24e   : > { %1549 = vmatmul.msk.f32.vlgmr.msrb.gmra.mxu0 %vm591_vm11, %v972_v40 }
 0x252   : > { %v844_v41 = vpop.permute.xlu1 %843 }
 0x253   : > { %1541 = vmatmul.msk.f32.gmra.mxu1 %vm591_vm11, %v844_v41 }
 0x256   : > { %1550 = vmatmul.msk.f32.gmra.mxu0 %vm591_vm11, %v974_v42 }
 0x25a   : > { %v976_v44 = vpop.permute.xlu1 %975 }
 0x25b   : > { %1542 = vmatmul.msk.f32.gmra.mxu1 %vm591_vm11, %v846_v43 }
 0x25e   : > { %1551 = vmatmul.msk.f32.gmra.mxu0 %vm591_vm11, %v976_v44 }
 0x262   : > { %v1655_v45 = vpop.permute.xlu1 %1654 }
 0x263   : > { %v1656_v46 = vunpack.i.l.bf16 %v1655_v45  ;;  %v1657_v47 = vunpack.i.h.bf16 %v1655_v45 }
 0x265   : > { %698 = vmatpush.msrb.mxu2 %v1656_v46 }
 0x267   : > { %699 = vmatpush.msrb.mxu2 %v1657_v47 }
 0x269   : > { %700 = vmatpush.msrb.mxu2 %v668_v48 }
 0x2af   : > { %v621_v49 = vpop.f32.mrf.mxu1 }
 0x2b0   : > { %v630_v50 = vmul.f32 0.35355338, %v621_v49 }
 0x2b2   : > { %v634_v51 = vsel %vm633_vm12, %v630_v50, -inf }
 0x2b3   : > { %635 = vmax.xlane.f32.xlu0 %v634_v51 }
 0x2b7   : > { %v624_v52 = vpop.f32.mrf.mxu1 }
 0x2b8   : > { %v631_v62 = vmul.f32 0.35355338, %v624_v52 }
 0x2b9   : > { %v752_v53 = vpop.f32.mrf.mxu3 }
 0x2ba   : > { %v761_v54 = vmul.f32 0.35355338, %v752_v53  ;;  %v637_v0 = vsel %vm633_vm12, %v631_v62, -inf }
 0x2bc   : > { %v764_v55 = vsel %vm633_vm12, %v761_v54, -inf }
 0x2bd   : > { %765 = vmax.xlane.f32.xlu0 %v764_v55 }
 0x2bf   : > { %v627_v56 = vpop.f32.mrf.mxu1 }
 0x2c0   : > { %v1972_v57 = vmul.f32 0.35355338, %v627_v56 }
 0x2c1   : > { %v755_v10 = vpop.f32.mrf.mxu3 }
 0x2c2   : > { %v640_v58 = vsel %vm633_vm12, %v1972_v57, -inf  ;;  %v762_v11 = vmul.f32 0.35355338, %v755_v10 }
 0x2c3   : > { %641 = vmax.xlane.f32.xlu1 %v640_v58 }
 0x2c4   : > { %v767_v13 = vsel %vm633_vm12, %v762_v11, -inf }
 0x2c7   : > { %v882_v7 = vpop.f32.mrf.mxu1 }
 0x2c8   : > { %v1987_v12 = vmul.f32 0.35355338, %v882_v7 }
 0x2c9   : > { %v758_v19 = vpop.f32.mrf.mxu3 }
 0x2ca   : > { %v894_v15 = vsel %vm633_vm12, %v1987_v12, -inf  ;;  %v1997_v21 = vmul.f32 0.35355338, %v758_v19 }
 0x2cb   : > { %v1012_v59 = vpop.f32.mrf.mxu0 }
 0x2cc   : > { %v1021_v60 = vmul.f32 0.35355338, %v1012_v59  ;;  %v770_v22 = vsel %vm633_vm12, %v1997_v21, -inf }
 0x2ce   : > { %v1024_v61 = vsel %vm633_vm12, %v1021_v60, -inf }
 0x2cf   : > { %1025 = vmax.xlane.f32.xlu2 %v1024_v61 }
 0x2d0   : > { %v885_v16 = vpop.f32.mrf.mxu1 }
 0x2d1   : > { %v1992_v17 = vmul.f32 0.35355338, %v885_v16 }
 0x2d3   : > { %v1015_v63 = vpop.f32.mrf.mxu0  ;;  %v897_v18 = vsel %vm633_vm12, %v1992_v17, -inf }
 0x2d4   : > { %v1978_v1 = vmul.f32 0.35355338, %v1015_v63 }
 0x2d6   : > { %v1027_v8 = vsel %vm633_vm12, %v1978_v1, -inf }
 0x2d7   : > { %638 = vmax.xlane.f32.xlu2 %v637_v0 }
 0x2d8   : > { %v888_v24 = vpop.f32.mrf.mxu1 }
 0x2d9   : > { %v2001_v25 = vmul.f32 0.35355338, %v888_v24 }
 0x2db   : > { %v1018_v4 = vpop.f32.mrf.mxu0  ;;  %v900_v26 = vsel %vm633_vm12, %v2001_v25, -inf }
 0x2dc   : > { %v1980_v5 = vmul.f32 0.35355338, %v1018_v4  ;;  %1659 = vrot.lane.b32.xlu1 %v1941_v23, %s1781_s18 }
 0x2de   : > { %v1030_v9 = vsel %vm633_vm12, %v1980_v5, -inf }
 0x2df   : > { %1028 = vmax.xlane.f32.xlu2 %v1027_v8  ;;  %1031 = vmax.xlane.f32.xlu0 %v1030_v9 }
 0x2e7   : > { %768 = vmax.xlane.f32.xlu2 %v767_v13  ;;  %895 = vmax.xlane.f32.xlu0 %v894_v15 }
 0x2ef   : > { %898 = vmax.xlane.f32.xlu0 %v897_v18 }
 0x2ff   : > { %797 = vrot.lane.b32.xlu2 %v1924_v20, %s1781_s18  ;;  %s440_s18 = scalar_lea.vmem %s2205_s13, %s1629_s27 }
 0x306   : > { %771 = vmax.xlane.f32.xlu1 %v770_v22 }
 0x30e   : > { %901 = vmax.xlane.f32.xlu1 %v900_v26 }
 0x326   : > { %v636_v27 = vpop.xlane.xlu0 %635 }
 0x327   : > { %v643_v28 = vsub.f32 %v630_v50, %v636_v27 }
 0x329   : > { %v646_v29 = vmul.f32 1.442695, %v643_v28 }
 0x32b   : > { %1704 = vpow2.f32 %v646_v29 }
 0x330   : > { %v766_v32 = vpop.xlane.xlu0 %765 }
 0x331   : > { %v2005_v30 = vpop.eup %1704  ;;  %v773_v35 = vsub.f32 %v761_v54, %v766_v32 }
 0x332   : > { %v652_v31 = vsel %vm633_vm12, %v2005_v30, 0.0 }
 0x333   : > { %653 = vadd.xlane.f32.xlu1 %v652_v31  ;;  %v776_v38 = vmul.f32 1.442695, %v773_v35 }
 0x336   : > { %v642_v37 = vpop.xlane.xlu1 %641 }
 0x337   : > { %v645_v53 = vsub.f32 %v1972_v57, %v642_v37 }
 0x339   : > { %v650_v56 = vmul.f32 1.442695, %v645_v53 }
 0x342   : > { %v1026_v33 = vpop.xlane.xlu2 %1025 }
 0x343   : > { %v1033_v34 = vsub.f32 %v1021_v60, %v1026_v33 }
 0x345   : > { %v1036_v36 = vmul.f32 1.442695, %v1033_v34 }
 0x347   : > { %1706 = vpow2.f32 %v1036_v36 }
 0x348   : > { %1708 = vpow2.f32 %v776_v38 }
 0x34a   : > { %v639_v39 = vpop.xlane.xlu2 %638 }
 0x34b   : > { %v644_v41 = vsub.f32 %v631_v62, %v639_v39 }
 0x34c   : > { %1669 = vrot.lane.b32.xlu1 %v1941_v23, %s1782_s19 }
 0x34d   : > { %v2011_v40 = vpop.eup %1706  ;;  %v648_v45 = vmul.f32 1.442695, %v644_v41 }
 0x34e   : > { %v1660_v42 = vpop.permute.xlu1 %1659  ;;  %v1042_v43 = vsel %vm633_vm12, %v2011_v40, 0.0  ;;  %v2015_v48 = vpop.eup %1708 }
 0x34f   : > { %v1661_v44 = vunpack.i.l.bf16 %v1660_v42  ;;  %1043 = vadd.xlane.f32.xlu0 %v1042_v43  ;;  %v1662_v46 = vunpack.i.h.bf16 %v1660_v42  ;;  %1710 = vpow2.f32 %v648_v45  ;;  %v782_v49 = vsel %vm633_vm12, %v2015_v48, 0.0 }
 0x351   : > { %828 = vmatpush.msra.mxu2 %v1661_v44 }
 0x352   : > { %v1029_v47 = vpop.xlane.xlu2 %1028 }
 0x353   : > { %829 = vmatpush.msra.mxu2 %v1662_v46  ;;  %v1034_v59 = vsub.f32 %v1978_v1, %v1029_v47 }
 0x355   : > { %v2019_v51 = vpop.eup %1710  ;;  %v1038_v62 = vmul.f32 1.442695, %v1034_v59 }
 0x356   : > { %v655_v55 = vsel %vm633_vm12, %v2019_v51, 0.0 }
 0x357   : > { %783 = vadd.xlane.f32.xlu0 %v782_v49 }
 0x35a   : > { %v769_v50 = vpop.xlane.xlu2 %768 }
 0x35b   : > { %v774_v52 = vsub.f32 %v762_v11, %v769_v50  ;;  %v1032_v11 = vpop.xlane.xlu0 %1031 }
 0x35c   : > { %v1035_v26 = vsub.f32 %v1980_v5, %v1032_v11 }
 0x35d   : > { %v778_v54 = vmul.f32 1.442695, %v774_v52 }
 0x35e   : > { %v1040_v29 = vmul.f32 1.442695, %v1035_v26 }
 0x35f   : > { %1712 = vpow2.f32 %v778_v54  ;;  %656 = vadd.xlane.f32.xlu0 %v655_v55 }
 0x360   : > { %1714 = vpow2.f32 %v650_v56 }
 0x361   : > { %1716 = vpow2.f32 %v1038_v62 }
 0x362   : > { %v798_v58 = vpop.permute.xlu2 %797 }
 0x363   : > { %830 = vmatpush.msra.mxu2 %v798_v58  ;;  %v896_v13 = vpop.xlane.xlu0 %895 }
 0x364   : > { %v903_v15 = vsub.f32 %v1987_v12, %v896_v13 }
 0x365   : > { %v2025_v60 = vpop.eup %1712 }
 0x366   : > { %v785_v61 = vsel %vm633_vm12, %v2025_v60, 0.0  ;;  %v2029_v57 = vpop.eup %1714  ;;  %v906_v18 = vmul.f32 1.442695, %v903_v15 }
 0x367   : > { %786 = vadd.xlane.f32.xlu0 %v785_v61  ;;  %v658_v63 = vsel %vm633_vm12, %v2029_v57, 0.0  ;;  %v2033_v0 = vpop.eup %1716 }
 0x368   : > { %v1045_v1 = vsel %vm633_vm12, %v2033_v0, 0.0 }
 0x36b   : > { %v899_v19 = vpop.xlane.xlu0 %898 }
 0x36f   : > { %659 = vadd.xlane.f32.xlu0 %v658_v63 }
 0x376   : > { %1046 = vadd.xlane.f32.xlu1 %v1045_v1 }
 0x379   : > { %v772_v4 = vpop.xlane.xlu1 %771 }
 0x37a   : > { %v775_v7 = vsub.f32 %v1997_v21, %v772_v4  ;;  %v904_v21 = vsub.f32 %v1992_v17, %v899_v19 }
 0x37c   : > { %v780_v8 = vmul.f32 1.442695, %v775_v7  ;;  %v908_v22 = vmul.f32 1.442695, %v904_v21 }
 0x37e   : > { %1718 = vpow2.f32 %v780_v8 }
 0x37f   : > { %1720 = vpow2.f32 %v906_v18 }
 0x381   : > { %v902_v16 = vpop.xlane.xlu1 %901 }
 0x382   : > { %v905_v32 = vsub.f32 %v2001_v25, %v902_v16 }
 0x383   : > { %1664 = vrot.lane.b32.xlu0 %v1941_v23, %s1783_s20 }
 0x384   : > { %v2039_v9 = vpop.eup %1718  ;;  %v910_v34 = vmul.f32 1.442695, %v905_v32  ;;  %v1612_v32 = vld [vmem:[%s2197_s5 + $0x8] sm:$0xff] }
 0x385   : > { %v788_v10 = vsel %vm633_vm12, %v2039_v9, 0.0  ;;  %v2048_v24 = vpop.eup %1720  ;;  %1181 = vmatpush.bf16.msra.mxu1 %v1612_v32 }
 0x386   : > { %789 = vadd.xlane.f32.xlu2 %v788_v10  ;;  %v912_v12 = vsel %vm633_vm12, %v2048_v24, 0.0 }
 0x39e   : > { %927 = vrot.lane.b32.xlu2 %v1924_v20, %s1783_s20 }
 0x3a6   : > { %1057 = vrot.lane.b32.xlu2 %v1924_v20, %s1782_s19  ;;  %v654_v23 = vpop.xlane.xlu1 %653 }
 0x3a7   : > { %1722 = vrcp.f32 %v654_v23 }
 0x3a8   : > { %1724 = vpow2.f32 %v908_v22 }
 0x3a9   : > { %1726 = vpow2.f32 %v1040_v29 }
 0x3aa   : > { %1728 = vpow2.f32 %v910_v34 }
 0x3ad   : > { %v1723_v27 = vpop.eup %1722  ;;  %913 = vadd.xlane.f32.xlu0 %v912_v12 }
 0x3ae   : > { %v664_v28 = vmul.f32 %v1723_v27, %v2005_v30  ;;  %v2055_v17 = vpop.eup %1724 }
 0x3af   : > { %v915_v20 = vsel %vm633_vm12, %v2055_v17, 0.0  ;;  %v2059_v31 = vpop.eup %1726 }
 0x3b0   : > { %1525 = vmatmul.msk.f32.vlgmr.msrb.gmra.mxu2 %vm633_vm12, %v664_v28  ;;  %v1048_v5 = vsel %vm633_vm12, %v2059_v31, 0.0  ;;  %v2064_v38 = vpop.eup %1728 }
 0x3b1   : > { %v918_v39 = vsel %vm633_vm12, %v2064_v38, 0.0 }
 0x3b5   : > { %916 = vadd.xlane.f32.xlu0 %v915_v20 }
 0x3bd   : > { %1049 = vadd.xlane.f32.xlu0 %v1048_v5 }
 0x3be   : > { %v1670_v33 = vpop.permute.xlu1 %1669 }
 0x3bf   : > { %v1671_v30 = vunpack.i.l.bf16 %v1670_v33  ;;  %v1672_v35 = vunpack.i.h.bf16 %v1670_v33  ;;  %v1611_v33 = vld [vmem:[%s2197_s5] sm:$0xff] }
 0x3c0   : > { %1182 = vmatpush.bf16.msra.mxu1 %v1611_v33 }
 0x3c1   : > { %1088 = vmatpush.msrb.mxu2 %v1671_v30 }
 0x3c2   : > { %v1044_v36 = vpop.xlane.xlu0 %1043 }
 0x3c3   : > { %1089 = vmatpush.msrb.mxu2 %v1672_v35 }
 0x3ca   : > { %v784_v37 = vpop.xlane.xlu0 %783 }
 0x3cf   : > { %919 = vadd.xlane.f32.xlu2 %v918_v39 }
 0x3d2   : > { %v657_v41 = vpop.xlane.xlu0 %656 }
 0x3d3   : > { %1730 = vrcp.f32 %v657_v41 }
 0x3d9   : > { %v1731_v42 = vpop.eup %1730 }
 0x3da   : > { %v787_v25 = vpop.xlane.xlu0 %786  ;;  %v665_v43 = vmul.f32 %v1731_v42, %v2019_v51 }
 0x3dc   : > { %1526 = vmatmul.msk.f32.gmra.mxu2 %vm633_vm12, %v665_v43 }
 0x3e2   : > { %v660_v44 = vpop.xlane.xlu0 %659 }
 0x3e3   : > { %1732 = vrcp.f32 %v660_v44 }
 0x3e4   : > { %1734 = vrcp.f32 %v784_v37 }
 0x3e5   : > { %1736 = vrcp.f32 %v787_v25 }
 0x3e9   : > { %v1733_v45 = vpop.eup %1732 }
 0x3ea   : > { %v666_v46 = vmul.f32 %v1733_v45, %v2029_v57  ;;  %v1735_v47 = vpop.eup %1734 }
 0x3eb   : > { %v794_v49 = vmul.f32 %v1735_v47, %v2015_v48  ;;  %v1737_v53 = vpop.eup %1736  ;;  %v1047_v48 = vpop.xlane.xlu1 %1046 }
 0x3ec   : > { %1527 = vmatmul.msk.f32.gmra.mxu2 %vm633_vm12, %v666_v46  ;;  %v795_v55 = vmul.f32 %v1737_v53, %v2025_v60 }
 0x3f4   : > { %1534 = vmatmul.msk.f32.vlgmr.msra.gmra.mxu2 %vm633_vm12, %v794_v49 }
 0x3f5   : > { %v1665_v50 = vpop.permute.xlu0 %1664 }
 0x3f6   : > { %v1666_v52 = vunpack.i.l.bf16 %v1665_v50  ;;  %v1667_v51 = vunpack.i.h.bf16 %v1665_v50 }
 0x3f8   : > { %958 = vmatpush.msrb.mxu3 %v1666_v52 }
 0x3f9   : > { %v790_v54 = vpop.xlane.xlu2 %789 }
 0x3fa   : > { %1738 = vrcp.f32 %v790_v54  ;;  %959 = vmatpush.msrb.mxu3 %v1667_v51 }
 0x3fb   : > { %1740 = vrcp.f32 %v1044_v36 }
 0x3fc   : > { %1535 = vmatmul.msk.f32.gmra.mxu2 %vm633_vm12, %v795_v55  ;;  %1742 = vrcp.f32 %v1047_v48 }
 0x400   : > { %v1739_v56 = vpop.eup %1738 }
 0x401   : > { %v928_v58 = vpop.permute.xlu2 %927  ;;  %v796_v59 = vmul.f32 %v1739_v56, %v2039_v9  ;;  %v1741_v61 = vpop.eup %1740 }
 0x402   : > { %960 = vmatpush.msrb.mxu3 %v928_v58  ;;  %v1054_v57 = vmul.f32 %v1741_v61, %v2011_v40  ;;  %v1743_v60 = vpop.eup %1742  ;;  %v1691_v58 = vld [vmem:[%s2198_s6] ss:$0 sm:$0xff] }
 0x403   : > { %v1055_v63 = vmul.f32 %v1743_v60, %v2033_v0 }
 0x404   : > { %1536 = vmatmul.msk.f32.gmra.mxu2 %vm633_vm12, %v796_v59 }
 0x409   : > { %v1058_v62 = vpop.permute.xlu2 %1057 }
 0x40a   : > { %1090 = vmatpush.msrb.mxu2 %v1058_v62 }
 0x40c   : > { %1552 = vmatmul.msk.f32.vlgmr.msrb.gmra.mxu2 %vm633_vm12, %v1054_v57 }
 0x414   : > { %1553 = vmatmul.msk.f32.gmra.mxu2 %vm633_vm12, %v1055_v63 }
 0x420   : > { %v914_v1 = vpop.xlane.xlu0 %913 }
 0x421   : > { %1744 = vrcp.f32 %v914_v1 }
 0x427   : > { %v1745_v4 = vpop.eup %1744 }
 0x428   : > { %v917_v7 = vpop.xlane.xlu0 %916  ;;  %v924_v8 = vmul.f32 %v1745_v4, %v2048_v24 }
 0x429   : > { %1746 = vrcp.f32 %v917_v7 }
 0x42a   : > { %1543 = vmatmul.msk.f32.vlgmr.msrb.gmra.mxu3 %vm633_vm12, %v924_v8 }
 0x42f   : > { %v1747_v9 = vpop.eup %1746 }
 0x430   : > { %v1050_v10 = vpop.xlane.xlu0 %1049  ;;  %v925_v40 = vmul.f32 %v1747_v9, %v2055_v17 }
 0x431   : > { %1748 = vrcp.f32 %v1050_v10 }
 0x432   : > { %1544 = vmatmul.msk.f32.gmra.mxu3 %vm633_vm12, %v925_v40 }
 0x433   : > { %v702_v18 = vpop.f32.mrf.mxu2 }
 0x437   : > { %v1749_v11 = vpop.eup %1748 }
 0x438   : > { %v1056_v0 = vmul.f32 %v1749_v11, %v2059_v31 }
 0x43a   : > { %1554 = vmatmul.msk.f32.gmra.mxu2 %vm633_vm12, %v1056_v0 }
 0x442   : > { %v920_v13 = vpop.xlane.xlu2 %919 }
 0x443   : > { %1750 = vrcp.f32 %v920_v13 }
 0x449   : > { %v1751_v15 = vpop.eup %1750 }
 0x44a   : > { %v926_v16 = vmul.f32 %v1751_v15, %v2064_v38 }
 0x44c   : > { %1545 = vmatmul.msk.f32.gmra.mxu3 %vm633_vm12, %v926_v16 }
 0x45f   : > { %v705_v19 = vpop.f32.mrf.mxu2 }
 0x46f   : > { %v708_v21 = vpop.f32.mrf.mxu2 }
 0x477   : > { %v832_v23 = vpop.f32.mrf.mxu2 }
 0x47f   : > { %v835_v22 = vpop.f32.mrf.mxu2 }
 0x480   : > { %v1673_v24 = vpack.i.bf16 %v835_v22, %v832_v23 }
 0x482   : > { %1674 = vrot.lane.b32.xlu0 %v1673_v24, %s1784_s21 }
 0x487   : > { %v838_v26 = vpop.f32.mrf.mxu2 }
 0x488   : > { %1108 = vrot.lane.b32.xlu2 %v838_v26, %s1784_s21  ;;  %v1614_v26 = vld [vmem:[%s2201_s9 + $0x8] sm:$0xff] }
 0x489   : > { %1310 = vmatpush.bf16.msra.mxu3 %v1614_v26 }
 0x48f   : > { %v1092_v12 = vpop.f32.mrf.mxu2 }
 0x497   : > { %v1095_v27 = vpop.f32.mrf.mxu2 }
 0x498   : > { %v1683_v28 = vpack.i.bf16 %v1095_v27, %v1092_v12 }
 0x49a   : > { %1684 = vrot.lane.b32.xlu0 %v1683_v28, %s1785_s22 }
 0x4ad   : > { %v962_v29 = vpop.f32.mrf.mxu3 }
 0x4b5   : > { %v965_v17 = vpop.f32.mrf.mxu3 }
 0x4b6   : > { %v1678_v20 = vpack.i.bf16 %v965_v17, %v962_v29  ;;  %v1613_v29 = vld [vmem:[%s2201_s9] sm:$0xff] }
 0x4b7   : > { %1311 = vmatpush.bf16.msra.mxu3 %v1613_v29 }
 0x4b8   : > { %1679 = vrot.lane.b32.xlu1 %v1678_v20, %s1786_s23 }
 0x4bd   : > { %v1098_v5 = vpop.f32.mrf.mxu2 }
 0x4cf   : > { %v968_v31 = vpop.f32.mrf.mxu3 }
 0x4d0   : > { %1120 = vrot.lane.b32.xlu0 %v968_v31, %s1786_s23 }
 0x4d8   : > { %1132 = vrot.lane.b32.xlu0 %v1098_v5, %s1785_s22 }
 0x4e2   : > { %v1109_v52 = vpop.permute.xlu2 %1108 }
 0x4e3   : > { %v1139_v53 = vsel %vm591_vm11, %v708_v21, %v1109_v52 }
 0x4f4   : > { %v1675_v30 = vpop.permute.xlu0 %1674 }
 0x4f5   : > { %v1677_v34 = vunpack.i.h.bf16 %v1675_v30  ;;  %v1676_v35 = vunpack.i.l.bf16 %v1675_v30 }
 0x4f7   : > { %v1138_v41 = vsel %vm591_vm11, %v705_v19, %v1677_v34  ;;  %v1137_v42 = vsel %vm591_vm11, %v702_v18, %v1676_v35 }
 0x50c   : > { %v1685_v36 = vpop.permute.xlu0 %1684 }
 0x50d   : > { %v1687_v25 = vunpack.i.h.bf16 %v1685_v36  ;;  %v1686_v43 = vunpack.i.l.bf16 %v1685_v36 }
 0x52a   : > { %v1680_v37 = vpop.permute.xlu1 %1679 }
 0x52b   : > { %v1682_v38 = vunpack.i.h.bf16 %v1680_v37  ;;  %v1681_v39 = vunpack.i.l.bf16 %v1680_v37 }
 0x52d   : > { %v1142_v44 = vsel %vm1140_vm13, %v1138_v41, %v1682_v38  ;;  %v1141_v45 = vsel %vm1140_vm13, %v1137_v42, %v1681_v39 }
 0x52e   : > { %v1145_v46 = vsel %vm633_vm12, %v1142_v44, %v1687_v25  ;;  %v1144_v47 = vsel %vm633_vm12, %v1141_v45, %v1686_v43  ;;  %v1692_v25 = vld [vmem:[%s2199_s7] ss:$0 sm:$0xff] }
 0x52f   : > { %v1147_v49 = vpack.c.bf16 %v1145_v46, %v1144_v47 }
 0x531   : > { %1563 = vmatmul.msk.bf16.vlgmr.msra.gmra.mxu1 %vm450_vm0, %v1147_v49  ;;  %v1693_v49 = vld [vmem:[%s2200_s8] ss:$0 sm:$0xff] }
 0x542   : > { %v1121_v50 = vpop.permute.xlu0 %1120 }
 0x543   : > { %v1143_v51 = vsel %vm1140_vm13, %v1139_v53, %v1121_v50 }
 0x54a   : > { %v1133_v54 = vpop.permute.xlu0 %1132 }
 0x54b   : > { %v1146_v55 = vsel %vm633_vm12, %v1143_v51, %v1133_v54 }
 0x54c   : > { %v1148_v56 = vpack.c.bf16 %v1146_v55, %v1146_v55 }
 0x54e   : > { %1564 = vmatmul.msk.bf16.gmra.mxu1 %vm450_vm0, %v1148_v56 }
 0x5ae   : > { %v1184_v59 = vpop.f32.mrf.mxu1 }
 0x5af   : > { %v1185_v48 = vadd.f32 %v1691_v58, %v1184_v59 }
 0x5b1   : > { %v2111_v61 = vadd.f32 %v1881_v6, %v1185_v48 }
 0x5b3   : > { %v1198_v62 = vsel %vm450_vm0, %v2111_v61, 0.0 }
 0x5b4   : > { %1199 = vadd.xlane.f32.xlu1 %v1198_v62 }
 0x5b6   : > { %v1186_v57 = vpop.f32.mrf.mxu1 }
 0x5b7   : > { %v1187_v60 = vadd.f32 %v1691_v58, %v1186_v57 }
 0x5b9   : > { %v2116_v63 = vadd.f32 %v1875_v3, %v1187_v60 }
 0x5bb   : > { %v1201_v1 = vsel %vm450_vm0, %v2116_v63, 0.0 }
 0x5bc   : > { %1202 = vadd.xlane.f32.xlu0 %v1201_v1 }
 0x5cb   : > { %v1189_v4 = vpop.f32.mrf.mxu1 }
 0x5cc   : > { %v1190_v7 = vadd.f32 %v1691_v58, %v1189_v4 }
 0x5ce   : > { %v2121_v8 = vadd.f32 %v1190_v7, %v1873_v2 }
 0x5d0   : > { %v1204_v6 = vsel %vm450_vm0, %v2121_v8, 0.0 }
 0x5d1   : > { %1205 = vadd.xlane.f32.xlu2 %v1204_v6 }
 0x5d3   : > { %v1191_v9 = vpop.f32.mrf.mxu1 }
 0x5d4   : > { %v1622_v9 = vld [vmem:[%s2203_s11 + $0x38] sm:$0xff] }
 0x5d5   : > { %1419 = vmatpush.bf16.msra.mxu0 %v1622_v9 }
 0x627   : > { %v1200_v10 = vpop.xlane.xlu1 %1199 }
 0x628   : > { %v1207_v40 = vmul.f32 %v1200_v10, %v1885_v14  ;;  %v1621_v10 = vld [vmem:[%s2203_s11 + $0x30] sm:$0xff] }
 0x629   : > { %1420 = vmatpush.bf16.msra.mxu0 %v1621_v10 }
 0x62a   : > { %v1210_v3 = vsub.f32 %v2111_v61, %v1207_v40  ;;  %v1620_v40 = vld [vmem:[%s2203_s11 + $0x28] sm:$0xff] }
 0x62c   : > { %v1213_v11 = vmul.f32 %v1210_v3, %v1210_v3 }
 0x62d   : > { %1421 = vmatpush.bf16.msra.mxu0 %v1620_v40 }
 0x62e   : > { %v1216_v0 = vsel %vm450_vm0, %v1213_v11, 0.0  ;;  %v1618_v11 = vld [vmem:[%s2203_s11 + $0x18] sm:$0xff] }
 0x62f   : > { %1217 = vadd.xlane.f32.xlu1 %v1216_v0  ;;  %v1203_v13 = vpop.xlane.xlu0 %1202  ;;  %v1617_v0 = vld [vmem:[%s2203_s11 + $0x10] sm:$0xff] }
 0x630   : > { %v1208_v15 = vmul.f32 %v1203_v13, %v1885_v14  ;;  %v1616_v13 = vld [vmem:[%s2203_s11 + $0x8] sm:$0xff] }
 0x632   : > { %v1211_v2 = vsub.f32 %v2116_v63, %v1208_v15  ;;  %v1694_v15 = vld [vmem:[%s2202_s10] ss:$0 sm:$0xff] }
 0x634   : > { %v1214_v16 = vmul.f32 %v1211_v2, %v1211_v2 }
 0x636   : > { %v1219_v18 = vsel %vm450_vm0, %v1214_v16, 0.0  ;;  %v1615_v16 = vld [vmem:[%s2203_s11] sm:$0xff] }
 0x637   : > { %1220 = vadd.xlane.f32.xlu0 %v1219_v18 }
 0x644   : > { %v1206_v19 = vpop.xlane.xlu2 %1205 }
 0x645   : > { %v1209_v21 = vmul.f32 %v1206_v19, %v1885_v14 }
 0x647   : > { %v1212_v23 = vsub.f32 %v2121_v8, %v1209_v21 }
 0x649   : > { %v1215_v22 = vmul.f32 %v1212_v23, %v1212_v23 }
 0x64b   : > { %v1222_v24 = vsel %vm450_vm0, %v1215_v22, 0.0 }
 0x64c   : > { %1223 = vadd.xlane.f32.xlu1 %v1222_v24 }
 0x6a2   : > { %v1218_v12 = vpop.xlane.xlu1 %1217 }
 0x6a3   : > { %v1225_v27 = vmul.f32 %v1218_v12, %v1885_v14 }
 0x6a5   : > { %v1228_v28 = vadd.f32 1e-05, %v1225_v27 }
 0x6a7   : > { %1752 = vrsqrt.f32 %v1228_v28  ;;  %vm1237_vm15 = vweird.f32 %v1228_v28 }
 0x6aa   : > { %v1221_v17 = vpop.xlane.xlu0 %1220 }
 0x6ab   : > { %v1226_v20 = vmul.f32 %v1221_v17, %v1885_v14 }
 0x6ad   : > { %v1753_v31 = vpop.eup %1752  ;;  %v1229_v5 = vadd.f32 1e-05, %v1226_v20 }
 0x6ae   : > { %v1232_v32 = vmul.f32 %v1753_v31, %v1228_v28  ;;  %vm1238_vm14 = vweird.f32 %v1753_v31 }
 0x6af   : > { %1754 = vrsqrt.f32 %v1229_v5  ;;  %vm1239_vm1 = vmor %vm1237_vm15, %vm1238_vm14  ;;  %vm1247_vm3 = vweird.f32 %v1229_v5 }
 0x6b0   : > { %v1233_v33 = vmul.f32 %v1753_v31, %v1232_v32 }
 0x6b2   : > { %v1234_v30 = vmul.f32 0.5, %v1233_v33 }
 0x6b4   : > { %v1235_v34 = vsub.f32 1.5, %v1234_v30 }
 0x6b5   : > { %v1755_v35 = vpop.eup %1754 }
 0x6b6   : > { %v1236_v36 = vmul.f32 %v1753_v31, %v1235_v34  ;;  %v1242_v37 = vmul.f32 %v1755_v35, %v1229_v5  ;;  %vm1248_vm2 = vweird.f32 %v1755_v35 }
 0x6b7   : > { %vm1249_vm4 = vmor %vm1247_vm3, %vm1248_vm2 }
 0x6b8   : > { %v1243_v38 = vmul.f32 %v1755_v35, %v1242_v37  ;;  %v1240_v39 = vsel %vm1239_vm1, %v1753_v31, %v1236_v36 }
 0x6b9   : > { %v1261_v43 = vmul.f32 %v1240_v39, %v1210_v3  ;;  %v1619_v3 = vld [vmem:[%s2203_s11 + $0x20] sm:$0xff] }
 0x6ba   : > { %v1244_v41 = vmul.f32 0.5, %v1243_v38  ;;  %1422 = vmatpush.bf16.msra.mxu0 %v1619_v3 }
 0x6bb   : > { %v1267_v50 = vmul.f32 %v1692_v25, %v1261_v43 }
 0x6bc   : > { %v1245_v42 = vsub.f32 1.5, %v1244_v41 }
 0x6bd   : > { %v1273_v54 = vadd.f32 %v1693_v49, %v1267_v50 }
 0x6be   : > { %v1246_v44 = vmul.f32 %v1755_v35, %v1245_v42  ;;  %1423 = vmatpush.bf16.msra.mxu0 %v1618_v11 }
 0x6bf   : > { %v1224_v45 = vpop.xlane.xlu1 %1223 }
 0x6c0   : > { %v1250_v46 = vsel %vm1249_vm4, %v1755_v35, %v1246_v44  ;;  %v1227_v47 = vmul.f32 %v1224_v45, %v1885_v14 }
 0x6c1   : > { %v1262_v52 = vmul.f32 %v1250_v46, %v1211_v2 }
 0x6c2   : > { %v1230_v53 = vadd.f32 1e-05, %v1227_v47  ;;  %1424 = vmatpush.bf16.msra.mxu0 %v1617_v0 }
 0x6c3   : > { %v1268_v51 = vmul.f32 %v1692_v25, %v1262_v52 }
 0x6c4   : > { %1756 = vrsqrt.f32 %v1230_v53  ;;  %vm1257_vm6 = vweird.f32 %v1230_v53 }
 0x6c5   : > { %v1274_v55 = vadd.f32 %v1693_v49, %v1268_v51 }
 0x6c6   : > { %1425 = vmatpush.bf16.msra.mxu0 %v1616_v13 }
 0x6c7   : > { %v1276_v56 = vpack.c.bf16 %v1274_v55, %v1273_v54 }
 0x6c9   : > { %1573 = vmatmul.msk.bf16.vlgmr.msra.gmra.mxu3 %vm450_vm0, %v1276_v56 }
 0x6ca   : > { %v1757_v58 = vpop.eup %1756  ;;  %1426 = vmatpush.bf16.msra.mxu0 %v1615_v16 }
 0x6cb   : > { %v1252_v59 = vmul.f32 %v1757_v58, %v1230_v53  ;;  %vm1258_vm5 = vweird.f32 %v1757_v58  ;;  %v1695_v53 = vld [vmem:[%s2204_s12] ss:$0 sm:$0xff] }
 0x6cc   : > { %vm1259_vm7 = vmor %vm1257_vm6, %vm1258_vm5 }
 0x6cd   : > { %v1253_v48 = vmul.f32 %v1757_v58, %v1252_v59 }
 0x6cf   : > { %v1254_v62 = vmul.f32 0.5, %v1253_v48 }
 0x6d1   : > { %v1255_v57 = vsub.f32 1.5, %v1254_v62 }
 0x6d3   : > { %v1256_v14 = vmul.f32 %v1757_v58, %v1255_v57 }
 0x6d5   : > { %v1260_v60 = vsel %vm1259_vm7, %v1757_v58, %v1256_v14 }
 0x6d6   : > { %v1263_v1 = vmul.f32 %v1260_v60, %v1212_v23 }
 0x6d8   : > { %v1269_v4 = vmul.f32 %v1692_v25, %v1263_v1 }
 0x6da   : > { %v1275_v7 = vadd.f32 %v1693_v49, %v1269_v4 }
 0x6dc   : > { %v1277_v6 = vpack.c.bf16 %v1275_v7, %v1275_v7 }
 0x6de   : > { %1574 = vmatmul.msk.bf16.gmra.mxu3 %vm450_vm0, %v1277_v6  ;;  %vm1443_vm0 = vcmask 257024  }
 0x74c   : > { %v1313_v2 = vpop.f32.mrf.mxu3 }
 0x74d   : > { %v1314_v18 = vadd.f32 %v1694_v15, %v1313_v2 }
 0x74f   : > { %v1322_v19 = vmul.f32 %v1314_v18, %v1314_v18 }
 0x751   : > { %v1325_v21 = vmul.f32 %v1322_v19, %v1314_v18 }
 0x753   : > { %v1328_v23 = vmul.f32 0.044715, %v1325_v21 }
 0x754   : > { %v1315_v22 = vpop.f32.mrf.mxu3 }
 0x755   : > { %v1331_v24 = vadd.f32 %v1328_v23, %v1314_v18  ;;  %v1316_v26 = vadd.f32 %v1694_v15, %v1315_v22 }
 0x757   : > { %v1334_v12 = vmul.f32 0.7978846, %v1331_v24  ;;  %v1323_v27 = vmul.f32 %v1316_v26, %v1316_v26 }
 0x759   : > { %v1326_v28 = vmul.f32 %v1323_v27, %v1316_v26  ;;  %1758 = vtanh.f32 %v1334_v12 }
 0x75b   : > { %v1329_v29 = vmul.f32 0.044715, %v1326_v28 }
 0x75d   : > { %v1332_v17 = vadd.f32 %v1329_v29, %v1316_v26 }
 0x75f   : > { %v1335_v20 = vmul.f32 0.7978846, %v1332_v17  ;;  %v1759_v31 = vpop.eup %1758 }
 0x760   : > { %v1340_v33 = vadd.f32 1.0, %v1759_v31 }
 0x761   : > { %1760 = vtanh.f32 %v1335_v20  ;;  %v1318_v5 = vpop.f32.mrf.mxu3 }
 0x762   : > { %v1319_v32 = vadd.f32 %v1694_v15, %v1318_v5  ;;  %v1343_v36 = vmul.f32 0.5, %v1340_v33 }
 0x764   : > { %v1324_v30 = vmul.f32 %v1319_v32, %v1319_v32  ;;  %v1346_v25 = vmul.f32 %v1343_v36, %v1314_v18 }
 0x766   : > { %v1327_v34 = vmul.f32 %v1324_v30, %v1319_v32 }
 0x767   : > { %v1761_v35 = vpop.eup %1760 }
 0x768   : > { %v1341_v37 = vadd.f32 1.0, %v1761_v35  ;;  %v1330_v38 = vmul.f32 0.044715, %v1327_v34 }
 0x769   : > { %v1320_v39 = vpop.f32.mrf.mxu3 }
 0x76a   : > { %v1344_v41 = vmul.f32 0.5, %v1341_v37  ;;  %v1333_v42 = vadd.f32 %v1330_v38, %v1319_v32 }
 0x76c   : > { %v1347_v43 = vmul.f32 %v1344_v41, %v1316_v26  ;;  %v1336_v44 = vmul.f32 0.7978846, %v1333_v42 }
 0x76e   : > { %v1349_v45 = vpack.c.bf16 %v1347_v43, %v1346_v25  ;;  %1762 = vtanh.f32 %v1336_v44 }
 0x770   : > { %1427 = vmatmul.bf16.vlgmr.msra.gmra.mxu0 %v1349_v45 }
 0x774   : > { %v1763_v46 = vpop.eup %1762 }
 0x775   : > { %v1342_v47 = vadd.f32 1.0, %v1763_v46 }
 0x777   : > { %v1345_v49 = vmul.f32 0.5, %v1342_v47 }
 0x779   : > { %v1348_v50 = vmul.f32 %v1345_v49, %v1319_v32 }
 0x77b   : > { %v1350_v52 = vpack.c.bf16 %v1348_v50, %v1348_v50 }
 0x780   : > { %1432 = vmatmul.bf16.gmra.mxu0 %v1350_v52 }
 0x7ed   : > { %v1428_v51 = vpop.f32.mrf.mxu0 }
 0x7ee   : > { %v1429_v54 = vadd.f32 %v1695_v53, %v1428_v51 }
 0x7f0   : > { %v1437_v55 = vadd.f32 %v1429_v54, %v2111_v61 }
 0x7f2   : > { %v1440_v56 = vpack.c.bf16 %v1437_v55, %v1437_v55 }
 0x7f4   : > { %1444 = vst.msk [vmem:[%s440_s18] sm:$0xf] %vm1443_vm0, %v1440_v56 }
 0x7f5   : > { %v1430_v58 = vpop.f32.mrf.mxu0 }
 0x7f6   : > { %v1431_v59 = vadd.f32 %v1695_v53, %v1430_v58 }
 0x7f8   : > { %v1438_v48 = vadd.f32 %v1431_v59, %v2116_v63 }
 0x7fa   : > { %v1441_v62 = vpack.c.bf16 %v1438_v48, %v1438_v48 }
 0x7fc   : > { %1445 = vst.msk [vmem:[%s440_s18 + $0x4] sm:$0xf] %vm1443_vm0, %v1441_v62 }
 0x7fd   : > { %v1433_v57 = vpop.f32.mrf.mxu0 }
 0x7fe   : > { %v1434_v14 = vadd.f32 %v1695_v53, %v1433_v57 }
 0x800   : > { %v1439_v60 = vadd.f32 %v1434_v14, %v2121_v8 }
 0x802   : > { %v1442_v1 = vpack.c.bf16 %v1439_v60, %v1439_v60 }
 0x804   : > { %1446 = vst.msk [vmem:[%s440_s18 + $0x8] sm:$0xf] %vm1443_vm0, %v1442_v1 }
 0x805   : > { %v1435_v61 = vpop.f32.mrf.mxu0 }
 0x806 PF: > { %s23_s25 = sadd.s32 1, %s1770_s25  }
 0x807   : > { %p20_p4 = scmp.ge.s32.totalorder %s23_s25, 4  }
 0x809   :  { %22 = sbr.rel (!%p20_p4) target bundleno = 1 (0x1), region = 102 }

</bundles_post_ra>
